<compile_context>
chip_gen: v7x
topology: tpu7x:2x2x1
jax: 0.10.0
libtpu: 0.0.40
codegen_flags: <defaults>
</compile_context>

<pallas_src>
import math
import numpy as np
import jax
import jax.numpy as jnp
from jax import lax
from jax.experimental import pallas as pl
from jax.experimental.pallas import tpu as pltpu

_BN_EPS = 1e-5
_OFFS = [(dy, dx) for dy in (-1, 0, 1) for dx in (-1, 0, 1)]   # 3x3 taps, PyTorch order
_CENTER = 4                                                    # (0, 0) tap index
_HALO = 128                                                    # lane-aligned halo width
_VMEM_BUDGET = 32 * 1024 * 1024                                # tile-sizing budget
_VMEM_LIMIT = 48 * 1024 * 1024                                 # < v7x 64 MiB physical


def _gelu_tanh(v):
    # TODO(synk): swap for exact erf GELU if the real MLP uses nn.GELU() default.
    c = 0.7978845608028654  # sqrt(2/pi)
    return 0.5 * v * (1.0 + jnp.tanh(c * (v + 0.044715 * v * v * v)))


def _fold_bn(gamma, beta, mean, var):
    scale = gamma / jnp.sqrt(var + _BN_EPS)
    shift = beta - mean * scale
    return scale.astype(jnp.float32), shift.astype(jnp.float32)


def _choose_block_images(N, HW, Cin, Cout, hidden, block_images):
    """Pick images-per-grid-step from a VMEM budget; pad N so it divides evenly."""
    # B_blk granularity so that P = B_blk * HW is a multiple of 128 lanes.
    gran = 128 // math.gcd(HW, 128)
    # Conservative per-pixel VMEM bytes: double-buffered in/out blocks, bf16/f32 halo
    # pads, f32 tap masks, plus live f32/bf16 intermediates (y, dw, ob, h, mlp).
    per_px = (2 * Cin * 4 + 2 * Cout * 4      # pipelined input / output blocks
              + Cin * 2 + Cout * 4            # padx (bf16) + pady (f32)
              + 9 * 4                         # tap validity masks
              + 6 * hidden + 24 * Cout)       # intermediates (rough upper bound)
    max_blk = max(gran, int(_VMEM_BUDGET // (per_px * HW)) // gran * gran)
    if block_images is not None:
        b = max(gran, (block_images // gran) * gran)
    else:
        b = max_blk
        if N >= 2 * gran:
            # Keep the grid length >= 2 so both v7x TensorCores get work.
            b = min(b, max(gran, ((N // 2) // gran) * gran))
    b = min(b, max_blk)
    b = min(b, max(gran, (-(-N // gran)) * gran))   # never exceed (padded) N
    n_pad = (-(-N // b)) * b
    return b, n_pad


def jconv_pallas(x, params, *, block_images=None):
    """JConv forward pass.  x: (N, C_in, H, W) f32 -> (N, C_out, H, W) f32."""
    (w_ft, g1, b1, m1, v1, w_dw, b_dw, g2, b2, m2, v2,
     w_f1, b_f1, w_f2, b_f2) = params
    N, Cin, H, W = x.shape
    Cout = w_ft.shape[0]
    hidden = w_f1.shape[0]
    HW = H * W

    assert Cin % 8 == 0 and Cout % 8 == 0 and hidden % 8 == 0
    assert W + 1 <= _HALO

    B_blk, N_pad = _choose_block_images(N, HW, Cin, Cout, hidden, block_images)
    P = B_blk * HW
    assert P % 128 == 0

    # ---- fold / reshape parameters into the kernel's (C, lanes) layout --------------
    s1, t1 = _fold_bn(g1, b1, m1, v1)
    s2, t2 = _fold_bn(g2, b2, m2, v2)

    # 3x3 conv weights as per-tap (Cout, Cin) bf16 matrices; tap order matches _OFFS.
    wft3 = jnp.transpose(w_ft, (2, 3, 0, 1)).reshape(9, Cout, Cin).astype(jnp.bfloat16)
    # Depthwise weights as per-tap (Cout, 1) f32 broadcast columns.
    wdw3 = jnp.transpose(w_dw.reshape(Cout, 9), (1, 0))[:, :, None].astype(jnp.float32)
    wf1b = w_f1.astype(jnp.bfloat16)                  # (hidden, Cout)
    wf2b = w_f2.astype(jnp.bfloat16)                  # (Cout, hidden)

    # All small per-channel column vectors stacked into ONE constant (fewer DMA windows).
    colvec = jnp.concatenate([
        s1, t1, b_dw.astype(jnp.float32), s2, t2,
        b_f2.astype(jnp.float32), b_f1.astype(jnp.float32)]).reshape(-1, 1)

    # 9 per-tap validity masks over one block of images (0/1 in f32: applied post-matmul).
    yy, xx = np.meshgrid(np.arange(H), np.arange(W), indexing="ij")
    row = np.tile(yy.reshape(-1), B_blk)
    cc = np.tile(xx.reshape(-1), B_blk)
    mask_np = np.stack(
        [((row + dy >= 0) & (row + dy < H) & (cc + dx >= 0) & (cc + dx < W))
         for (dy, dx) in _OFFS]).astype(np.float32)
    mask3 = jnp.asarray(mask_np.reshape(9, 1, P), dtype=jnp.float32)

    consts = [mask3, wft3, wdw3, colvec, wf1b, wf2b]

    # TODO(synk): fuse these NCHW <-> (C, N*HW) transposes into producer/consumer ops
    #             when JConv is embedded in a larger lane-dense pipeline.
    if N_pad > N:
        x = jnp.pad(x, ((0, N_pad - N), (0, 0), (0, 0), (0, 0)))
    x2d = jnp.transpose(x, (1, 0, 2, 3)).reshape(Cin, N_pad * HW).astype(jnp.float32)

    # ---- the kernel: B_blk whole images per grid step --------------------------------
    def kernel(x_ref, mask_ref, wft_ref, wdw_ref, vec_ref, wf1_ref, wf2_ref,
               out_ref, padx_ref, pady_ref):
        # Zero only the 128-lane halos (the interior is fully overwritten every step).
        zx = jnp.zeros((Cin, _HALO), jnp.bfloat16)
        padx_ref[:, 0:_HALO] = zx
        padx_ref[:, _HALO + P:_HALO + P + _HALO] = zx
        zy = jnp.zeros((Cout, _HALO), jnp.float32)
        pady_ref[:, 0:_HALO] = zy
        pady_ref[:, _HALO + P:_HALO + P + _HALO] = zy

        # ---- feat_trans: 3x3 conv (pad 1, no bias) as 9 per-tap MXU matmuls ---------
        # Convert the input to bf16 ONCE; shifted reads are bf16 views of the pad.
        padx_ref[:, _HALO:_HALO + P] = x_ref[...].astype(jnp.bfloat16)
        y = None
        for k, (dy, dx) in enumerate(_OFFS):
            off = dy * W + dx
            s = padx_ref[:, _HALO + off:_HALO + off + P]          # (Cin, P) bf16
            c = jnp.dot(wft_ref[k], s, preferred_element_type=jnp.float32)
            if k != _CENTER:                     # centre tap mask is all ones -> skip
                c = mask_ref[k] * c              # mask post-matmul: (Cout,P) not (Cin,P)
            y = c if y is None else y + c
        s1c = vec_ref[0 * Cout:1 * Cout]
        t1c = vec_ref[1 * Cout:2 * Cout]
        y = jnp.maximum(y * s1c + t1c, 0.0)      # folded BatchNorm + ReLU, (Cout, P) f32

        # ---- x = y + dwconv(y): depthwise 3x3 + bias, sequential VPU FMAs (f32) -----
        pady_ref[:, _HALO:_HALO + P] = y
        dw = None
        for k, (dy, dx) in enumerate(_OFFS):
            off = dy * W + dx
            t = pady_ref[:, _HALO + off:_HALO + off + P]          # (Cout, P) f32
            if k != _CENTER:
                t = mask_ref[k] * t
            c = wdw_ref[k] * t
            dw = c if dw is None else dw + c
        bdw = vec_ref[2 * Cout:3 * Cout]
        xj = y + dw + bdw

        # ---- out = BN(x); x = x + MLP(out)   (1x1 conv -> GELU -> 1x1 conv) ---------
        s2c = vec_ref[3 * Cout:4 * Cout]
        t2c = vec_ref[4 * Cout:5 * Cout]
        bf2 = vec_ref[5 * Cout:6 * Cout]
        bf1 = vec_ref[6 * Cout:6 * Cout + hidden]
        ob = (xj * s2c + t2c).astype(jnp.bfloat16)
        h = jnp.dot(wf1_ref[...], ob, preferred_element_type=jnp.float32) + bf1
        h = _gelu_tanh(h).astype(jnp.bfloat16)
        mlp = jnp.dot(wf2_ref[...], h, preferred_element_type=jnp.float32) + bf2
        out_ref[...] = xj + mlp

    def full_spec(a):
        nd = a.ndim
        return pl.BlockSpec(a.shape, lambda b, _nd=nd: (0,) * _nd)

    out2d = pl.pallas_call(
        kernel,
        out_shape=jax.ShapeDtypeStruct((Cout, N_pad * HW), jnp.float32),
        grid=(N_pad // B_blk,),
        in_specs=[pl.BlockSpec((Cin, P), lambda b: (0, b))]
                 + [full_spec(c) for c in consts],
        out_specs=pl.BlockSpec((Cout, P), lambda b: (0, b)),
        scratch_shapes=[
            pltpu.VMEM((Cin, P + 2 * _HALO), jnp.bfloat16),        # bf16 zero-halo input pad
            pltpu.VMEM((Cout, P + 2 * _HALO), jnp.float32),        # f32 zero-halo y pad
        ],
        compiler_params=pltpu.CompilerParams(
            dimension_semantics=("parallel",),                     # batch axis -> both TCs on v7x
            vmem_limit_bytes=_VMEM_LIMIT,
        ),
    )(x2d, *consts)

    out = jnp.transpose(out2d.reshape(Cout, N_pad, H, W), (1, 0, 2, 3))
    return out[:N]


# ----------------------------- pure-JAX reference -------------------------------------
def jconv_reference(x, params):
    """XLA reference with matching numerics (bf16 MXU operands, f32 accumulation)."""
    (w_ft, g1, b1, m1, v1, w_dw, b_dw, g2, b2, m2, v2,
     w_f1, b_f1, w_f2, b_f2) = params
    N, _, H, W = x.shape
    Cout = w_ft.shape[0]
    s1, t1 = _fold_bn(g1, b1, m1, v1)
    s2, t2 = _fold_bn(g2, b2, m2, v2)
    dn = ("NCHW", "OIHW", "NCHW")
    bc = lambda v: v[None, :, None, None]

    y = lax.conv_general_dilated(
        x.astype(jnp.bfloat16), w_ft.astype(jnp.bfloat16), (1, 1), "SAME",
        dimension_numbers=dn, preferred_element_type=jnp.float32)
    y = jnp.maximum(y * bc(s1) + bc(t1), 0.0)

    dw = lax.conv_general_dilated(
        y, w_dw, (1, 1), "SAME", dimension_numbers=dn,
        feature_group_count=Cout, precision=lax.Precision.HIGHEST)
    xj = y + dw + bc(b_dw)

    ob = (xj * bc(s2) + bc(t2)).astype(jnp.bfloat16)
    obf = jnp.transpose(ob, (1, 0, 2, 3)).reshape(Cout, -1)
    h = jnp.dot(w_f1.astype(jnp.bfloat16), obf,
                preferred_element_type=jnp.float32) + b_f1[:, None]
    h = _gelu_tanh(h).astype(jnp.bfloat16)
    mlpf = jnp.dot(w_f2.astype(jnp.bfloat16), h,
                   preferred_element_type=jnp.float32) + b_f2[:, None]
    mlp = jnp.transpose(mlpf.reshape(Cout, N, H, W), (1, 0, 2, 3))
    return xj + mlp


# ----------------------------- parameter init -----------------------------------------
def make_params(key, cin, cout, hidden):
    ks = jax.random.split(key, 16)
    w_ft = math.sqrt(2.0 / (cout * 9)) * jax.random.normal(ks[0], (cout, cin, 3, 3), jnp.float32)
    g1 = 1.0 + 0.1 * jax.random.normal(ks[1], (cout,), jnp.float32)
    b1 = 0.1 * jax.random.normal(ks[2], (cout,), jnp.float32)
    m1 = 0.1 * jax.random.normal(ks[3], (cout,), jnp.float32)
    v1 = 1.0 + 0.1 * jnp.abs(jax.random.normal(ks[4], (cout,), jnp.float32))
    w_dw = math.sqrt(2.0 / 9.0) * jax.random.normal(ks[5], (cout, 1, 3, 3), jnp.float32)
    b_dw = 0.05 * jax.random.normal(ks[6], (cout,), jnp.float32)
    g2 = 1.0 + 0.1 * jax.random.normal(ks[7], (cout,), jnp.float32)
    b2 = 0.1 * jax.random.normal(ks[8], (cout,), jnp.float32)
    m2 = 0.1 * jax.random.normal(ks[9], (cout,), jnp.float32)
    v2 = 1.0 + 0.1 * jnp.abs(jax.random.normal(ks[10], (cout,), jnp.float32))
    w_f1 = math.sqrt(2.0 / cout) * jax.random.normal(ks[11], (hidden, cout), jnp.float32)
    b_f1 = 0.05 * jax.random.normal(ks[12], (hidden,), jnp.float32)
    w_f2 = math.sqrt(2.0 / hidden) * jax.random.normal(ks[13], (cout, hidden), jnp.float32)
    b_f2 = 0.05 * jax.random.normal(ks[14], (cout,), jnp.float32)
    return (w_ft, g1, b1, m1, v1, w_dw, b_dw, g2, b2, m2, v2, w_f1, b_f1, w_f2, b_f2)


if __name__ == "__main__":
    key = jax.random.PRNGKey(0)
    kx, kp = jax.random.split(key)

    N, Cin, Cout, H, W = 8, 16, 8, 16, 16       # JConv(16, 8) applied to 8 images of 16x16
    hidden = 4 * Cout                           # SemLA MLP hidden dim = 4 * dim
    x = jax.random.normal(kx, (N, Cin, H, W), jnp.float32)
    params = make_params(kp, Cin, Cout, hidden)

    out = jax.block_until_ready(jconv_pallas(x, params))
    ref = jconv_reference(x, params)

    assert out.shape == (N, Cout, H, W)
    assert bool(jnp.all(jnp.isfinite(out)))
    # bf16 MXU operands at DEFAULT precision in both kernel and reference; remaining
    # differences are f32 accumulation order + rare bf16 re-rounding of intermediates.
    np.testing.assert_allclose(np.asarray(out), np.asarray(ref), atol=1e-2, rtol=1e-2)
    print("KERNEL_OK")
</pallas_src>

<mosaic_0001>
module attributes {stable_mosaic.version = 11 : i64} {
  func.func @kernel(%arg0: i32, %arg1: memref<16x1024xf32, #tpu.memory_space<vmem>>, %arg2: memref<9x1x1024xf32, #tpu.memory_space<vmem>>, %arg3: memref<9x8x16xbf16, #tpu.memory_space<vmem>>, %arg4: memref<9x8x1xf32, #tpu.memory_space<vmem>>, %arg5: memref<80x1xf32, #tpu.memory_space<vmem>>, %arg6: memref<32x8xbf16, #tpu.memory_space<vmem>>, %arg7: memref<8x32xbf16, #tpu.memory_space<vmem>>, %arg8: memref<8x1024xf32, #tpu.memory_space<vmem>>, %arg9: memref<16x1280xbf16, #tpu.memory_space<vmem>>, %arg10: memref<8x1280xf32, #tpu.memory_space<vmem>>) attributes {dimension_semantics = [#tpu.dimension_semantics<parallel>], iteration_bounds = array<i64: 2>, scalar_prefetch = 0 : i64, scratch_operands = 2 : i64, tpu.core_type = #tpu.core_type<tc>, window_params = [{transform_indices = @transform_0, window_bounds = array<i64: 16, 1024>}, {pipeline_mode = #tpu.pipeline_mode<synchronous>, transform_indices = @transform_1, window_bounds = array<i64: 9, 1, 1024>}, {pipeline_mode = #tpu.pipeline_mode<synchronous>, transform_indices = @transform_2, window_bounds = array<i64: 9, 8, 16>}, {pipeline_mode = #tpu.pipeline_mode<synchronous>, transform_indices = @transform_3, window_bounds = array<i64: 9, 8, 1>}, {pipeline_mode = #tpu.pipeline_mode<synchronous>, transform_indices = @transform_4, window_bounds = array<i64: 80, 1>}, {pipeline_mode = #tpu.pipeline_mode<synchronous>, transform_indices = @transform_5, window_bounds = array<i64: 32, 8>}, {pipeline_mode = #tpu.pipeline_mode<synchronous>, transform_indices = @transform_6, window_bounds = array<i64: 8, 32>}, {transform_indices = @transform_7, window_bounds = array<i64: 8, 1024>}]} {
    %cst = arith.constant 0.000000e+00 : bf16
    %0 = vector.broadcast %cst : bf16 to vector<16x128xbf16>
    %c0 = arith.constant 0 : index
    %c0_0 = arith.constant 0 : index
    %1 = vector.load %arg9[%c0, %c0_0] : memref<16x1280xbf16, #tpu.memory_space<vmem>>, vector<16x128xbf16>
    tpu.vector_store %arg9[%c0, %c0_0], %0 {strides = array<i32>} : memref<16x1280xbf16, #tpu.memory_space<vmem>>, vector<16x128xbf16>,
    %c0_1 = arith.constant 0 : index
    %c1152 = arith.constant 1152 : index
    %2 = vector.load %arg9[%c0_1, %c1152] : memref<16x1280xbf16, #tpu.memory_space<vmem>>, vector<16x128xbf16>
    tpu.vector_store %arg9[%c0_1, %c1152], %0 {strides = array<i32>} : memref<16x1280xbf16, #tpu.memory_space<vmem>>, vector<16x128xbf16>,
    %cst_2 = arith.constant 0.000000e+00 : f32
    %3 = vector.broadcast %cst_2 : f32 to vector<8x128xf32>
    %c0_3 = arith.constant 0 : index
    %c0_4 = arith.constant 0 : index
    %4 = vector.load %arg10[%c0_3, %c0_4] : memref<8x1280xf32, #tpu.memory_space<vmem>>, vector<8x128xf32>
    tpu.vector_store %arg10[%c0_3, %c0_4], %3 {strides = array<i32>} : memref<8x1280xf32, #tpu.memory_space<vmem>>, vector<8x128xf32>,
    %c0_5 = arith.constant 0 : index
    %c1152_6 = arith.constant 1152 : index
    %5 = vector.load %arg10[%c0_5, %c1152_6] : memref<8x1280xf32, #tpu.memory_space<vmem>>, vector<8x128xf32>
    tpu.vector_store %arg10[%c0_5, %c1152_6], %3 {strides = array<i32>} : memref<8x1280xf32, #tpu.memory_space<vmem>>, vector<8x128xf32>,
    %c0_7 = arith.constant 0 : index
    %c0_8 = arith.constant 0 : index
    %6 = vector.load %arg1[%c0_7, %c0_8] : memref<16x1024xf32, #tpu.memory_space<vmem>>, vector<16x1024xf32>
    %7 = arith.truncf %6 : vector<16x1024xf32> to vector<16x1024xbf16>
    %c0_9 = arith.constant 0 : index
    %c128 = arith.constant 128 : index
    %8 = vector.load %arg9[%c0_9, %c128] : memref<16x1280xbf16, #tpu.memory_space<vmem>>, vector<16x1024xbf16>
    tpu.vector_store %arg9[%c0_9, %c128], %7 {strides = array<i32>} : memref<16x1280xbf16, #tpu.memory_space<vmem>>, vector<16x1024xbf16>,
    %c0_10 = arith.constant 0 : index
    %c111 = arith.constant 111 : index
    %9 = vector.load %arg9[%c0_10, %c111] : memref<16x1280xbf16, #tpu.memory_space<vmem>>, vector<16x1024xbf16>
    %c0_11 = arith.constant 0 : index
    %c0_12 = arith.constant 0 : index
    %c0_13 = arith.constant 0 : index
    %10 = vector.load %arg3[%c0_11, %c0_12, %c0_13] : memref<9x8x16xbf16, #tpu.memory_space<vmem>>, vector<1x8x16xbf16>
    %11 = vector.shape_cast %10 : vector<1x8x16xbf16> to vector<8x16xbf16>
    %cst_14 = arith.constant dense<0.000000e+00> : vector<8x1024xf32>
    %12 = tpu.matmul %11, %9, %cst_14 {dimension_numbers = #tpu.dot_dimension_numbers<[1], [0], [0], [1], [0, 0, 1, 1], [], []>} : vector<8x16xbf16>, vector<16x1024xbf16>, vector<8x1024xf32> -> vector<8x1024xf32>
    %c0_15 = arith.constant 0 : index
    %c0_16 = arith.constant 0 : index
    %c0_17 = arith.constant 0 : index
    %13 = vector.load %arg2[%c0_15, %c0_16, %c0_17] : memref<9x1x1024xf32, #tpu.memory_space<vmem>>, vector<1x1x1024xf32>
    %14 = vector.shape_cast %13 : vector<1x1x1024xf32> to vector<1x1024xf32>
    %15 = vector.broadcast %14 : vector<1x1024xf32> to vector<8x1024xf32>
    %16 = arith.mulf %15, %12 : vector<8x1024xf32>
    %c0_18 = arith.constant 0 : index
    %c112 = arith.constant 112 : index
    %17 = vector.load %arg9[%c0_18, %c112] : memref<16x1280xbf16, #tpu.memory_space<vmem>>, vector<16x1024xbf16>
    %c1 = arith.constant 1 : index
    %c0_19 = arith.constant 0 : index
    %c0_20 = arith.constant 0 : index
    %18 = vector.load %arg3[%c1, %c0_19, %c0_20] : memref<9x8x16xbf16, #tpu.memory_space<vmem>>, vector<1x8x16xbf16>
    %19 = vector.shape_cast %18 : vector<1x8x16xbf16> to vector<8x16xbf16>
    %cst_21 = arith.constant dense<0.000000e+00> : vector<8x1024xf32>
    %20 = tpu.matmul %19, %17, %cst_21 {dimension_numbers = #tpu.dot_dimension_numbers<[1], [0], [0], [1], [0, 0, 1, 1], [], []>} : vector<8x16xbf16>, vector<16x1024xbf16>, vector<8x1024xf32> -> vector<8x1024xf32>
    %c1_22 = arith.constant 1 : index
    %c0_23 = arith.constant 0 : index
    %c0_24 = arith.constant 0 : index
    %21 = vector.load %arg2[%c1_22, %c0_23, %c0_24] : memref<9x1x1024xf32, #tpu.memory_space<vmem>>, vector<1x1x1024xf32>
    %22 = vector.shape_cast %21 : vector<1x1x1024xf32> to vector<1x1024xf32>
    %23 = vector.broadcast %22 : vector<1x1024xf32> to vector<8x1024xf32>
    %24 = arith.mulf %23, %20 : vector<8x1024xf32>
    %25 = arith.addf %16, %24 : vector<8x1024xf32>
    %c0_25 = arith.constant 0 : index
    %c113 = arith.constant 113 : index
    %26 = vector.load %arg9[%c0_25, %c113] : memref<16x1280xbf16, #tpu.memory_space<vmem>>, vector<16x1024xbf16>
    %c2 = arith.constant 2 : index
    %c0_26 = arith.constant 0 : index
    %c0_27 = arith.constant 0 : index
    %27 = vector.load %arg3[%c2, %c0_26, %c0_27] : memref<9x8x16xbf16, #tpu.memory_space<vmem>>, vector<1x8x16xbf16>
    %28 = vector.shape_cast %27 : vector<1x8x16xbf16> to vector<8x16xbf16>
    %cst_28 = arith.constant dense<0.000000e+00> : vector<8x1024xf32>
    %29 = tpu.matmul %28, %26, %cst_28 {dimension_numbers = #tpu.dot_dimension_numbers<[1], [0], [0], [1], [0, 0, 1, 1], [], []>} : vector<8x16xbf16>, vector<16x1024xbf16>, vector<8x1024xf32> -> vector<8x1024xf32>
    %c2_29 = arith.constant 2 : index
    %c0_30 = arith.constant 0 : index
    %c0_31 = arith.constant 0 : index
    %30 = vector.load %arg2[%c2_29, %c0_30, %c0_31] : memref<9x1x1024xf32, #tpu.memory_space<vmem>>, vector<1x1x1024xf32>
    %31 = vector.shape_cast %30 : vector<1x1x1024xf32> to vector<1x1024xf32>
    %32 = vector.broadcast %31 : vector<1x1024xf32> to vector<8x1024xf32>
    %33 = arith.mulf %32, %29 : vector<8x1024xf32>
    %34 = arith.addf %25, %33 : vector<8x1024xf32>
    %c0_32 = arith.constant 0 : index
    %c127 = arith.constant 127 : index
    %35 = vector.load %arg9[%c0_32, %c127] : memref<16x1280xbf16, #tpu.memory_space<vmem>>, vector<16x1024xbf16>
    %c3 = arith.constant 3 : index
    %c0_33 = arith.constant 0 : index
    %c0_34 = arith.constant 0 : index
    %36 = vector.load %arg3[%c3, %c0_33, %c0_34] : memref<9x8x16xbf16, #tpu.memory_space<vmem>>, vector<1x8x16xbf16>
    %37 = vector.shape_cast %36 : vector<1x8x16xbf16> to vector<8x16xbf16>
    %cst_35 = arith.constant dense<0.000000e+00> : vector<8x1024xf32>
    %38 = tpu.matmul %37, %35, %cst_35 {dimension_numbers = #tpu.dot_dimension_numbers<[1], [0], [0], [1], [0, 0, 1, 1], [], []>} : vector<8x16xbf16>, vector<16x1024xbf16>, vector<8x1024xf32> -> vector<8x1024xf32>
    %c3_36 = arith.constant 3 : index
    %c0_37 = arith.constant 0 : index
    %c0_38 = arith.constant 0 : index
    %39 = vector.load %arg2[%c3_36, %c0_37, %c0_38] : memref<9x1x1024xf32, #tpu.memory_space<vmem>>, vector<1x1x1024xf32>
    %40 = vector.shape_cast %39 : vector<1x1x1024xf32> to vector<1x1024xf32>
    %41 = vector.broadcast %40 : vector<1x1024xf32> to vector<8x1024xf32>
    %42 = arith.mulf %41, %38 : vector<8x1024xf32>
    %43 = arith.addf %34, %42 : vector<8x1024xf32>
    %c0_39 = arith.constant 0 : index
    %c128_40 = arith.constant 128 : index
    %44 = vector.load %arg9[%c0_39, %c128_40] : memref<16x1280xbf16, #tpu.memory_space<vmem>>, vector<16x1024xbf16>
    %c4 = arith.constant 4 : index
    %c0_41 = arith.constant 0 : index
    %c0_42 = arith.constant 0 : index
    %45 = vector.load %arg3[%c4, %c0_41, %c0_42] : memref<9x8x16xbf16, #tpu.memory_space<vmem>>, vector<1x8x16xbf16>
    %46 = vector.shape_cast %45 : vector<1x8x16xbf16> to vector<8x16xbf16>
    %cst_43 = arith.constant dense<0.000000e+00> : vector<8x1024xf32>
    %47 = tpu.matmul %46, %44, %cst_43 {dimension_numbers = #tpu.dot_dimension_numbers<[1], [0], [0], [1], [0, 0, 1, 1], [], []>} : vector<8x16xbf16>, vector<16x1024xbf16>, vector<8x1024xf32> -> vector<8x1024xf32>
    %48 = arith.addf %43, %47 : vector<8x1024xf32>
    %c0_44 = arith.constant 0 : index
    %c129 = arith.constant 129 : index
    %49 = vector.load %arg9[%c0_44, %c129] : memref<16x1280xbf16, #tpu.memory_space<vmem>>, vector<16x1024xbf16>
    %c5 = arith.constant 5 : index
    %c0_45 = arith.constant 0 : index
    %c0_46 = arith.constant 0 : index
    %50 = vector.load %arg3[%c5, %c0_45, %c0_46] : memref<9x8x16xbf16, #tpu.memory_space<vmem>>, vector<1x8x16xbf16>
    %51 = vector.shape_cast %50 : vector<1x8x16xbf16> to vector<8x16xbf16>
    %cst_47 = arith.constant dense<0.000000e+00> : vector<8x1024xf32>
    %52 = tpu.matmul %51, %49, %cst_47 {dimension_numbers = #tpu.dot_dimension_numbers<[1], [0], [0], [1], [0, 0, 1, 1], [], []>} : vector<8x16xbf16>, vector<16x1024xbf16>, vector<8x1024xf32> -> vector<8x1024xf32>
    %c5_48 = arith.constant 5 : index
    %c0_49 = arith.constant 0 : index
    %c0_50 = arith.constant 0 : index
    %53 = vector.load %arg2[%c5_48, %c0_49, %c0_50] : memref<9x1x1024xf32, #tpu.memory_space<vmem>>, vector<1x1x1024xf32>
    %54 = vector.shape_cast %53 : vector<1x1x1024xf32> to vector<1x1024xf32>
    %55 = vector.broadcast %54 : vector<1x1024xf32> to vector<8x1024xf32>
    %56 = arith.mulf %55, %52 : vector<8x1024xf32>
    %57 = arith.addf %48, %56 : vector<8x1024xf32>
    %c0_51 = arith.constant 0 : index
    %c143 = arith.constant 143 : index
    %58 = vector.load %arg9[%c0_51, %c143] : memref<16x1280xbf16, #tpu.memory_space<vmem>>, vector<16x1024xbf16>
    %c6 = arith.constant 6 : index
    %c0_52 = arith.constant 0 : index
    %c0_53 = arith.constant 0 : index
    %59 = vector.load %arg3[%c6, %c0_52, %c0_53] : memref<9x8x16xbf16, #tpu.memory_space<vmem>>, vector<1x8x16xbf16>
    %60 = vector.shape_cast %59 : vector<1x8x16xbf16> to vector<8x16xbf16>
    %cst_54 = arith.constant dense<0.000000e+00> : vector<8x1024xf32>
    %61 = tpu.matmul %60, %58, %cst_54 {dimension_numbers = #tpu.dot_dimension_numbers<[1], [0], [0], [1], [0, 0, 1, 1], [], []>} : vector<8x16xbf16>, vector<16x1024xbf16>, vector<8x1024xf32> -> vector<8x1024xf32>
    %c6_55 = arith.constant 6 : index
    %c0_56 = arith.constant 0 : index
    %c0_57 = arith.constant 0 : index
    %62 = vector.load %arg2[%c6_55, %c0_56, %c0_57] : memref<9x1x1024xf32, #tpu.memory_space<vmem>>, vector<1x1x1024xf32>
    %63 = vector.shape_cast %62 : vector<1x1x1024xf32> to vector<1x1024xf32>
    %64 = vector.broadcast %63 : vector<1x1024xf32> to vector<8x1024xf32>
    %65 = arith.mulf %64, %61 : vector<8x1024xf32>
    %66 = arith.addf %57, %65 : vector<8x1024xf32>
    %c0_58 = arith.constant 0 : index
    %c144 = arith.constant 144 : index
    %67 = vector.load %arg9[%c0_58, %c144] : memref<16x1280xbf16, #tpu.memory_space<vmem>>, vector<16x1024xbf16>
    %c7 = arith.constant 7 : index
    %c0_59 = arith.constant 0 : index
    %c0_60 = arith.constant 0 : index
    %68 = vector.load %arg3[%c7, %c0_59, %c0_60] : memref<9x8x16xbf16, #tpu.memory_space<vmem>>, vector<1x8x16xbf16>
    %69 = vector.shape_cast %68 : vector<1x8x16xbf16> to vector<8x16xbf16>
    %cst_61 = arith.constant dense<0.000000e+00> : vector<8x1024xf32>
    %70 = tpu.matmul %69, %67, %cst_61 {dimension_numbers = #tpu.dot_dimension_numbers<[1], [0], [0], [1], [0, 0, 1, 1], [], []>} : vector<8x16xbf16>, vector<16x1024xbf16>, vector<8x1024xf32> -> vector<8x1024xf32>
    %c7_62 = arith.constant 7 : index
    %c0_63 = arith.constant 0 : index
    %c0_64 = arith.constant 0 : index
    %71 = vector.load %arg2[%c7_62, %c0_63, %c0_64] : memref<9x1x1024xf32, #tpu.memory_space<vmem>>, vector<1x1x1024xf32>
    %72 = vector.shape_cast %71 : vector<1x1x1024xf32> to vector<1x1024xf32>
    %73 = vector.broadcast %72 : vector<1x1024xf32> to vector<8x1024xf32>
    %74 = arith.mulf %73, %70 : vector<8x1024xf32>
    %75 = arith.addf %66, %74 : vector<8x1024xf32>
    %c0_65 = arith.constant 0 : index
    %c145 = arith.constant 145 : index
    %76 = vector.load %arg9[%c0_65, %c145] : memref<16x1280xbf16, #tpu.memory_space<vmem>>, vector<16x1024xbf16>
    %c8 = arith.constant 8 : index
    %c0_66 = arith.constant 0 : index
    %c0_67 = arith.constant 0 : index
    %77 = vector.load %arg3[%c8, %c0_66, %c0_67] : memref<9x8x16xbf16, #tpu.memory_space<vmem>>, vector<1x8x16xbf16>
    %78 = vector.shape_cast %77 : vector<1x8x16xbf16> to vector<8x16xbf16>
    %cst_68 = arith.constant dense<0.000000e+00> : vector<8x1024xf32>
    %79 = tpu.matmul %78, %76, %cst_68 {dimension_numbers = #tpu.dot_dimension_numbers<[1], [0], [0], [1], [0, 0, 1, 1], [], []>} : vector<8x16xbf16>, vector<16x1024xbf16>, vector<8x1024xf32> -> vector<8x1024xf32>
    %c8_69 = arith.constant 8 : index
    %c0_70 = arith.constant 0 : index
    %c0_71 = arith.constant 0 : index
    %80 = vector.load %arg2[%c8_69, %c0_70, %c0_71] : memref<9x1x1024xf32, #tpu.memory_space<vmem>>, vector<1x1x1024xf32>
    %81 = vector.shape_cast %80 : vector<1x1x1024xf32> to vector<1x1024xf32>
    %82 = vector.broadcast %81 : vector<1x1024xf32> to vector<8x1024xf32>
    %83 = arith.mulf %82, %79 : vector<8x1024xf32>
    %84 = arith.addf %75, %83 : vector<8x1024xf32>
    %c0_72 = arith.constant 0 : index
    %c0_73 = arith.constant 0 : index
    %85 = vector.load %arg5[%c0_72, %c0_73] : memref<80x1xf32, #tpu.memory_space<vmem>>, vector<8x1xf32>
    %c8_74 = arith.constant 8 : index
    %c0_75 = arith.constant 0 : index
    %86 = vector.load %arg5[%c8_74, %c0_75] : memref<80x1xf32, #tpu.memory_space<vmem>>, vector<8x1xf32>
    %87 = vector.broadcast %85 : vector<8x1xf32> to vector<8x1024xf32>
    %88 = arith.mulf %84, %87 : vector<8x1024xf32>
    %89 = vector.broadcast %86 : vector<8x1xf32> to vector<8x1024xf32>
    %90 = arith.addf %88, %89 : vector<8x1024xf32>
    %cst_76 = arith.constant 0.000000e+00 : f32
    %91 = vector.broadcast %cst_76 : f32 to vector<8x1024xf32>
    %92 = arith.maximumf %90, %91 : vector<8x1024xf32>
    %c0_77 = arith.constant 0 : index
    %c128_78 = arith.constant 128 : index
    %93 = vector.load %arg10[%c0_77, %c128_78] : memref<8x1280xf32, #tpu.memory_space<vmem>>, vector<8x1024xf32>
    tpu.vector_store %arg10[%c0_77, %c128_78], %92 {strides = array<i32>} : memref<8x1280xf32, #tpu.memory_space<vmem>>, vector<8x1024xf32>,
    %c0_79 = arith.constant 0 : index
    %c111_80 = arith.constant 111 : index
    %94 = vector.load %arg10[%c0_79, %c111_80] : memref<8x1280xf32, #tpu.memory_space<vmem>>, vector<8x1024xf32>
    %c0_81 = arith.constant 0 : index
    %c0_82 = arith.constant 0 : index
    %c0_83 = arith.constant 0 : index
    %95 = vector.load %arg2[%c0_81, %c0_82, %c0_83] : memref<9x1x1024xf32, #tpu.memory_space<vmem>>, vector<1x1x1024xf32>
    %96 = vector.shape_cast %95 : vector<1x1x1024xf32> to vector<1x1024xf32>
    %97 = vector.broadcast %96 : vector<1x1024xf32> to vector<8x1024xf32>
    %98 = arith.mulf %97, %94 : vector<8x1024xf32>
    %c0_84 = arith.constant 0 : index
    %c0_85 = arith.constant 0 : index
    %c0_86 = arith.constant 0 : index
    %99 = vector.load %arg4[%c0_84, %c0_85, %c0_86] : memref<9x8x1xf32, #tpu.memory_space<vmem>>, vector<1x8x1xf32>
    %100 = vector.shape_cast %99 : vector<1x8x1xf32> to vector<8x1xf32>
    %101 = vector.broadcast %100 : vector<8x1xf32> to vector<8x1024xf32>
    %102 = arith.mulf %101, %98 : vector<8x1024xf32>
    %c0_87 = arith.constant 0 : index
    %c112_88 = arith.constant 112 : index
    %103 = vector.load %arg10[%c0_87, %c112_88] : memref<8x1280xf32, #tpu.memory_space<vmem>>, vector<8x1024xf32>
    %c1_89 = arith.constant 1 : index
    %c0_90 = arith.constant 0 : index
    %c0_91 = arith.constant 0 : index
    %104 = vector.load %arg2[%c1_89, %c0_90, %c0_91] : memref<9x1x1024xf32, #tpu.memory_space<vmem>>, vector<1x1x1024xf32>
    %105 = vector.shape_cast %104 : vector<1x1x1024xf32> to vector<1x1024xf32>
    %106 = vector.broadcast %105 : vector<1x1024xf32> to vector<8x1024xf32>
    %107 = arith.mulf %106, %103 : vector<8x1024xf32>
    %c1_92 = arith.constant 1 : index
    %c0_93 = arith.constant 0 : index
    %c0_94 = arith.constant 0 : index
    %108 = vector.load %arg4[%c1_92, %c0_93, %c0_94] : memref<9x8x1xf32, #tpu.memory_space<vmem>>, vector<1x8x1xf32>
    %109 = vector.shape_cast %108 : vector<1x8x1xf32> to vector<8x1xf32>
    %110 = vector.broadcast %109 : vector<8x1xf32> to vector<8x1024xf32>
    %111 = arith.mulf %110, %107 : vector<8x1024xf32>
    %112 = arith.addf %102, %111 : vector<8x1024xf32>
    %c0_95 = arith.constant 0 : index
    %c113_96 = arith.constant 113 : index
    %113 = vector.load %arg10[%c0_95, %c113_96] : memref<8x1280xf32, #tpu.memory_space<vmem>>, vector<8x1024xf32>
    %c2_97 = arith.constant 2 : index
    %c0_98 = arith.constant 0 : index
    %c0_99 = arith.constant 0 : index
    %114 = vector.load %arg2[%c2_97, %c0_98, %c0_99] : memref<9x1x1024xf32, #tpu.memory_space<vmem>>, vector<1x1x1024xf32>
    %115 = vector.shape_cast %114 : vector<1x1x1024xf32> to vector<1x1024xf32>
    %116 = vector.broadcast %115 : vector<1x1024xf32> to vector<8x1024xf32>
    %117 = arith.mulf %116, %113 : vector<8x1024xf32>
    %c2_100 = arith.constant 2 : index
    %c0_101 = arith.constant 0 : index
    %c0_102 = arith.constant 0 : index
    %118 = vector.load %arg4[%c2_100, %c0_101, %c0_102] : memref<9x8x1xf32, #tpu.memory_space<vmem>>, vector<1x8x1xf32>
    %119 = vector.shape_cast %118 : vector<1x8x1xf32> to vector<8x1xf32>
    %120 = vector.broadcast %119 : vector<8x1xf32> to vector<8x1024xf32>
    %121 = arith.mulf %120, %117 : vector<8x1024xf32>
    %122 = arith.addf %112, %121 : vector<8x1024xf32>
    %c0_103 = arith.constant 0 : index
    %c127_104 = arith.constant 127 : index
    %123 = vector.load %arg10[%c0_103, %c127_104] : memref<8x1280xf32, #tpu.memory_space<vmem>>, vector<8x1024xf32>
    %c3_105 = arith.constant 3 : index
    %c0_106 = arith.constant 0 : index
    %c0_107 = arith.constant 0 : index
    %124 = vector.load %arg2[%c3_105, %c0_106, %c0_107] : memref<9x1x1024xf32, #tpu.memory_space<vmem>>, vector<1x1x1024xf32>
    %125 = vector.shape_cast %124 : vector<1x1x1024xf32> to vector<1x1024xf32>
    %126 = vector.broadcast %125 : vector<1x1024xf32> to vector<8x1024xf32>
    %127 = arith.mulf %126, %123 : vector<8x1024xf32>
    %c3_108 = arith.constant 3 : index
    %c0_109 = arith.constant 0 : index
    %c0_110 = arith.constant 0 : index
    %128 = vector.load %arg4[%c3_108, %c0_109, %c0_110] : memref<9x8x1xf32, #tpu.memory_space<vmem>>, vector<1x8x1xf32>
    %129 = vector.shape_cast %128 : vector<1x8x1xf32> to vector<8x1xf32>
    %130 = vector.broadcast %129 : vector<8x1xf32> to vector<8x1024xf32>
    %131 = arith.mulf %130, %127 : vector<8x1024xf32>
    %132 = arith.addf %122, %131 : vector<8x1024xf32>
    %c0_111 = arith.constant 0 : index
    %c128_112 = arith.constant 128 : index
    %133 = vector.load %arg10[%c0_111, %c128_112] : memref<8x1280xf32, #tpu.memory_space<vmem>>, vector<8x1024xf32>
    %c4_113 = arith.constant 4 : index
    %c0_114 = arith.constant 0 : index
    %c0_115 = arith.constant 0 : index
    %134 = vector.load %arg4[%c4_113, %c0_114, %c0_115] : memref<9x8x1xf32, #tpu.memory_space<vmem>>, vector<1x8x1xf32>
    %135 = vector.shape_cast %134 : vector<1x8x1xf32> to vector<8x1xf32>
    %136 = vector.broadcast %135 : vector<8x1xf32> to vector<8x1024xf32>
    %137 = arith.mulf %136, %133 : vector<8x1024xf32>
    %138 = arith.addf %132, %137 : vector<8x1024xf32>
    %c0_116 = arith.constant 0 : index
    %c129_117 = arith.constant 129 : index
    %139 = vector.load %arg10[%c0_116, %c129_117] : memref<8x1280xf32, #tpu.memory_space<vmem>>, vector<8x1024xf32>
    %c5_118 = arith.constant 5 : index
    %c0_119 = arith.constant 0 : index
    %c0_120 = arith.constant 0 : index
    %140 = vector.load %arg2[%c5_118, %c0_119, %c0_120] : memref<9x1x1024xf32, #tpu.memory_space<vmem>>, vector<1x1x1024xf32>
    %141 = vector.shape_cast %140 : vector<1x1x1024xf32> to vector<1x1024xf32>
    %142 = vector.broadcast %141 : vector<1x1024xf32> to vector<8x1024xf32>
    %143 = arith.mulf %142, %139 : vector<8x1024xf32>
    %c5_121 = arith.constant 5 : index
    %c0_122 = arith.constant 0 : index
    %c0_123 = arith.constant 0 : index
    %144 = vector.load %arg4[%c5_121, %c0_122, %c0_123] : memref<9x8x1xf32, #tpu.memory_space<vmem>>, vector<1x8x1xf32>
    %145 = vector.shape_cast %144 : vector<1x8x1xf32> to vector<8x1xf32>
    %146 = vector.broadcast %145 : vector<8x1xf32> to vector<8x1024xf32>
    %147 = arith.mulf %146, %143 : vector<8x1024xf32>
    %148 = arith.addf %138, %147 : vector<8x1024xf32>
    %c0_124 = arith.constant 0 : index
    %c143_125 = arith.constant 143 : index
    %149 = vector.load %arg10[%c0_124, %c143_125] : memref<8x1280xf32, #tpu.memory_space<vmem>>, vector<8x1024xf32>
    %c6_126 = arith.constant 6 : index
    %c0_127 = arith.constant 0 : index
    %c0_128 = arith.constant 0 : index
    %150 = vector.load %arg2[%c6_126, %c0_127, %c0_128] : memref<9x1x1024xf32, #tpu.memory_space<vmem>>, vector<1x1x1024xf32>
    %151 = vector.shape_cast %150 : vector<1x1x1024xf32> to vector<1x1024xf32>
    %152 = vector.broadcast %151 : vector<1x1024xf32> to vector<8x1024xf32>
    %153 = arith.mulf %152, %149 : vector<8x1024xf32>
    %c6_129 = arith.constant 6 : index
    %c0_130 = arith.constant 0 : index
    %c0_131 = arith.constant 0 : index
    %154 = vector.load %arg4[%c6_129, %c0_130, %c0_131] : memref<9x8x1xf32, #tpu.memory_space<vmem>>, vector<1x8x1xf32>
    %155 = vector.shape_cast %154 : vector<1x8x1xf32> to vector<8x1xf32>
    %156 = vector.broadcast %155 : vector<8x1xf32> to vector<8x1024xf32>
    %157 = arith.mulf %156, %153 : vector<8x1024xf32>
    %158 = arith.addf %148, %157 : vector<8x1024xf32>
    %c0_132 = arith.constant 0 : index
    %c144_133 = arith.constant 144 : index
    %159 = vector.load %arg10[%c0_132, %c144_133] : memref<8x1280xf32, #tpu.memory_space<vmem>>, vector<8x1024xf32>
    %c7_134 = arith.constant 7 : index
    %c0_135 = arith.constant 0 : index
    %c0_136 = arith.constant 0 : index
    %160 = vector.load %arg2[%c7_134, %c0_135, %c0_136] : memref<9x1x1024xf32, #tpu.memory_space<vmem>>, vector<1x1x1024xf32>
    %161 = vector.shape_cast %160 : vector<1x1x1024xf32> to vector<1x1024xf32>
    %162 = vector.broadcast %161 : vector<1x1024xf32> to vector<8x1024xf32>
    %163 = arith.mulf %162, %159 : vector<8x1024xf32>
    %c7_137 = arith.constant 7 : index
    %c0_138 = arith.constant 0 : index
    %c0_139 = arith.constant 0 : index
    %164 = vector.load %arg4[%c7_137, %c0_138, %c0_139] : memref<9x8x1xf32, #tpu.memory_space<vmem>>, vector<1x8x1xf32>
    %165 = vector.shape_cast %164 : vector<1x8x1xf32> to vector<8x1xf32>
    %166 = vector.broadcast %165 : vector<8x1xf32> to vector<8x1024xf32>
    %167 = arith.mulf %166, %163 : vector<8x1024xf32>
    %168 = arith.addf %158, %167 : vector<8x1024xf32>
    %c0_140 = arith.constant 0 : index
    %c145_141 = arith.constant 145 : index
    %169 = vector.load %arg10[%c0_140, %c145_141] : memref<8x1280xf32, #tpu.memory_space<vmem>>, vector<8x1024xf32>
    %c8_142 = arith.constant 8 : index
    %c0_143 = arith.constant 0 : index
    %c0_144 = arith.constant 0 : index
    %170 = vector.load %arg2[%c8_142, %c0_143, %c0_144] : memref<9x1x1024xf32, #tpu.memory_space<vmem>>, vector<1x1x1024xf32>
    %171 = vector.shape_cast %170 : vector<1x1x1024xf32> to vector<1x1024xf32>
    %172 = vector.broadcast %171 : vector<1x1024xf32> to vector<8x1024xf32>
    %173 = arith.mulf %172, %169 : vector<8x1024xf32>
    %c8_145 = arith.constant 8 : index
    %c0_146 = arith.constant 0 : index
    %c0_147 = arith.constant 0 : index
    %174 = vector.load %arg4[%c8_145, %c0_146, %c0_147] : memref<9x8x1xf32, #tpu.memory_space<vmem>>, vector<1x8x1xf32>
    %175 = vector.shape_cast %174 : vector<1x8x1xf32> to vector<8x1xf32>
    %176 = vector.broadcast %175 : vector<8x1xf32> to vector<8x1024xf32>
    %177 = arith.mulf %176, %173 : vector<8x1024xf32>
    %178 = arith.addf %168, %177 : vector<8x1024xf32>
    %c16 = arith.constant 16 : index
    %c0_148 = arith.constant 0 : index
    %179 = vector.load %arg5[%c16, %c0_148] : memref<80x1xf32, #tpu.memory_space<vmem>>, vector<8x1xf32>
    %180 = arith.addf %92, %178 : vector<8x1024xf32>
    %181 = vector.broadcast %179 : vector<8x1xf32> to vector<8x1024xf32>
    %182 = arith.addf %180, %181 : vector<8x1024xf32>
    %c24 = arith.constant 24 : index
    %c0_149 = arith.constant 0 : index
    %183 = vector.load %arg5[%c24, %c0_149] : memref<80x1xf32, #tpu.memory_space<vmem>>, vector<8x1xf32>
    %c32 = arith.constant 32 : index
    %c0_150 = arith.constant 0 : index
    %184 = vector.load %arg5[%c32, %c0_150] : memref<80x1xf32, #tpu.memory_space<vmem>>, vector<8x1xf32>
    %c40 = arith.constant 40 : index
    %c0_151 = arith.constant 0 : index
    %185 = vector.load %arg5[%c40, %c0_151] : memref<80x1xf32, #tpu.memory_space<vmem>>, vector<8x1xf32>
    %c48 = arith.constant 48 : index
    %c0_152 = arith.constant 0 : index
    %186 = vector.load %arg5[%c48, %c0_152] : memref<80x1xf32, #tpu.memory_space<vmem>>, vector<32x1xf32>
    %187 = vector.broadcast %183 : vector<8x1xf32> to vector<8x1024xf32>
    %188 = arith.mulf %182, %187 : vector<8x1024xf32>
    %189 = vector.broadcast %184 : vector<8x1xf32> to vector<8x1024xf32>
    %190 = arith.addf %188, %189 : vector<8x1024xf32>
    %191 = arith.truncf %190 : vector<8x1024xf32> to vector<8x1024xbf16>
    %c0_153 = arith.constant 0 : index
    %c0_154 = arith.constant 0 : index
    %192 = vector.load %arg6[%c0_153, %c0_154] : memref<32x8xbf16, #tpu.memory_space<vmem>>, vector<32x8xbf16>
    %cst_155 = arith.constant dense<0.000000e+00> : vector<32x1024xf32>
    %193 = tpu.matmul %192, %191, %cst_155 {dimension_numbers = #tpu.dot_dimension_numbers<[1], [0], [0], [1], [0, 0, 1, 1], [], []>} : vector<32x8xbf16>, vector<8x1024xbf16>, vector<32x1024xf32> -> vector<32x1024xf32>
    %194 = vector.broadcast %186 : vector<32x1xf32> to vector<32x1024xf32>
    %195 = arith.addf %193, %194 : vector<32x1024xf32>
    %cst_156 = arith.constant 5.000000e-01 : f32
    %196 = vector.broadcast %cst_156 : f32 to vector<32x1024xf32>
    %197 = arith.mulf %196, %195 : vector<32x1024xf32>
    %cst_157 = arith.constant 4.471500e-02 : f32
    %198 = vector.broadcast %cst_157 : f32 to vector<32x1024xf32>
    %199 = arith.mulf %198, %195 : vector<32x1024xf32>
    %200 = arith.mulf %199, %195 : vector<32x1024xf32>
    %201 = arith.mulf %200, %195 : vector<32x1024xf32>
    %202 = arith.addf %195, %201 : vector<32x1024xf32>
    %cst_158 = arith.constant 0.797884583 : f32
    %203 = vector.broadcast %cst_158 : f32 to vector<32x1024xf32>
    %204 = arith.mulf %203, %202 : vector<32x1024xf32>
    %205 = math.tanh %204 : vector<32x1024xf32>
    %cst_159 = arith.constant 1.000000e+00 : f32
    %206 = vector.broadcast %cst_159 : f32 to vector<32x1024xf32>
    %207 = arith.addf %206, %205 : vector<32x1024xf32>
    %208 = arith.mulf %197, %207 : vector<32x1024xf32>
    %209 = arith.truncf %208 : vector<32x1024xf32> to vector<32x1024xbf16>
    %c0_160 = arith.constant 0 : index
    %c0_161 = arith.constant 0 : index
    %210 = vector.load %arg7[%c0_160, %c0_161] : memref<8x32xbf16, #tpu.memory_space<vmem>>, vector<8x32xbf16>
    %cst_162 = arith.constant dense<0.000000e+00> : vector<8x1024xf32>
    %211 = tpu.matmul %210, %209, %cst_162 {dimension_numbers = #tpu.dot_dimension_numbers<[1], [0], [0], [1], [0, 0, 1, 1], [], []>} : vector<8x32xbf16>, vector<32x1024xbf16>, vector<8x1024xf32> -> vector<8x1024xf32>
    %212 = vector.broadcast %185 : vector<8x1xf32> to vector<8x1024xf32>
    %213 = arith.addf %211, %212 : vector<8x1024xf32>
    %214 = arith.addf %182, %213 : vector<8x1024xf32>
    %c0_163 = arith.constant 0 : index
    %c0_164 = arith.constant 0 : index
    %215 = vector.load %arg8[%c0_163, %c0_164] : memref<8x1024xf32, #tpu.memory_space<vmem>>, vector<8x1024xf32>
    tpu.vector_store %arg8[%c0_163, %c0_164], %214 {strides = array<i32>} : memref<8x1024xf32, #tpu.memory_space<vmem>>, vector<8x1024xf32>,
    return
  }
  func.func @transform_0(%arg0: i32) -> (i32, i32) {
    %c0_i32 = arith.constant 0 : i32
    %c0_i32_0 = arith.constant 0 : i32
    return %c0_i32, %arg0 : i32, i32
  }
  func.func @transform_1(%arg0: i32) -> (i32, i32, i32) {
    %c0_i32 = arith.constant 0 : i32
    %c0_i32_0 = arith.constant 0 : i32
    %c0_i32_1 = arith.constant 0 : i32
    %c0_i32_2 = arith.constant 0 : i32
    return %c0_i32, %c0_i32_0, %c0_i32_1 : i32, i32, i32
  }
  func.func @transform_2(%arg0: i32) -> (i32, i32, i32) {
    %c0_i32 = arith.constant 0 : i32
    %c0_i32_0 = arith.constant 0 : i32
    %c0_i32_1 = arith.constant 0 : i32
    %c0_i32_2 = arith.constant 0 : i32
    return %c0_i32, %c0_i32_0, %c0_i32_1 : i32, i32, i32
  }
  func.func @transform_3(%arg0: i32) -> (i32, i32, i32) {
    %c0_i32 = arith.constant 0 : i32
    %c0_i32_0 = arith.constant 0 : i32
    %c0_i32_1 = arith.constant 0 : i32
    %c0_i32_2 = arith.constant 0 : i32
    return %c0_i32, %c0_i32_0, %c0_i32_1 : i32, i32, i32
  }
  func.func @transform_4(%arg0: i32) -> (i32, i32) {
    %c0_i32 = arith.constant 0 : i32
    %c0_i32_0 = arith.constant 0 : i32
    %c0_i32_1 = arith.constant 0 : i32
    return %c0_i32, %c0_i32_0 : i32, i32
  }
  func.func @transform_5(%arg0: i32) -> (i32, i32) {
    %c0_i32 = arith.constant 0 : i32
    %c0_i32_0 = arith.constant 0 : i32
    %c0_i32_1 = arith.constant 0 : i32
    return %c0_i32, %c0_i32_0 : i32, i32
  }
  func.func @transform_6(%arg0: i32) -> (i32, i32) {
    %c0_i32 = arith.constant 0 : i32
    %c0_i32_0 = arith.constant 0 : i32
    %c0_i32_1 = arith.constant 0 : i32
    return %c0_i32, %c0_i32_0 : i32, i32
  }
  func.func @transform_7(%arg0: i32) -> (i32, i32) {
    %c0_i32 = arith.constant 0 : i32
    %c0_i32_0 = arith.constant 0 : i32
    return %c0_i32, %arg0 : i32, i32
  }
}

</mosaic_0001>

<bundles_post_ra>
// kernel: tpu_custom_call.1
= control target key start
LH: loop header
LB: loop body
LE: loop exit
PB: predicated region body
PF: predicated region fallthrough
CT: control target
= control target key end

     0   :  { %12 = vsyncpa [#allocation5], 0  ;;  %s6697_s0 = inlined_call_operand.hbm [shape: f32[16,2048], index: 0, kind: input, shape index: {}]   ;;  %s6698_s1 = inlined_call_operand.vmem [shape: f32[9,1,1024], index: 1, kind: input, shape index: {}]   ;;  %s6699_s2 = inlined_call_operand.vmem [shape: bf16[9,8,16], index: 2, kind: input, shape index: {}]   ;;  %s6700_s3 = inlined_call_operand.vmem [shape: f32[9,8,1], index: 3, kind: input, shape index: {}]   ;;  %s6701_s4 = inlined_call_operand.vmem [shape: f32[80,1], index: 4, kind: input, shape index: {}]   ;;  %s6702_s5 = inlined_call_operand.vmem [shape: bf16[32,8], index: 5, kind: input, shape index: {}]   ;;  %s6703_s6 = inlined_call_operand.vmem [shape: bf16[8,32], index: 6, kind: input, shape index: {}]   ;;  %s6704_s7 = inlined_call_operand.hbm [shape: f32[8,2048], index: 7, kind: output, shape index: {}]  }
   0x1   :  { %14 = vsyncpa [#allocation5 + $0x1], 0 }
   0x2   :  { %15 = vsyncpa [#allocation6], 0 }
   0x3   :  { %17 = vsyncpa [#allocation6 + $0x1], 0  ;;  %s4908_s24 = smov 0   ;;  %s4910_s25 = smov 0  }
   0x4   :  { %s4912_s26 = smov 0   ;;  %s4914_s27 = smov 0  }
   0x5 LB: > { %s4929_s28 = sadd.s32 4294967295, %s4851_s27   ;;  %s4521_s29 = sadd.s32 4294967294, %s4851_s27   ;;  %s4851_s27 = sphi %s4914_s27, %s6865_s27   ;;  %s4847_s26 = sphi %s4912_s26, %s6864_s26   ;;  %s4843_s25 = sphi %s4910_s25, %s6863_s25   ;;  %s4839_s24 = sphi %s4908_s24, %s6862_s24  }
   0x6   : > { %s4933_s30 = sadd.s32 1, %s4851_s27   ;;  %s30_s8 = sadd.s32 1, %s4847_s26 }
   0x7   : > { %s27_s9 = ssub.s32 %s4851_s27, %s4933_s30  ;;  %p37_p0 = scmp.ne.s32.totalorder %s4847_s26, %s4843_s25 }
   0x8   : > { %p28_p1 = scmp.eq.s32.totalorder %s27_s9, 0  ;;  %p38_p2 = scmp.eq.s32.totalorder %s4851_s27, 0 }
   0x9   : > { %p43_p3 = scmp.ne.s32.totalorder %s4843_s25, %s4839_s24  ;;  %p44_p4 = scmp.eq.s32.totalorder %s4929_s28, 0 }
   0xa   : > { %s4945_s10 = scalar_select %p28_p1, %s4847_s26, %s30_s8  }
   0xb   : > { %p4947_p5 = por %p38_p2, %p37_p0  ;;  %p4951_p6 = por %p44_p4, %p43_p3 }
   0xc   : > { %p193_p7 = scmp.eq.s32.totalorder %s4929_s28, 1  ;;  %p199_p8 = scmp.eq.s32.totalorder %s4521_s29, 1 }
   0xd   : > { %p4633_p10 = scmp.lt.s32.totalorder %s4851_s27, 2  ;;  %s237_s15 = sand.u32 1, %s4847_s26  }
   0xe   : > { %p4958_p11 = por %p193_p7, %p37_p0  ;;  %p4962_p12 = por %p199_p8, %p43_p3 }
   0xf   : > { %s4619_s16 = sshll.u32 %s4851_s27, 10  ;;  %s4524_s17 = sshll.u32 %s237_s15, 7 }
  0x10   : > { %s6764_s13 = scalar_select %p4958_p11, 1, 0 }
  0x11   : > { %s6765_s14 = scalar_select %p4962_p12, 1, 0 }
  0x12   : > { %s4971_s20 = scalar_lea.hbm %s6697_s0, %s4619_s16  ;;  %s241_s21 = scalar_lea.vmem [#allocation4], %s4524_s17 }
  0x13   : > { %s248_s22 = sshll.u32 %s241_s21, 4  ;;  %p4975_p13 = pnand %p4633_p10, %p4947_p5  ;;  %s4979_s22 = int_to_ptr.vmem [resolvable:$true] %s248_s22 }
  0x14   : > { %s4982_s29 = scalar_lea.sflag [#allocation5], %s237_s15  ;;  %s4755_s8 = scalar_lea.hbm %s4971_s20, 2048 }
  0x15   : > { %p4756_p1 = scmp.ne.s32.totalorder %s4971_s20, %s4755_s8  ;;  %p4757_p2 = pneg %p4975_p13 }
  0x16   : > { %s4760_s16 = scalar_lea.hbm %s6697_s0, 4096  ;;  %p4761_p5 = scmp.lt.u32.totalorder %s4971_s20, %s6697_s0 }
  0x17   : > { %p4758_p3 = pnand %p4757_p2, %p4756_p1  ;;  %p4762_p7 = scmp.lt.u32.totalorder %s4760_s16, %s4755_s8 }
  0x18   : > { %p4764_p10 = scmp.lt.u32.totalorder %s4755_s8, %s4971_s20 }
  0x19   : > { %p4759_p4 = pneg %p4758_p3  ;;  %p4763_p8 = por %p4762_p7, %p4761_p5 }
  0x1b   : > { %p4765_p9 = por %p4764_p10, %p4763_p8 }
  0x1d   : > { %p4766_p0 = pnand %p4765_p9, %p4759_p4 }
  0x1f   : > { %4769 = shalt.err (!%p4766_p0)
}
  0x20   : > { %s4770_s15 = scalar_lea.vmem %s4979_s22, 2048  ;;  %s4853_s19 = smov [#allocation4]  }
  0x21   : > { %p4771_p1 = scmp.ne.s32.totalorder %s4979_s22, %s4770_s15  ;;  %s4775_s21 = sshll.u32 %s4853_s19, 4  ;;  %s4776_s21 = int_to_ptr.vmem [resolvable:$false] %s4775_s21 }
  0x22   : > { %s4777_s9 = scalar_lea.vmem %s4776_s21, 4096  ;;  %p4778_p11 = scmp.lt.s32.totalorder %s4979_s22, %s4776_s21 }
  0x23   : > { %p4773_p3 = pnand %p4771_p1, %p4757_p2  ;;  %p4779_p5 = scmp.lt.s32.totalorder %s4777_s9, %s4770_s15 }
  0x25   : > { %p4774_p12 = pneg %p4773_p3  ;;  %p4780_p7 = por %p4779_p5, %p4778_p11 }
  0x27   : > { %p4781_p8 = pnand %p4780_p7, %p4774_p12 }
  0x29   : > { %4784 = shalt.err (!%p4781_p8)
}
  0x2a   : > { %s4854_s8 = smov 2048   ;;  %s4855_s11 = smov 1024  }
  0x2b   : > { %s4856_s16 = smov 64   ;;  %p256_p9 = scmp.lt.s32.totalorder %s4851_s27, 3 }
  0x2c   : > { %4628 = dma.hbm_to_vmem [thread:$0]  (!%p4975_p13), %s4971_s20, 2048, %s4979_s22, %s4982_s29, %s4854_s8, %s4855_s11, %s4856_s16  }
  0x2d   : > { %p6767_p0 = scmp.ge.s32.totalorder %s4851_s27, 1 }
  0x2f   : > { %p257_p2 = pnand %p6767_p0, %p256_p9 }
  0x31   : > { %260 = sbr.rel (%p257_p2) target bundleno = 1305 (0x519), region = 48 }
  0x38   : > { %s5014_s17 = sand.u32 1, %s4843_s25  }
  0x39   : > { %s4528_s18 = sshll.u32 %s5014_s17, 7  ;;  %s263_s15 = scalar_lea.sflag [#allocation5], %s5014_s17 }
  0x3a   : > { %s5018_s19 = scalar_lea.vmem [#allocation4], %s4528_s18 }
  0x3b   : > { %4830 = dma.done.wait (%p4951_p6), %s263_s15, 2048  }
  0x3c   : > { %4832 = vsyncadd (%p4951_p6), %s263_s15, 4294965248  ;;  %v6708_v0 = vmov 0   ;;  %s4858_s20 = smov 17   ;;  %v306_v1 = vld [vmem:[%s5018_s19 + $0x10] sm:$0xff]  ;;  %v304_v3 = vld [vmem:[%s5018_s19] sm:$0xff]  ;;  %s4859_s12 = smov 16  }
  0x3d   : > { %355 = vrot.lane.b32.xlu0 %v6708_v0, %s4858_s20  ;;  %467 = vmatprep.mubr.bf16.mxu1 %v6708_v0  ;;  %v314_v2 = vld [vmem:[%s5018_s19 + $0x50] sm:$0xff]  ;;  %v312_v5 = vld [vmem:[%s5018_s19 + $0x40] sm:$0xff]  ;;  %v307_v6 = vld [vmem:[%s5018_s19 + $0x18] sm:$0xff]  ;;  %s4860_s22 = smov 15   ;;  %s4861_s23 = smov 1   ;;  %vm373_vm0 = vcmask 138240  }
  0x3e   : > { %426 = vmatprep.mubr.bf16.mxu0 %v6708_v0  ;;  %4681 = vset.pattern.permute.xlu1 %v6708_v0  ;;  %v5033_v4 = vpack.c.bf16 %v314_v2, %v306_v1  ;;  %v315_v7 = vld [vmem:[%s5018_s19 + $0x58] sm:$0xff]  ;;  %v5038_v8 = vpack.c.bf16 %v312_v5, %v304_v3  ;;  %v305_v9 = vld [vmem:[%s5018_s19 + $0x8] sm:$0xff]  ;;  %v308_v13 = vld [vmem:[%s5018_s19 + $0x20] sm:$0xff]  ;;  %s4862_s29 = smov 127   ;;  %s4863_s21 = smov 113   ;;  %vm390_vm1 = vcmask 130048  }
  0x3f   : > { %4680 = vset.pattern.permute.xlu0 %v6708_v0  ;;  %v313_v10 = vld [vmem:[%s5018_s19 + $0x48] sm:$0xff]  ;;  %v5044_v11 = vpack.c.bf16 %v315_v7, %v307_v6  ;;  %v316_v14 = vld [vmem:[%s5018_s19 + $0x60] sm:$0xff]  ;;  %v310_v19 = vld [vmem:[%s5018_s19 + $0x30] sm:$0xff]  ;;  %s6706_s9 = smov 112   ;;  %s4865_s16 = smov 111   ;;  %vm891_vm2 = vcmask 121856  }
  0x40   : > { %361 = vrot.lane.b32.xlu1 %v5033_v4, %s4858_s20  ;;  %v5048_v12 = vpack.c.bf16 %v313_v10, %v305_v9  ;;  %v309_v15 = vld [vmem:[%s5018_s19 + $0x28] sm:$0xff]  ;;  %v5056_v17 = vpack.c.bf16 %v316_v14, %v308_v13  ;;  %v318_v20 = vld [vmem:[%s5018_s19 + $0x70] sm:$0xff]  ;;  %v311_v21 = vld [vmem:[%s5018_s19 + $0x38] sm:$0xff]  ;;  %v6710_v9 = vmov 0.0   ;;  %vm1154_vm3 = vcmask 7168   ;;  %s6788_s18 = smov 112  }
  0x41   : > { %357 = vrot.lane.b32.xlu0 %v5038_v8, %s4858_s20  ;;  %v317_v16 = vld [vmem:[%s5018_s19 + $0x68] sm:$0xff]  ;;  %v319_v22 = vld [vmem:[%s5018_s19 + $0x78] sm:$0xff]  ;;  %v5068_v23 = vpack.c.bf16 %v318_v20, %v310_v19  ;;  %v345_v34 = vld [vmem:[%s6699_s2] sm:$0xf]  ;;  %vm1612_vm4 = vcmask 1039360   ;;  %vm1875_vm5 = vcmask 924672  }
  0x42   : > { %v5060_v18 = vpack.c.bf16 %v317_v16, %v309_v15  ;;  %v5072_v24 = vpack.c.bf16 %v319_v22, %v311_v21  ;;  %v4534_v51 = vld [vmem:[%s6699_s2 + $0x4] sm:$0xf]  ;;  %v2645_v56 = vld [vmem:[%s6701_s4 + $0x8] sm:$0xff]  ;;  %v4584_v7 = vld [vmem:[%s6700_s3 + $0x10] sm:$0xff]  ;;  %vm2138_vm6 = vcmask 916480   ;;  %vm2401_vm7 = vcmask 908288  }
  0x43   : > { %v2644_v54 = vld [vmem:[%s6701_s4] sm:$0xff]  ;;  %v4582_v60 = vld [vmem:[%s6700_s3 + $0x8] sm:$0xff]  ;;  %v4586_v10 = vld [vmem:[%s6700_s3 + $0x18] sm:$0xff]  ;;  %vm3705_vm8 = vcmask 1043456   ;;  %vm3698_vm9 = vcmask 64512   ;;  %vm4252_vm10 = vcmask 261120  }
  0x44   : > { %363 = vrot.lane.b32.xlu1 %v5044_v11, %s4858_s20  ;;  %v2791_v62 = vld [vmem:[%s6700_s3] sm:$0xff]  ;;  %v4540_v21 = vld [vmem:[%s6699_s2 + $0x8] sm:$0xf]  ;;  %s4620_s15 = sshll.u32 %s4929_s28, 10  ;;  %s4437_s28 = scalar_lea.sflag [#allocation6], %s5014_s17 }
  0x45   : > { %359 = vrot.lane.b32.xlu0 %v5048_v12, %s4858_s20  ;;  %v4587_v20 = vld [vmem:[%s6700_s3 + $0x20] sm:$0xff]  ;;  %s6651_s8 = scalar_lea.hbm %s6704_s7, %s4620_s15  ;;  %p6859_p11 = scmp.ne.s32.totalorder %s6764_s13, 0 }
  0x48   : > { %365 = vrot.lane.b32.xlu1 %v5056_v17, %s4858_s20 }
  0x49   : > { %367 = vrot.lane.b32.xlu0 %v5060_v18, %s4858_s20 }
  0x4c   : > { %369 = vrot.lane.b32.xlu1 %v5068_v23, %s4858_s20 }
  0x4d   : > { %371 = vrot.lane.b32.xlu0 %v5072_v24, %s4858_s20 }
  0x50   : > { %612 = vrot.lane.b32.xlu1 %v5038_v8, %s4859_s12 }
  0x51   : > { %614 = vrot.lane.b32.xlu0 %v5048_v12, %s4859_s12 }
  0x54   : > { %616 = vrot.lane.b32.xlu1 %v5033_v4, %s4859_s12 }
  0x55   : > { %618 = vrot.lane.b32.xlu0 %v5044_v11, %s4859_s12 }
  0x58   : > { %610 = vrot.lane.b32.xlu1 %v6708_v0, %s4859_s12 }
  0x59   : > { %620 = vrot.lane.b32.xlu0 %v5056_v17, %s4859_s12 }
  0x5c   : > { %622 = vrot.lane.b32.xlu1 %v5060_v18, %s4859_s12 }
  0x5d   : > { %624 = vrot.lane.b32.xlu0 %v5068_v23, %s4859_s12 }
  0x60   : > { %626 = vrot.lane.b32.xlu1 %v5072_v24, %s4859_s12 }
  0x61   : > { %875 = vrot.lane.b32.xlu0 %v5038_v8, %s4860_s22 }
  0x64   : > { %877 = vrot.lane.b32.xlu1 %v5048_v12, %s4860_s22 }
  0x65   : > { %879 = vrot.lane.b32.xlu0 %v5033_v4, %s4860_s22 }
  0x68   : > { %881 = vrot.lane.b32.xlu1 %v5044_v11, %s4860_s22 }
  0x69   : > { %873 = vrot.lane.b32.xlu0 %v6708_v0, %s4860_s22 }
  0x6c   : > { %883 = vrot.lane.b32.xlu1 %v5056_v17, %s4860_s22 }
  0x6d   : > { %885 = vrot.lane.b32.xlu0 %v5060_v18, %s4860_s22 }
  0x70   : > { %887 = vrot.lane.b32.xlu1 %v5068_v23, %s4860_s22 }
  0x71   : > { %889 = vrot.lane.b32.xlu0 %v5072_v24, %s4860_s22 }
  0x74   : > { %1138 = vrot.lane.b32.xlu1 %v5038_v8, %s4861_s23 }
  0x75   : > { %1140 = vrot.lane.b32.xlu0 %v5048_v12, %s4861_s23 }
  0x78   : > { %1142 = vrot.lane.b32.xlu1 %v5033_v4, %s4861_s23 }
  0x79   : > { %1144 = vrot.lane.b32.xlu0 %v5044_v11, %s4861_s23 }
  0x7c   : > { %1136 = vrot.lane.b32.xlu1 %v6708_v0, %s4861_s23 }
  0x7d   : > { %1146 = vrot.lane.b32.xlu0 %v5056_v17, %s4861_s23 }
  0x80   : > { %1148 = vrot.lane.b32.xlu1 %v5060_v18, %s4861_s23 }
  0x81   : > { %1150 = vrot.lane.b32.xlu0 %v5068_v23, %s4861_s23 }
  0x84   : > { %1152 = vrot.lane.b32.xlu1 %v5072_v24, %s4861_s23 }
  0x85   : > { %1596 = vrot.lane.b32.xlu0 %v5048_v12, %s4862_s29 }
  0x88   : > { %1598 = vrot.lane.b32.xlu1 %v5033_v4, %s4862_s29 }
  0x89   : > { %1600 = vrot.lane.b32.xlu0 %v5044_v11, %s4862_s29 }
  0x8c   : > { %1602 = vrot.lane.b32.xlu1 %v5056_v17, %s4862_s29 }
  0x8d   : > { %1594 = vrot.lane.b32.xlu0 %v5038_v8, %s4862_s29 }
  0x90   : > { %1604 = vrot.lane.b32.xlu1 %v5060_v18, %s4862_s29 }
  0x91   : > { %1606 = vrot.lane.b32.xlu0 %v5068_v23, %s4862_s29 }
  0x94   : > { %1608 = vrot.lane.b32.xlu1 %v5072_v24, %s4862_s29 }
  0x95   : > { %1610 = vrot.lane.b32.xlu0 %v6708_v0, %s4862_s29 }
  0x98   : > { %1859 = vrot.lane.b32.xlu1 %v5048_v12, %s4863_s21 }
  0x99   : > { %1861 = vrot.lane.b32.xlu0 %v5033_v4, %s4863_s21 }
  0x9c   : > { %1863 = vrot.lane.b32.xlu1 %v5044_v11, %s4863_s21 }
  0x9d   : > { %1865 = vrot.lane.b32.xlu0 %v5056_v17, %s4863_s21 }
  0xa0   : > { %1857 = vrot.lane.b32.xlu1 %v5038_v8, %s4863_s21 }
  0xa1   : > { %1867 = vrot.lane.b32.xlu0 %v5060_v18, %s4863_s21 }
  0xa4   : > { %1869 = vrot.lane.b32.xlu1 %v5068_v23, %s4863_s21 }
  0xa5   : > { %1871 = vrot.lane.b32.xlu0 %v5072_v24, %s4863_s21 }
  0xa8   : > { %1873 = vrot.lane.b32.xlu1 %v6708_v0, %s4863_s21 }
  0xa9   : > { %2122 = vrot.lane.b32.xlu0 %v5048_v12, %s6706_s9 }
  0xac   : > { %2124 = vrot.lane.b32.xlu1 %v5033_v4, %s6706_s9 }
  0xad   : > { %2126 = vrot.lane.b32.xlu0 %v5044_v11, %s6706_s9 }
  0xaf   : > { %v356_v25 = vpop.permute.xlu0 %355 }
  0xb0   : > { %2128 = vrot.lane.b32.xlu1 %v5056_v17, %s6706_s9 }
  0xb1   : > { %2120 = vrot.lane.b32.xlu0 %v5038_v8, %s6706_s9 }
  0xb2   : > { %v362_v26 = vpop.permute.xlu1 %361 }
  0xb3   : > { %v358_v27 = vpop.permute.xlu0 %357 }
  0xb4   : > { %2130 = vrot.lane.b32.xlu1 %v5060_v18, %s6706_s9  ;;  %v374_v33 = vsel %vm373_vm0, %v356_v25, %v358_v27 }
  0xb5   : > { %2132 = vrot.lane.b32.xlu0 %v5068_v23, %s6706_s9 }
  0xb6   : > { %v364_v28 = vpop.permute.xlu1 %363 }
  0xb7   : > { %v360_v29 = vpop.permute.xlu0 %359  ;;  %v377_v30 = vsel %vm373_vm0, %v362_v26, %v364_v28 }
  0xb8   : > { %435 = vmatprep.subr.bf16.mxu1 %v377_v30  ;;  %2134 = vrot.lane.b32.xlu1 %v5072_v24, %s6706_s9  ;;  %v375_v31 = vsel %vm373_vm0, %v358_v27, %v360_v29  ;;  %v376_v32 = vsel %vm373_vm0, %v360_v29, %v362_v26 }
  0xb9   : > { %394 = vmatprep.subr.bf16.mxu0 %v375_v31  ;;  %436 = vmatpush1.bf16.msra.mxu1 %v376_v32 }
  0xba   : > { %395 = vmatpush1.bf16.msra.mxu0 %v374_v33  ;;  %v366_v35 = vpop.permute.xlu1 %365  ;;  %2136 = vrot.lane.b32.xlu0 %v6708_v0, %s6706_s9 }
  0xbb   : > { %v368_v36 = vpop.permute.xlu0 %367  ;;  %v378_v37 = vsel %vm373_vm0, %v364_v28, %v366_v35  ;;  %v4589_v28 = vld [vmem:[%s6700_s3 + $0x28] sm:$0xff] }
  0xbc   : > { %2385 = vrot.lane.b32.xlu1 %v5048_v12, %s4865_s16  ;;  %4531 = vmatmul.mubr.msk.bf16.vlgmr.msra.gmra.mrb[0].mxu1 %vm390_vm1, %v345_v34  ;;  %v379_v38 = vsel %vm373_vm0, %v366_v35, %v368_v36 }
  0xbd   : > { %476 = vmatprep.subr.bf16.mxu0 %v379_v38  ;;  %4530 = vmatmul.mubr.msk.bf16.vlgmr.msra.gmra.mrb[0].mxu0 %vm390_vm1, %v345_v34 }
  0xbe   : > { %477 = vmatpush1.bf16.msra.mxu0 %v378_v37  ;;  %v370_v39 = vpop.permute.xlu1 %369  ;;  %2387 = vrot.lane.b32.xlu0 %v5033_v4, %s4865_s16 }
  0xbf   : > { %v372_v40 = vpop.permute.xlu0 %371  ;;  %v380_v41 = vsel %vm373_vm0, %v368_v36, %v370_v39  ;;  %549 = vmatprep.mubr.bf16.mxu1 %v6708_v0  ;;  %508 = vmatprep.mubr.bf16.mxu0 %v6708_v0  ;;  %v4591_v36 = vld [vmem:[%s6700_s3 + $0x30] sm:$0xff] }
  0xc0   : > { %2389 = vrot.lane.b32.xlu1 %v5044_v11, %s4865_s16  ;;  %v381_v42 = vsel %vm373_vm0, %v370_v39, %v372_v40 }
  0xc1   : > { %517 = vmatprep.subr.bf16.mxu1 %v381_v42  ;;  %v4546_v42 = vld [vmem:[%s6699_s2 + $0xc] sm:$0xf] }
  0xc2   : > { %518 = vmatpush1.bf16.msra.mxu1 %v380_v41  ;;  %v613_v43 = vpop.permute.xlu1 %612  ;;  %2391 = vrot.lane.b32.xlu0 %v5056_v17, %s4865_s16 }
  0xc3   : > { %v615_v44 = vpop.permute.xlu0 %614 }
  0xc4   : > { %2383 = vrot.lane.b32.xlu1 %v5038_v8, %s4865_s16  ;;  %v630_v45 = vsel %vm390_vm1, %v613_v43, %v615_v44 }
  0xc5   : > { %4533 = vmatmul.mubr.msk.bf16.vlgmr.msra.gmra.mrb[4].mxu1 %vm390_vm1, %v345_v34  ;;  %648 = vmatprep.subr.bf16.mxu0 %v630_v45 }
  0xc6   : > { %v617_v46 = vpop.permute.xlu1 %616  ;;  %4532 = vmatmul.mubr.msk.bf16.vlgmr.msra.gmra.mrb[4].mxu0 %vm390_vm1, %v345_v34  ;;  %721 = vmatprep.mubr.bf16.mxu1 %v6708_v0 }
  0xc7   : > { %v619_v47 = vpop.permute.xlu0 %618  ;;  %v631_v48 = vsel %vm390_vm1, %v615_v44, %v617_v46  ;;  %2393 = vrot.lane.b32.xlu0 %v5060_v18, %s4865_s16  ;;  %680 = vmatprep.mubr.bf16.mxu0 %v6708_v0 }
  0xc8   : > { %v632_v49 = vsel %vm390_vm1, %v617_v46, %v619_v47  ;;  %2395 = vrot.lane.b32.xlu1 %v5068_v23, %s4865_s16 }
  0xc9   : > { %689 = vmatprep.subr.bf16.mxu1 %v632_v49 }
  0xca   : > { %690 = vmatpush1.bf16.msra.mxu1 %v631_v48  ;;  %v611_v50 = vpop.permute.xlu1 %610 }
  0xcb   : > { %v629_v52 = vsel %vm390_vm1, %v611_v50, %v613_v43  ;;  %v621_v53 = vpop.permute.xlu0 %620  ;;  %2397 = vrot.lane.b32.xlu0 %v5072_v24, %s4865_s16 }
  0xcc   : > { %649 = vmatpush1.bf16.msra.mxu0 %v629_v52  ;;  %2399 = vrot.lane.b32.xlu1 %v6708_v0, %s4865_s16  ;;  %v633_v59 = vsel %vm390_vm1, %v619_v47, %v621_v53 }
  0xcd   : > { %4536 = vmatmul.mubr.msk.bf16.vlgmr.msra.gmra.mrb[8].mxu1 %vm390_vm1, %v4534_v51 }
  0xce   : > { %v623_v55 = vpop.permute.xlu1 %622  ;;  %803 = vmatprep.mubr.bf16.mxu1 %v6708_v0 }
  0xcf   : > { %v625_v57 = vpop.permute.xlu0 %624  ;;  %4535 = vmatmul.mubr.msk.bf16.vlgmr.msra.gmra.mrb[8].mxu0 %vm390_vm1, %v4534_v51  ;;  %v634_v58 = vsel %vm390_vm1, %v621_v53, %v623_v55  ;;  %2648 = vperm.xlu0 %4680, %v2644_v54  }
  0xd0   : > { %730 = vmatprep.subr.bf16.mxu0 %v634_v58  ;;  %762 = vmatprep.mubr.bf16.mxu0 %v6708_v0  ;;  %v635_v2 = vsel %vm390_vm1, %v623_v55, %v625_v57 }
  0xd1   : > { %731 = vmatpush1.bf16.msra.mxu0 %v633_v59  ;;  %2661 = vperm.xlu1 %4681, %v2645_v56  }
  0xd2   : > { %v627_v61 = vpop.permute.xlu1 %626 }
  0xd3   : > { %v876_v63 = vpop.permute.xlu0 %875  ;;  %v636_v1 = vsel %vm390_vm1, %v625_v57, %v627_v61  ;;  %2893 = vperm.xlu0 %4680, %v4582_v60  }
  0xd4   : > { %771 = vmatprep.subr.bf16.mxu1 %v636_v1  ;;  %v4557_v1 = vld [vmem:[%s6699_s2 + $0x14] sm:$0xf] }
  0xd5   : > { %772 = vmatpush1.bf16.msra.mxu1 %v635_v2  ;;  %2794 = vperm.xlu1 %4681, %v2791_v62  }
  0xd6   : > { %v878_v3 = vpop.permute.xlu1 %877 }
  0xd7   : > { %v880_v5 = vpop.permute.xlu0 %879  ;;  %4537 = vmatmul.mubr.msk.bf16.vlgmr.msra.gmra.mrb[12].mxu0 %vm390_vm1, %v4534_v51  ;;  %v893_v6 = vsel %vm891_vm2, %v876_v63, %v878_v3  ;;  %2748 = vrot.lane.b32.xlu0 %v6710_v9, %s4858_s20 }
  0xd8   : > { %4538 = vmatmul.mubr.msk.bf16.vlgmr.msra.gmra.mrb[12].mxu1 %vm390_vm1, %v4534_v51  ;;  %911 = vmatprep.subr.bf16.mxu0 %v893_v6  ;;  %v894_v19 = vsel %vm891_vm2, %v878_v3, %v880_v5 }
  0xd9   : > { %943 = vmatprep.mubr.bf16.mxu0 %v6708_v0  ;;  %984 = vmatprep.mubr.bf16.mxu1 %v6708_v0 }
  0xda   : > { %v882_v13 = vpop.permute.xlu1 %881  ;;  %3001 = vperm.xlu1 %4681, %v4584_v7  }
  0xdb   : > { %v874_v14 = vpop.permute.xlu0 %873  ;;  %v895_v15 = vsel %vm891_vm2, %v880_v5, %v882_v13  ;;  %3109 = vperm.xlu0 %4680, %v4586_v10   ;;  %v4593_v5 = vld [vmem:[%s6700_s3 + $0x38] sm:$0xff] }
  0xdc   : > { %v892_v16 = vsel %vm891_vm2, %v874_v14, %v876_v63  ;;  %952 = vmatprep.subr.bf16.mxu1 %v895_v15  ;;  %v3601_v14 = vld [vmem:[%s6701_s4 + $0x10] sm:$0xff]  ;;  %v4595_v15 = vld [vmem:[%s6700_s3 + $0x40] sm:$0xff] }
  0xdd   : > { %912 = vmatpush1.bf16.msra.mxu0 %v892_v16  ;;  %953 = vmatpush1.bf16.msra.mxu1 %v894_v19 }
  0xde   : > { %v884_v22 = vpop.permute.xlu1 %883  ;;  %2847 = vrot.lane.b32.xlu1 %v6710_v9, %s4859_s12 }
  0xdf   : > { %v886_v25 = vpop.permute.xlu0 %885  ;;  %v896_v26 = vsel %vm891_vm2, %v882_v13, %v884_v22  ;;  %3132 = vperm.xlu0 %4680, %v4587_v20   ;;  %v3624_v20 = vld [vmem:[%s6701_s4 + $0x20] sm:$0xff] }
  0xe0   : > { %4541 = vmatmul.mubr.msk.bf16.vlgmr.msra.gmra.mrb[16].mxu0 %vm390_vm1, %v4540_v21  ;;  %4542 = vmatmul.mubr.msk.bf16.vlgmr.msra.gmra.mrb[16].mxu1 %vm390_vm1, %v4540_v21  ;;  %v897_v27 = vsel %vm891_vm2, %v884_v22, %v886_v25 }
  0xe1   : > { %993 = vmatprep.subr.bf16.mxu0 %v897_v27  ;;  %1025 = vmatprep.mubr.bf16.mxu0 %v6708_v0 }
  0xe2   : > { %994 = vmatpush1.bf16.msra.mxu0 %v896_v26  ;;  %v888_v29 = vpop.permute.xlu1 %887  ;;  %1066 = vmatprep.mubr.bf16.mxu1 %v6708_v0 }
  0xe3   : > { %v890_v30 = vpop.permute.xlu0 %889  ;;  %v898_v31 = vsel %vm891_vm2, %v886_v25, %v888_v29  ;;  %2954 = vrot.lane.b32.xlu1 %v6710_v9, %s4860_s22  ;;  %3258 = vperm.xlu0 %4680, %v4589_v28  }
  0xe4   : > { %v899_v32 = vsel %vm891_vm2, %v888_v29, %v890_v30  ;;  %v3623_v29 = vld [vmem:[%s6701_s4 + $0x18] sm:$0xff] }
  0xe5   : > { %1034 = vmatprep.subr.bf16.mxu1 %v899_v32  ;;  %v4563_v32 = vld [vmem:[%s6699_s2 + $0x18] sm:$0xf] }
  0xe6   : > { %1035 = vmatpush1.bf16.msra.mxu1 %v898_v31  ;;  %v1139_v33 = vpop.permute.xlu1 %1138 }
  0xe7   : > { %v1141_v34 = vpop.permute.xlu0 %1140  ;;  %3062 = vrot.lane.b32.xlu1 %v6710_v9, %s4861_s23  ;;  %3612 = vperm.xlu0 %4680, %v3601_v14  }
  0xe8   : > { %4543 = vmatmul.mubr.msk.bf16.vlgmr.msra.gmra.mrb[20].mxu0 %vm390_vm1, %v4540_v21  ;;  %v1156_v35 = vsel %vm1154_vm3, %v1139_v33, %v1141_v34 }
  0xe9   : > { %4544 = vmatmul.mubr.msk.bf16.vlgmr.msra.gmra.mrb[20].mxu1 %vm390_vm1, %v4540_v21  ;;  %1174 = vmatprep.subr.bf16.mxu0 %v1156_v35 }
  0xea   : > { %v1143_v37 = vpop.permute.xlu1 %1142  ;;  %1247 = vmatprep.mubr.bf16.mxu1 %v6708_v0  ;;  %1206 = vmatprep.mubr.bf16.mxu0 %v6708_v0 }
  0xeb   : > { %v1145_v38 = vpop.permute.xlu0 %1144  ;;  %v1157_v39 = vsel %vm1154_vm3, %v1141_v34, %v1143_v37  ;;  %3366 = vperm.xlu1 %4681, %v4591_v36   ;;  %3645 = vperm.xlu0 %4680, %v3624_v20  }
  0xec   : > { %v1158_v40 = vsel %vm1154_vm3, %v1143_v37, %v1145_v38 }
  0xed   : > { %1215 = vmatprep.subr.bf16.mxu1 %v1158_v40 }
  0xee   : > { %1216 = vmatpush1.bf16.msra.mxu1 %v1157_v39  ;;  %v1137_v41 = vpop.permute.xlu1 %1136 }
  0xef   : > { %v1155_v43 = vsel %vm1154_vm3, %v1137_v41, %v1139_v33  ;;  %v1147_v44 = vpop.permute.xlu0 %1146  ;;  %3474 = vperm.xlu1 %4681, %v4593_v5   ;;  %3227 = vrot.lane.b32.xlu0 %v6710_v9, %s4862_s29  ;;  %v560_v5 = vlaneseq }
  0xf0   : > { %1175 = vmatpush1.bf16.msra.mxu0 %v1155_v43  ;;  %v1159_v48 = vsel %vm1154_vm3, %v1145_v38, %v1147_v44 }
  0xf1   : > { %4548 = vmatmul.mubr.msk.bf16.vlgmr.msra.gmra.mrb[24].mxu1 %vm390_vm1, %v4546_v42 }
  0xf2   : > { %v1149_v45 = vpop.permute.xlu1 %1148  ;;  %1329 = vmatprep.mubr.bf16.mxu1 %v6708_v0 }
  0xf3   : > { %4547 = vmatmul.mubr.msk.bf16.vlgmr.msra.gmra.mrb[24].mxu0 %vm390_vm1, %v4546_v42  ;;  %v1160_v46 = vsel %vm1154_vm3, %v1147_v44, %v1149_v45  ;;  %v1151_v47 = vpop.permute.xlu0 %1150  ;;  %3582 = vperm.xlu1 %4681, %v4595_v15  }
  0xf4   : > { %1256 = vmatprep.subr.bf16.mxu0 %v1160_v46  ;;  %1288 = vmatprep.mubr.bf16.mxu0 %v6708_v0  ;;  %v1161_v52 = vsel %vm1154_vm3, %v1149_v45, %v1151_v47 }
  0xf5   : > { %1257 = vmatpush1.bf16.msra.mxu0 %v1159_v48  ;;  %3335 = vrot.lane.b32.xlu0 %v6710_v9, %s4863_s21  ;;  %v4569_v48 = vld [vmem:[%s6699_s2 + $0x1c] sm:$0xf] }
  0xf6   : > { %v1153_v49 = vpop.permute.xlu1 %1152  ;;  %1402 = vmatprep.subr.bf16.mxu0 %v5048_v12 }
  0xf7   : > { %v1162_v50 = vsel %vm1154_vm3, %v1151_v47, %v1153_v49  ;;  %v1597_v51 = vpop.permute.xlu0 %1596  ;;  %3632 = vperm.xlu1 %4681, %v3623_v29  }
  0xf8   : > { %1297 = vmatprep.subr.bf16.mxu1 %v1162_v50 }
  0xf9   : > { %1298 = vmatpush1.bf16.msra.mxu1 %v1161_v52 }
  0xfa   : > { %v1599_v53 = vpop.permute.xlu1 %1598  ;;  %1443 = vmatprep.subr.bf16.mxu1 %v5044_v11  ;;  %v4552_v11 = vld [vmem:[%s6699_s2 + $0x10] sm:$0xf] }
  0xfb   : > { %4549 = vmatmul.mubr.msk.bf16.vlgmr.msra.gmra.mrb[28].mxu0 %vm390_vm1, %v4546_v42  ;;  %v1601_v54 = vpop.permute.xlu0 %1600 }
  0xfc   : > { %4550 = vmatmul.mubr.msk.bf16.vlgmr.msra.gmra.mrb[28].mxu1 %vm390_vm1, %v4546_v42  ;;  %1403 = vmatpush1.bf16.msra.mxu0 %v5038_v8  ;;  %v1614_v8 = vsel %vm1612_vm4, %v1597_v51, %v1599_v53 }
  0xfd   : > { %1444 = vmatpush1.bf16.msra.mxu1 %v5033_v4  ;;  %1434 = vmatprep.mubr.bf16.mxu0 %v6708_v0 }
  0xfe   : > { %v1603_v12 = vpop.permute.xlu1 %1602  ;;  %1484 = vmatprep.subr.bf16.mxu0 %v5060_v18  ;;  %1475 = vmatprep.mubr.bf16.mxu1 %v6708_v0 }
  0xff   : > { %v1595_v55 = vpop.permute.xlu0 %1594  ;;  %1525 = vmatprep.subr.bf16.mxu1 %v5072_v24  ;;  %v1616_v57 = vsel %vm1612_vm4, %v1601_v54, %v1603_v12 }
 0x100   : > { %v1613_v60 = vsel %vm1612_vm4, %v1595_v55, %v1597_v51 }
 0x102   : > { %v1605_v56 = vpop.permute.xlu1 %1604 }
 0x103   : > { %4553 = vmatmul.mubr.msk.bf16.vlgmr.msra.gmra.mrb[32].mxu0 %vm390_vm1, %v4552_v11  ;;  %v1607_v4 = vpop.permute.xlu0 %1606  ;;  %v1617_v6 = vsel %vm1612_vm4, %v1603_v12, %v1605_v56 }
 0x104   : > { %1485 = vmatpush1.bf16.msra.mxu0 %v5056_v17  ;;  %4554 = vmatmul.mubr.msk.bf16.vlgmr.msra.gmra.mrb[32].mxu1 %vm390_vm1, %v4552_v11  ;;  %v1618_v59 = vsel %vm1612_vm4, %v1605_v56, %v1607_v4 }
 0x105   : > { %1632 = vmatprep.subr.bf16.mxu0 %v1614_v8  ;;  %1526 = vmatpush1.bf16.msra.mxu1 %v5068_v23  ;;  %v1615_v23 = vsel %vm1612_vm4, %v1599_v53, %v1601_v54 }
 0x106   : > { %v1609_v18 = vpop.permute.xlu1 %1608  ;;  %1673 = vmatprep.subr.bf16.mxu1 %v1616_v57  ;;  %1516 = vmatprep.mubr.bf16.mxu0 %v6708_v0 }
 0x107   : > { %v1611_v24 = vpop.permute.xlu0 %1610  ;;  %1557 = vmatprep.mubr.bf16.mxu1 %v6708_v0  ;;  %v1619_v13 = vsel %vm1612_vm4, %v1607_v4, %v1609_v18 }
 0x108   : > { %v1620_v61 = vsel %vm1612_vm4, %v1609_v18, %v1611_v24 }
 0x10a   : > { %v1860_v58 = vpop.permute.xlu1 %1859 }
 0x10b   : > { %4555 = vmatmul.mubr.msk.bf16.vlgmr.msra.gmra.mrb[36].mxu0 %vm390_vm1, %v4552_v11  ;;  %v1862_v17 = vpop.permute.xlu0 %1861 }
 0x10c   : > { %1633 = vmatpush1.bf16.msra.mxu0 %v1613_v60  ;;  %4556 = vmatmul.mubr.msk.bf16.vlgmr.msra.gmra.mrb[36].mxu1 %vm390_vm1, %v4552_v11  ;;  %v1877_v3 = vsel %vm1875_vm5, %v1860_v58, %v1862_v17 }
 0x10d   : > { %1674 = vmatpush1.bf16.msra.mxu1 %v1615_v23  ;;  %1714 = vmatprep.subr.bf16.mxu0 %v1618_v59  ;;  %v4575_v59 = vld [vmem:[%s6699_s2 + $0x20] sm:$0xf] }
 0x10e   : > { %v1864_v62 = vpop.permute.xlu1 %1863  ;;  %1755 = vmatprep.subr.bf16.mxu1 %v1620_v61  ;;  %1664 = vmatprep.mubr.bf16.mxu0 %v6708_v0 }
 0x10f   : > { %v1866_v63 = vpop.permute.xlu0 %1865  ;;  %1705 = vmatprep.mubr.bf16.mxu1 %v6708_v0  ;;  %v1878_v27 = vsel %vm1875_vm5, %v1862_v17, %v1864_v62 }
 0x110   : > { %v1879_v10 = vsel %vm1875_vm5, %v1864_v62, %v1866_v63 }
 0x112   : > { %v1858_v2 = vpop.permute.xlu1 %1857 }
 0x113   : > { %4558 = vmatmul.mubr.msk.bf16.vlgmr.msra.gmra.mrb[40].mxu0 %vm390_vm1, %v4557_v1  ;;  %v1868_v7 = vpop.permute.xlu0 %1867  ;;  %v1876_v25 = vsel %vm1875_vm5, %v1858_v2, %v1860_v58 }
 0x114   : > { %1715 = vmatpush1.bf16.msra.mxu0 %v1617_v6  ;;  %4559 = vmatmul.mubr.msk.bf16.vlgmr.msra.gmra.mrb[40].mxu1 %vm390_vm1, %v4557_v1  ;;  %v1880_v35 = vsel %vm1875_vm5, %v1866_v63, %v1868_v7 }
 0x115   : > { %1756 = vmatpush1.bf16.msra.mxu1 %v1619_v13  ;;  %1895 = vmatprep.subr.bf16.mxu0 %v1877_v3 }
 0x116   : > { %v1870_v16 = vpop.permute.xlu1 %1869  ;;  %1936 = vmatprep.subr.bf16.mxu1 %v1879_v10  ;;  %1746 = vmatprep.mubr.bf16.mxu0 %v6708_v0 }
 0x117   : > { %v1872_v19 = vpop.permute.xlu0 %1871  ;;  %1787 = vmatprep.mubr.bf16.mxu1 %v6708_v0  ;;  %v1881_v22 = vsel %vm1875_vm5, %v1868_v7, %v1870_v16  ;;  %v561_v7 = vshrl.u32 %v560_v5, 7 }
 0x118   : > { %v1882_v37 = vsel %vm1875_vm5, %v1870_v16, %v1872_v19 }
 0x119   : > { %v5429_v13 = vsub.s32 2, %v561_v7  ;;  %v5431_v16 = vsub.s32 3, %v561_v7 }
 0x11a   : > { %v1874_v21 = vpop.permute.xlu1 %1873 }
 0x11b   : > { %4560 = vmatmul.mubr.msk.bf16.vlgmr.msra.gmra.mrb[44].mxu0 %vm390_vm1, %v4557_v1  ;;  %v2123_v26 = vpop.permute.xlu0 %2122  ;;  %v1883_v28 = vsel %vm1875_vm5, %v1872_v19, %v1874_v21  ;;  %v4539_v21 = vld [vmem:[%s6698_s1 + $0x8] sm:$0xff] }
 0x11c   : > { %1896 = vmatpush1.bf16.msra.mxu0 %v1876_v25  ;;  %4561 = vmatmul.mubr.msk.bf16.vlgmr.msra.gmra.mrb[44].mxu1 %vm390_vm1, %v4557_v1 }
 0x11d   : > { %1937 = vmatpush1.bf16.msra.mxu1 %v1878_v27  ;;  %1977 = vmatprep.subr.bf16.mxu0 %v1881_v22  ;;  %v5436_v22 = vsub.s32 0, %v561_v7  ;;  %v558_v27 = vld [vmem:[%s6698_s1] sm:$0xff] }
 0x11e   : > { %v2125_v30 = vpop.permute.xlu1 %2124  ;;  %1927 = vmatprep.mubr.bf16.mxu0 %v6708_v0  ;;  %1968 = vmatprep.mubr.bf16.mxu1 %v6708_v0 }
 0x11f   : > { %v2127_v31 = vpop.permute.xlu0 %2126  ;;  %2018 = vmatprep.subr.bf16.mxu1 %v1883_v28  ;;  %v2140_v34 = vsel %vm2138_vm6, %v2123_v26, %v2125_v30  ;;  %v5441_v28 = vsub.s32 1, %v561_v7 }
 0x120   : > { %v2141_v44 = vsel %vm2138_vm6, %v2125_v30, %v2127_v31  ;;  %v5444_v30 = vrot.slane %v558_v27, %v5429_v13 }
 0x122   : > { %v2129_v33 = vpop.permute.xlu1 %2128 }
 0x123   : > { %4564 = vmatmul.mubr.msk.bf16.vlgmr.msra.gmra.mrb[48].mxu0 %vm390_vm1, %v4563_v32  ;;  %v2121_v36 = vpop.permute.xlu0 %2120  ;;  %v2142_v38 = vsel %vm2138_vm6, %v2127_v31, %v2129_v33  ;;  %v5447_v31 = vrot.slane %v4539_v21, %v5429_v13 }
 0x124   : > { %1978 = vmatpush1.bf16.msra.mxu0 %v1880_v35  ;;  %4565 = vmatmul.mubr.msk.bf16.vlgmr.msra.gmra.mrb[48].mxu1 %vm390_vm1, %v4563_v32  ;;  %v2139_v43 = vsel %vm2138_vm6, %v2121_v36, %v2123_v26  ;;  %v5459_v35 = vrot.slane %v4539_v21, %v5436_v22  ;;  %v5462_v36 = vrot.slane %v558_v27, %v5441_v28 }
 0x125   : > { %2019 = vmatpush1.bf16.msra.mxu1 %v1882_v37  ;;  %2158 = vmatprep.subr.bf16.mxu0 %v2140_v34  ;;  %v5456_v34 = vrot.slane %v558_v27, %v5436_v22 }
 0x126   : > { %v2131_v39 = vpop.permute.xlu1 %2130  ;;  %2009 = vmatprep.mubr.bf16.mxu0 %v6708_v0  ;;  %2050 = vmatprep.mubr.bf16.mxu1 %v6708_v0 }
 0x127   : > { %2199 = vmatprep.subr.bf16.mxu1 %v2142_v38  ;;  %v2133_v40 = vpop.permute.xlu0 %2132  ;;  %v2143_v53 = vsel %vm2138_vm6, %v2129_v33, %v2131_v39  ;;  %v5453_v33 = vrot.slane %v4539_v21, %v5431_v16  ;;  %v5465_v38 = vrot.slane %v4539_v21, %v5441_v28 }
 0x128   : > { %v2144_v42 = vsel %vm2138_vm6, %v2131_v39, %v2133_v40 }
 0x12a   : > { %v2135_v41 = vpop.permute.xlu1 %2134 }
 0x12b   : > { %4566 = vmatmul.mubr.msk.bf16.vlgmr.msra.gmra.mrb[52].mxu0 %vm390_vm1, %v4563_v32  ;;  %v2145_v51 = vsel %vm2138_vm6, %v2133_v40, %v2135_v41 }
 0x12c   : > { %2159 = vmatpush1.bf16.msra.mxu0 %v2139_v43  ;;  %4567 = vmatmul.mubr.msk.bf16.vlgmr.msra.gmra.mrb[52].mxu1 %vm390_vm1, %v4563_v32  ;;  %v2137_v45 = vpop.permute.xlu0 %2136  ;;  %v5450_v32 = vrot.slane %v558_v27, %v5431_v16  ;;  %v5470_v43 = vsub.s32 4, %v561_v7 }
 0x12d   : > { %2200 = vmatpush1.bf16.msra.mxu1 %v2141_v44  ;;  %2240 = vmatprep.subr.bf16.mxu0 %v2144_v42  ;;  %v2146_v46 = vsel %vm2138_vm6, %v2135_v41, %v2137_v45 }
 0x12e   : > { %v2386_v47 = vpop.permute.xlu1 %2385  ;;  %2190 = vmatprep.mubr.bf16.mxu0 %v6708_v0  ;;  %2231 = vmatprep.mubr.bf16.mxu1 %v6708_v0  ;;  %6768 = vst [vmem:[#allocation10_spill] sm:$0xff] %v5470_v43 }
 0x12f   : > { %2281 = vmatprep.subr.bf16.mxu1 %v2146_v46 }
 0x130   : > { %v2388_v49 = vpop.permute.xlu0 %2387 }
 0x131   : > { %v2403_v52 = vsel %vm2401_vm7, %v2386_v47, %v2388_v49 }
 0x132   : > { %v2390_v50 = vpop.permute.xlu1 %2389 }
 0x133   : > { %4570 = vmatmul.mubr.msk.bf16.vlgmr.msra.gmra.mrb[56].mxu0 %vm390_vm1, %v4569_v48  ;;  %v2404_v56 = vsel %vm2401_vm7, %v2388_v49, %v2390_v50 }
 0x134   : > { %2241 = vmatpush1.bf16.msra.mxu0 %v2143_v53  ;;  %4571 = vmatmul.mubr.msk.bf16.vlgmr.msra.gmra.mrb[56].mxu1 %vm390_vm1, %v4569_v48  ;;  %v2392_v54 = vpop.permute.xlu0 %2391 }
 0x135   : > { %2282 = vmatpush1.bf16.msra.mxu1 %v2145_v51  ;;  %2421 = vmatprep.subr.bf16.mxu0 %v2403_v52  ;;  %v2405_v12 = vsel %vm2401_vm7, %v2390_v50, %v2392_v54 }
 0x136   : > { %v2384_v55 = vpop.permute.xlu1 %2383  ;;  %2272 = vmatprep.mubr.bf16.mxu0 %v6708_v0  ;;  %2313 = vmatprep.mubr.bf16.mxu1 %v6708_v0 }
 0x137   : > { %2462 = vmatprep.subr.bf16.mxu1 %v2405_v12  ;;  %v2402_v4 = vsel %vm2401_vm7, %v2384_v55, %v2386_v47 }
 0x139   : > { %v2394_v11 = vpop.permute.xlu0 %2393 }
 0x13a   : > { %v2396_v8 = vpop.permute.xlu1 %2395  ;;  %v2406_v60 = vsel %vm2401_vm7, %v2392_v54, %v2394_v11  ;;  %v5478_v54 = vsub.s32 5, %v561_v7 }
 0x13b   : > { %4572 = vmatmul.mubr.msk.bf16.vlgmr.msra.gmra.mrb[60].mxu0 %vm390_vm1, %v4569_v48  ;;  %v2407_v57 = vsel %vm2401_vm7, %v2394_v11, %v2396_v8 }
 0x13c   : > { %2422 = vmatpush1.bf16.msra.mxu0 %v2402_v4  ;;  %4573 = vmatmul.mubr.msk.bf16.vlgmr.msra.gmra.mrb[60].mxu1 %vm390_vm1, %v4569_v48  ;;  %v5474_v48 = vsub.s32 6, %v561_v7  ;;  %6770 = vst [vmem:[#allocation12_spill] sm:$0xff] %v5478_v54 }
 0x13d   : > { %2463 = vmatpush1.bf16.msra.mxu1 %v2404_v56  ;;  %2453 = vmatprep.mubr.bf16.mxu0 %v6708_v0  ;;  %v2398_v18 = vpop.permute.xlu0 %2397  ;;  %v5481_v56 = vsub.s32 7, %v561_v7 }
 0x13e   : > { %2503 = vmatprep.subr.bf16.mxu0 %v2407_v57  ;;  %2494 = vmatprep.mubr.bf16.mxu1 %v6708_v0  ;;  %v2400_v24 = vpop.permute.xlu1 %2399  ;;  %v2408_v17 = vsel %vm2401_vm7, %v2396_v8, %v2398_v18  ;;  %6769 = vst [vmem:[#allocation11_spill] sm:$0xff] %v5474_v48 }
 0x13f   : > { %v2409_v58 = vsel %vm2401_vm7, %v2398_v18, %v2400_v24  ;;  %6771 = vst [vmem:[#allocation13_spill] sm:$0xff] %v5481_v56  ;;  %v579_v18 = vrot.slane %v558_v27, %v5470_v43  ;;  %v834_v24 = vrot.slane %v4539_v21, %v5470_v43 }
 0x140   : > { %2544 = vmatprep.subr.bf16.mxu1 %v2409_v58  ;;  %v587_v58 = vrot.slane %v558_v27, %v5474_v48 }
 0x143   : > { %4576 = vmatmul.mubr.msk.bf16.vlgmr.msra.gmra.mrb[64].mxu0 %vm390_vm1, %v4575_v59 }
 0x144   : > { %2504 = vmatpush1.bf16.msra.mxu0 %v2406_v60  ;;  %4577 = vmatmul.mubr.msk.bf16.vlgmr.msra.gmra.mrb[64].mxu1 %vm390_vm1, %v4575_v59  ;;  %v838_v60 = vrot.slane %v4539_v21, %v5478_v54 }
 0x145   : > { %2545 = vmatpush1.bf16.msra.mxu1 %v2408_v17  ;;  %2535 = vmatprep.mubr.bf16.mxu0 %v6708_v0  ;;  %v842_v17 = vrot.slane %v4539_v21, %v5474_v48 }
 0x146   : > { %2576 = vmatprep.mubr.bf16.mxu1 %v6708_v0 }
 0x14b   : > { %4578 = vmatmul.mubr.msk.bf16.vlgmr.msra.gmra.mrb[68].mxu0 %vm390_vm1, %v4575_v59 }
 0x14c   : > { %4579 = vmatmul.mubr.msk.bf16.vlgmr.msra.gmra.mrb[68].mxu1 %vm390_vm1, %v4575_v59  ;;  %3762 = vmatprep.mubr.bf16.mxu0 %v6708_v0  ;;  %v583_v59 = vrot.slane %v558_v27, %v5478_v54 }
 0x14d   : > { %3815 = vmatprep.mubr.bf16.mxu1 %v6708_v0 }
 0x18f   : > { %v469_v61 = vpop.f32.mrb[0].mxu1 }
 0x190   : > { %v428_v23 = vpop.f32.mrb[0].mxu0  ;;  %v471_v62 = vpop.f32.mrb[1].mxu1  ;;  %v602_v39 = vmul.f32 %v5444_v30, %v469_v61  ;;  %v591_v61 = vrot.slane %v558_v27, %v5481_v56 }
 0x191   : > { %v430_v63 = vpop.f32.mrb[1].mxu0  ;;  %v473_v1 = vpop.f32.mrb[2].mxu1  ;;  %v603_v42 = vmul.f32 %v5450_v32, %v471_v62  ;;  %v600_v47 = vmul.f32 %v5456_v34, %v428_v23  ;;  %v846_v23 = vrot.slane %v4539_v21, %v5481_v56  ;;  %v4545_v21 = vld [vmem:[%s6698_s1 + $0x10] sm:$0xff] }
 0x192   : > { %v432_v2 = vpop.f32.mrb[2].mxu0  ;;  %v474_v3 = vpop.f32.mrb[3].mxu1  ;;  %v601_v53 = vmul.f32 %v5462_v36, %v430_v63 }
 0x193   : > { %v433_v6 = vpop.f32.mrb[3].mxu0 }
 0x198   : > { %v551_v10 = vpop.f32.mrb[4].mxu1 }
 0x199   : > { %v510_v14 = vpop.f32.mrb[4].mxu0  ;;  %v553_v15 = vpop.f32.mrb[5].mxu1  ;;  %v606_v5 = vmul.f32 %v587_v58, %v551_v10  ;;  %v5495_v10 = vrot.slane %v4545_v21, %v5436_v22 }
 0x19a   : > { %v512_v19 = vpop.f32.mrb[5].mxu0  ;;  %v555_v20 = vpop.f32.mrb[6].mxu1  ;;  %v604_v63 = vmul.f32 %v579_v18, %v510_v14 }
 0x19b   : > { %v514_v25 = vpop.f32.mrb[6].mxu0  ;;  %v556_v26 = vpop.f32.mrb[7].mxu1  ;;  %v605_v6 = vmul.f32 %v583_v59, %v512_v19  ;;  %v5498_v19 = vrot.slane %v4545_v21, %v5429_v13 }
 0x19c   : > { %v515_v29 = vpop.f32.mrb[7].mxu0 }
 0x19d   : > { %v607_v29 = vmul.f32 %v591_v61, %v553_v15  ;;  %v5501_v15 = vrot.slane %v4545_v21, %v5441_v28 }
 0x1a0   : > { %v723_v37 = vpop.f32.mrb[8].mxu1 }
 0x1a1   : > { %v857_v40 = vmul.f32 %v5447_v31, %v723_v37  ;;  %v725_v41 = vpop.f32.mrb[9].mxu1 }
 0x1a2   : > { %v858_v44 = vmul.f32 %v5453_v33, %v725_v41  ;;  %v682_v45 = vpop.f32.mrb[8].mxu0  ;;  %v727_v46 = vpop.f32.mrb[10].mxu1 }
 0x1a3   : > { %v865_v49 = vadd.f32 %v857_v40, %v602_v39  ;;  %v855_v50 = vmul.f32 %v5459_v35, %v682_v45  ;;  %v684_v51 = vpop.f32.mrb[9].mxu0  ;;  %v728_v52 = vpop.f32.mrb[11].mxu1  ;;  %v5504_v45 = vrot.slane %v4545_v21, %v5431_v16 }
 0x1a4   : > { %v866_v12 = vadd.f32 %v858_v44, %v603_v42  ;;  %v856_v55 = vmul.f32 %v5465_v38, %v684_v51  ;;  %v686_v11 = vpop.f32.mrb[10].mxu0 }
 0x1a5   : > { %v863_v8 = vadd.f32 %v855_v50, %v600_v47  ;;  %v687_v4 = vpop.f32.mrb[11].mxu0 }
 0x1a6   : > { %v864_v57 = vadd.f32 %v856_v55, %v601_v53 }
 0x1aa   : > { %v764_v62 = vpop.f32.mrb[12].mxu0 }
 0x1ab   : > { %v859_v1 = vmul.f32 %v834_v24, %v764_v62  ;;  %v766_v2 = vpop.f32.mrb[13].mxu0  ;;  %v805_v3 = vpop.f32.mrb[12].mxu1  ;;  %v1101_v62 = vrot.slane %v4545_v21, %v5478_v54 }
 0x1ac   : > { %v860_v7 = vmul.f32 %v838_v60, %v766_v2  ;;  %v861_v20 = vmul.f32 %v842_v17, %v805_v3  ;;  %v807_v25 = vpop.f32.mrb[13].mxu1  ;;  %v768_v26 = vpop.f32.mrb[14].mxu0 }
 0x1ad   : > { %v867_v37 = vadd.f32 %v859_v1, %v604_v63  ;;  %v862_v39 = vmul.f32 %v846_v23, %v807_v25  ;;  %v769_v40 = vpop.f32.mrb[15].mxu0  ;;  %v809_v41 = vpop.f32.mrb[14].mxu1  ;;  %v1097_v23 = vrot.slane %v4545_v21, %v5470_v43  ;;  %v1105_v63 = vrot.slane %v4545_v21, %v5474_v48 }
 0x1ae   : > { %v868_v27 = vadd.f32 %v860_v7, %v605_v6  ;;  %v869_v14 = vadd.f32 %v861_v20, %v606_v5  ;;  %v810_v42 = vpop.f32.mrb[15].mxu1  ;;  %v1109_v1 = vrot.slane %v4545_v21, %v5481_v56 }
 0x1af   : > { %v870_v44 = vadd.f32 %v862_v39, %v607_v29  ;;  %v4551_v29 = vld [vmem:[%s6698_s1 + $0x18] sm:$0xff] }
 0x1b0   : > { %v5518_v42 = vrot.slane %v4551_v29, %v5429_v13 }
 0x1b3   : > { %v945_v46 = vpop.f32.mrb[16].mxu0  ;;  %v986_v47 = vpop.f32.mrb[16].mxu1 }
 0x1b4   : > { %v1118_v50 = vmul.f32 %v5495_v10, %v945_v46  ;;  %v947_v51 = vpop.f32.mrb[17].mxu0  ;;  %v1120_v52 = vmul.f32 %v5498_v19, %v986_v47  ;;  %v988_v53 = vpop.f32.mrb[17].mxu1  ;;  %v5521_v46 = vrot.slane %v4551_v29, %v5431_v16  ;;  %v5524_v47 = vrot.slane %v4551_v29, %v5436_v22 }
 0x1b5   : > { %v1119_v55 = vmul.f32 %v5501_v15, %v947_v51  ;;  %v1121_v11 = vmul.f32 %v5504_v45, %v988_v53  ;;  %v949_v4 = vpop.f32.mrb[18].mxu0  ;;  %v990_v18 = vpop.f32.mrb[18].mxu1 }
 0x1b6   : > { %v1126_v24 = vadd.f32 %v1118_v50, %v863_v8  ;;  %v1128_v58 = vadd.f32 %v1120_v52, %v865_v49  ;;  %v950_v59 = vpop.f32.mrb[19].mxu0  ;;  %v991_v60 = vpop.f32.mrb[19].mxu1  ;;  %v5527_v50 = vrot.slane %v4551_v29, %v5441_v28 }
 0x1b7   : > { %v1127_v17 = vadd.f32 %v1119_v55, %v864_v57  ;;  %v1129_v61 = vadd.f32 %v1121_v11, %v866_v12 }
 0x1bb   : > { %v1027_v2 = vpop.f32.mrb[20].mxu0 }
 0x1bc   : > { %v1122_v3 = vmul.f32 %v1097_v23, %v1027_v2  ;;  %v1029_v5 = vpop.f32.mrb[21].mxu0  ;;  %v1068_v6 = vpop.f32.mrb[20].mxu1  ;;  %v1364_v2 = vrot.slane %v4551_v29, %v5478_v54 }
 0x1bd   : > { %v1123_v7 = vmul.f32 %v1101_v62, %v1029_v5  ;;  %v1124_v20 = vmul.f32 %v1105_v63, %v1068_v6  ;;  %v1070_v8 = vpop.f32.mrb[21].mxu1  ;;  %v1031_v49 = vpop.f32.mrb[22].mxu0  ;;  %v1372_v5 = vrot.slane %v4551_v29, %v5481_v56 }
 0x1be   : > { %v1130_v25 = vadd.f32 %v1122_v3, %v867_v37  ;;  %v1125_v26 = vmul.f32 %v1109_v1, %v1070_v8  ;;  %v1032_v57 = vpop.f32.mrb[23].mxu0  ;;  %v1072_v12 = vpop.f32.mrb[22].mxu1  ;;  %v1360_v1 = vrot.slane %v4551_v29, %v5470_v43  ;;  %v1368_v3 = vrot.slane %v4551_v29, %v5474_v48 }
 0x1bf   : > { %v1131_v39 = vadd.f32 %v1123_v7, %v868_v27  ;;  %v1132_v40 = vadd.f32 %v1124_v20, %v869_v14  ;;  %v1073_v41 = vpop.f32.mrb[23].mxu1 }
 0x1c0   : > { %v1133_v21 = vadd.f32 %v1125_v26, %v870_v44 }
 0x1c4   : > { %v1249_v37 = vpop.f32.mrb[24].mxu1 }
 0x1c5   : > { %v1383_v51 = vmul.f32 %v5518_v42, %v1249_v37  ;;  %v1251_v52 = vpop.f32.mrb[25].mxu1 }
 0x1c6   : > { %v1384_v27 = vmul.f32 %v5521_v46, %v1251_v52  ;;  %v1208_v14 = vpop.f32.mrb[24].mxu0  ;;  %v1253_v44 = vpop.f32.mrb[26].mxu1 }
 0x1c7   : > { %v1381_v53 = vmul.f32 %v5524_v47, %v1208_v14  ;;  %v1210_v55 = vpop.f32.mrb[25].mxu0  ;;  %v1254_v11 = vpop.f32.mrb[27].mxu1  ;;  %v1391_v4 = vadd.f32 %v1383_v51, %v1128_v58 }
 0x1c8   : > { %v1382_v18 = vmul.f32 %v5527_v50, %v1210_v55  ;;  %v1212_v59 = vpop.f32.mrb[26].mxu0  ;;  %v1392_v60 = vadd.f32 %v1384_v27, %v1129_v61 }
 0x1c9   : > { %v1213_v23 = vpop.f32.mrb[27].mxu0  ;;  %v1389_v62 = vadd.f32 %v1381_v53, %v1126_v24 }
 0x1ca   : > { %v1390_v63 = vadd.f32 %v1382_v18, %v1127_v17 }
 0x1ce   : > { %v1290_v6 = vpop.f32.mrb[28].mxu0 }
 0x1cf   : > { %v1385_v7 = vmul.f32 %v1360_v1, %v1290_v6  ;;  %v1292_v20 = vpop.f32.mrb[29].mxu0  ;;  %v1331_v8 = vpop.f32.mrb[28].mxu1 }
 0x1d0   : > { %v1386_v58 = vmul.f32 %v1364_v2, %v1292_v20  ;;  %v1387_v49 = vmul.f32 %v1368_v3, %v1331_v8  ;;  %v1294_v26 = vpop.f32.mrb[30].mxu0  ;;  %v1333_v57 = vpop.f32.mrb[29].mxu1 }
 0x1d1   : > { %v1388_v61 = vmul.f32 %v1372_v5, %v1333_v57  ;;  %v1295_v12 = vpop.f32.mrb[31].mxu0  ;;  %v1335_v24 = vpop.f32.mrb[30].mxu1  ;;  %v1393_v17 = vadd.f32 %v1385_v7, %v1130_v25 }
 0x1d2   : > { %v1336_v41 = vpop.f32.mrb[31].mxu1  ;;  %v1394_v37 = vadd.f32 %v1386_v58, %v1131_v39  ;;  %v1395_v51 = vadd.f32 %v1387_v49, %v1132_v40 }
 0x1d3   : > { %v1396_v52 = vadd.f32 %v1388_v61, %v1133_v21 }
 0x1d6   : > { %v1436_v27 = vpop.f32.mrb[32].mxu0 }
 0x1d7   : > { %v1566_v14 = vadd.f32 %v1436_v27, %v1389_v62  ;;  %v1438_v44 = vpop.f32.mrb[33].mxu0  ;;  %v1477_v29 = vpop.f32.mrb[32].mxu1  ;;  %v4562_v62 = vld [vmem:[%s6698_s1 + $0x28] sm:$0xff] }
 0x1d8   : > { %v1567_v53 = vadd.f32 %v1438_v44, %v1390_v63  ;;  %v1568_v55 = vadd.f32 %v1477_v29, %v1391_v4  ;;  %v1440_v11 = vpop.f32.mrb[34].mxu0  ;;  %v1479_v18 = vpop.f32.mrb[33].mxu1  ;;  %v5544_v58 = vrot.slane %v4562_v62, %v5441_v28  ;;  %v5547_v49 = vrot.slane %v4562_v62, %v5429_v13 }
 0x1d9   : > { %v1569_v59 = vadd.f32 %v1479_v18, %v1392_v60  ;;  %v1441_v23 = vpop.f32.mrb[35].mxu0  ;;  %v1481_v1 = vpop.f32.mrb[34].mxu1  ;;  %v5541_v60 = vrot.slane %v4562_v62, %v5436_v22  ;;  %v5550_v26 = vrot.slane %v4562_v62, %v5431_v16 }
 0x1da   : > { %v1482_v2 = vpop.f32.mrb[35].mxu1 }
 0x1db   : > { %6772 = vst [vmem:[#allocation14_spill] sm:$0xff] %v5550_v26  ;;  %v1818_v2 = vrot.slane %v4562_v62, %v5470_v43 }
 0x1de   : > { %v1518_v3 = vpop.f32.mrb[36].mxu0 }
 0x1df   : > { %v1570_v5 = vadd.f32 %v1518_v3, %v1393_v17  ;;  %v1520_v6 = vpop.f32.mrb[37].mxu0  ;;  %v1559_v25 = vpop.f32.mrb[36].mxu1  ;;  %v1822_v3 = vrot.slane %v4562_v62, %v5478_v54 }
 0x1e0   : > { %v1571_v7 = vadd.f32 %v1520_v6, %v1394_v37  ;;  %v1572_v39 = vadd.f32 %v1559_v25, %v1395_v51  ;;  %v1522_v40 = vpop.f32.mrb[38].mxu0  ;;  %v1561_v21 = vpop.f32.mrb[37].mxu1  ;;  %v1826_v6 = vrot.slane %v4562_v62, %v5474_v48  ;;  %v1830_v25 = vrot.slane %v4562_v62, %v5481_v56 }
 0x1e1   : > { %v1573_v63 = vadd.f32 %v1561_v21, %v1396_v52  ;;  %v1523_v4 = vpop.f32.mrb[39].mxu0  ;;  %v1563_v20 = vpop.f32.mrb[38].mxu1 }
 0x1e2   : > { %v1564_v8 = vpop.f32.mrb[39].mxu1 }
 0x1e6   : > { %v1666_v57 = vpop.f32.mrb[40].mxu0 }
 0x1e7   : > { %v1839_v61 = vmul.f32 %v5541_v60, %v1666_v57  ;;  %v1668_v12 = vpop.f32.mrb[41].mxu0  ;;  %v1707_v24 = vpop.f32.mrb[40].mxu1 }
 0x1e8   : > { %v1840_v17 = vmul.f32 %v5544_v58, %v1668_v12  ;;  %v1841_v41 = vmul.f32 %v5547_v49, %v1707_v24  ;;  %v1670_v37 = vpop.f32.mrb[42].mxu0  ;;  %v1709_v51 = vpop.f32.mrb[41].mxu1 }
 0x1e9   : > { %v1847_v52 = vadd.f32 %v1839_v61, %v1566_v14  ;;  %v1842_v27 = vmul.f32 %v5550_v26, %v1709_v51  ;;  %v1671_v44 = vpop.f32.mrb[43].mxu0  ;;  %v1711_v29 = vpop.f32.mrb[42].mxu1 }
 0x1ea   : > { %v1848_v11 = vadd.f32 %v1840_v17, %v1567_v53  ;;  %v1849_v18 = vadd.f32 %v1841_v41, %v1568_v55  ;;  %v1712_v23 = vpop.f32.mrb[43].mxu1  ;;  %v4568_v53 = vld [vmem:[%s6698_s1 + $0x30] sm:$0xff] }
 0x1eb   : > { %v1850_v1 = vadd.f32 %v1842_v27, %v1569_v59  ;;  %v5564_v51 = vrot.slane %v4568_v53, %v5436_v22  ;;  %v5567_v27 = vrot.slane %v4568_v53, %v5441_v28  ;;  %v5570_v44 = vrot.slane %v4568_v53, %v5429_v13 }
 0x1ec   : > { %v5573_v29 = vrot.slane %v4568_v53, %v5431_v16 }
 0x1ee   : > { %v1748_v40 = vpop.f32.mrb[44].mxu0  ;;  %6773 = vst [vmem:[#allocation15_spill] sm:$0xff] %v5573_v29 }
 0x1ef   : > { %v1843_v21 = vmul.f32 %v1818_v2, %v1748_v40  ;;  %v1750_v4 = vpop.f32.mrb[45].mxu0  ;;  %v1789_v14 = vpop.f32.mrb[44].mxu1 }
 0x1f0   : > { %v1844_v20 = vmul.f32 %v1822_v3, %v1750_v4  ;;  %v1845_v8 = vmul.f32 %v1826_v6, %v1789_v14  ;;  %v1752_v57 = vpop.f32.mrb[46].mxu0  ;;  %v1791_v61 = vpop.f32.mrb[45].mxu1 }
 0x1f1   : > { %v1851_v55 = vadd.f32 %v1843_v21, %v1570_v5  ;;  %v1846_v59 = vmul.f32 %v1830_v25, %v1791_v61  ;;  %v1753_v12 = vpop.f32.mrb[47].mxu0  ;;  %v1793_v24 = vpop.f32.mrb[46].mxu1  ;;  %v2081_v61 = vrot.slane %v4568_v53, %v5470_v43 }
 0x1f2   : > { %v1852_v17 = vadd.f32 %v1844_v20, %v1571_v7  ;;  %v1853_v41 = vadd.f32 %v1845_v8, %v1572_v39  ;;  %v1794_v37 = vpop.f32.mrb[47].mxu1  ;;  %v2089_v12 = vrot.slane %v4568_v53, %v5474_v48  ;;  %v2093_v24 = vrot.slane %v4568_v53, %v5481_v56 }
 0x1f3   : > { %v1854_v62 = vadd.f32 %v1846_v59, %v1573_v63  ;;  %v2085_v59 = vrot.slane %v4568_v53, %v5478_v54 }
 0x1f6   : > { %v1929_v5 = vpop.f32.mrb[48].mxu0 }
 0x1f7   : > { %v2102_v23 = vmul.f32 %v5564_v51, %v1929_v5  ;;  %v1931_v2 = vpop.f32.mrb[49].mxu0  ;;  %v1970_v7 = vpop.f32.mrb[48].mxu1 }
 0x1f8   : > { %v2103_v39 = vmul.f32 %v5567_v27, %v1931_v2  ;;  %v2104_v63 = vmul.f32 %v5570_v44, %v1970_v7  ;;  %v1933_v3 = vpop.f32.mrb[50].mxu0  ;;  %v1972_v6 = vpop.f32.mrb[49].mxu1 }
 0x1f9   : > { %v2110_v25 = vadd.f32 %v2102_v23, %v1847_v52  ;;  %v2105_v40 = vmul.f32 %v5573_v29, %v1972_v6  ;;  %v1934_v21 = vpop.f32.mrb[51].mxu0  ;;  %v1974_v4 = vpop.f32.mrb[50].mxu1  ;;  %v3625_v29 = vld [vmem:[%s6701_s4 + $0x28] sm:$0xff] }
 0x1fa   : > { %v2111_v14 = vadd.f32 %v2103_v39, %v1848_v11  ;;  %v2112_v20 = vadd.f32 %v2104_v63, %v1849_v18  ;;  %v1975_v8 = vpop.f32.mrb[51].mxu1  ;;  %v4574_v11 = vld [vmem:[%s6698_s1 + $0x38] sm:$0xff] }
 0x1fb   : > { %v2113_v57 = vadd.f32 %v2105_v40, %v1850_v1  ;;  %v5587_v8 = vrot.slane %v4574_v11, %v5436_v22 }
 0x1fe   : > { %v2011_v37 = vpop.f32.mrb[52].mxu0 }
 0x1ff   : > { %v2106_v5 = vmul.f32 %v2081_v61, %v2011_v37  ;;  %v2013_v2 = vpop.f32.mrb[53].mxu0  ;;  %v2052_v52 = vpop.f32.mrb[52].mxu1  ;;  %v5590_v61 = vrot.slane %v4574_v11, %v5441_v28 }
 0x200   : > { %v2107_v23 = vmul.f32 %v2085_v59, %v2013_v2  ;;  %v2108_v7 = vmul.f32 %v2089_v12, %v2052_v52  ;;  %v2015_v3 = vpop.f32.mrb[54].mxu0  ;;  %v2054_v6 = vpop.f32.mrb[53].mxu1  ;;  %v5593_v59 = vrot.slane %v4574_v11, %v5429_v13  ;;  %v5596_v12 = vrot.slane %v4574_v11, %v5431_v16 }
 0x201   : > { %v2114_v18 = vadd.f32 %v2106_v5, %v1851_v55  ;;  %v2109_v1 = vmul.f32 %v2093_v24, %v2054_v6  ;;  %v2016_v39 = vpop.f32.mrb[55].mxu0  ;;  %v2056_v63 = vpop.f32.mrb[54].mxu1 }
 0x202   : > { %v2115_v40 = vadd.f32 %v2107_v23, %v1852_v17  ;;  %v2116_v21 = vadd.f32 %v2108_v7, %v1853_v41  ;;  %v2057_v4 = vpop.f32.mrb[55].mxu1  ;;  %6774 = vst [vmem:[#allocation16_spill] sm:$0xff] %v5593_v59  ;;  %6775 = vst [vmem:[#allocation17_spill] sm:$0xff] %v5596_v12 }
 0x203   : > { %v2117_v53 = vadd.f32 %v2109_v1, %v1854_v62  ;;  %v5603_v4 = vrot.slane %v4574_v11, %v5470_v43 }
 0x205   : > { %6776 = vst [vmem:[#allocation18_spill] sm:$0xff] %v5603_v4 }
 0x206   : > { %v2192_v55 = vpop.f32.mrb[56].mxu0 }
 0x207   : > { %v2365_v24 = vmul.f32 %v5587_v8, %v2192_v55  ;;  %v2194_v37 = vpop.f32.mrb[57].mxu0  ;;  %v2233_v17 = vpop.f32.mrb[56].mxu1  ;;  %v5606_v55 = vrot.slane %v4574_v11, %v5478_v54 }
 0x208   : > { %v2366_v41 = vmul.f32 %v5590_v61, %v2194_v37  ;;  %v2367_v62 = vmul.f32 %v5593_v59, %v2233_v17  ;;  %v2196_v5 = vpop.f32.mrb[58].mxu0  ;;  %v2235_v2 = vpop.f32.mrb[57].mxu1  ;;  %v5609_v37 = vrot.slane %v4574_v11, %v5474_v48  ;;  %v5612_v17 = vrot.slane %v4574_v11, %v5481_v56 }
 0x209   : > { %v2373_v52 = vadd.f32 %v2365_v24, %v2110_v25  ;;  %v2368_v23 = vmul.f32 %v5596_v12, %v2235_v2  ;;  %v2197_v7 = vpop.f32.mrb[59].mxu0  ;;  %v2237_v3 = vpop.f32.mrb[58].mxu1  ;;  %6777 = vst [vmem:[#allocation19_spill] sm:$0xff] %v5606_v55  ;;  %v4580_v2 = vld [vmem:[%s6698_s1 + $0x40] sm:$0xff]  ;;  %v3627_v12 = vld [vmem:[%s6701_s4 + $0x38] sm:$0xff] }
 0x20a   : > { %v2374_v6 = vadd.f32 %v2366_v41, %v2111_v14  ;;  %v2375_v1 = vadd.f32 %v2367_v62, %v2112_v20  ;;  %v2238_v39 = vpop.f32.mrb[59].mxu1  ;;  %6778 = vst [vmem:[#allocation20_spill] sm:$0xff] %v5609_v37  ;;  %6779 = vst [vmem:[#allocation21_spill] sm:$0xff] %v5612_v17 }
 0x20b   : > { %v2376_v63 = vadd.f32 %v2368_v23, %v2113_v57 }
 0x20e   : > { %v2274_v25 = vpop.f32.mrb[60].mxu0 }
 0x20f   : > { %v2369_v24 = vmul.f32 %v5603_v4, %v2274_v25  ;;  %v2276_v5 = vpop.f32.mrb[61].mxu0  ;;  %v2315_v14 = vpop.f32.mrb[60].mxu1  ;;  %v5622_v4 = vrot.slane %v4580_v2, %v5436_v22 }
 0x210   : > { %v2370_v20 = vmul.f32 %v5606_v55, %v2276_v5  ;;  %v2371_v57 = vmul.f32 %v5609_v37, %v2315_v14  ;;  %v2278_v41 = vpop.f32.mrb[62].mxu0  ;;  %v2317_v62 = vpop.f32.mrb[61].mxu1  ;;  %v5625_v5 = vrot.slane %v4580_v2, %v5441_v28  ;;  %v5628_v14 = vrot.slane %v4580_v2, %v5429_v13 }
 0x211   : > { %v2377_v23 = vadd.f32 %v2369_v24, %v2114_v18  ;;  %v2372_v7 = vmul.f32 %v5612_v17, %v2317_v62  ;;  %v2279_v11 = vpop.f32.mrb[63].mxu0  ;;  %v2319_v3 = vpop.f32.mrb[62].mxu1  ;;  %6780 = vst [vmem:[#allocation22_spill] sm:$0xff] %v5622_v4  ;;  %v5631_v41 = vrot.slane %v4580_v2, %v5431_v16  ;;  %v5641_v37 = vrot.slane %v4580_v2, %v5470_v43 }
 0x212   : > { %v2378_v39 = vadd.f32 %v2370_v20, %v2115_v40  ;;  %v2379_v0 = vadd.f32 %v2371_v57, %v2116_v21  ;;  %v2320_v25 = vpop.f32.mrb[63].mxu1  ;;  %6781 = vst [vmem:[#allocation23_spill] sm:$0xff] %v5625_v5  ;;  %6782 = vst [vmem:[#allocation24_spill] sm:$0xff] %v5628_v14  ;;  %v5637_v11 = vpop.permute.xlu0 %2648 }
 0x213   : > { %v2380_v9 = vadd.f32 %v2372_v7, %v2117_v53  ;;  %6783 = vst [vmem:[#allocation25_spill] sm:$0xff] %v5631_v41  ;;  %6784 = vst [vmem:[#allocation26_spill] sm:$0xff] %v5641_v37 }
 0x216   : > { %v2455_v18 = vpop.f32.mrb[64].mxu0 }
 0x217   : > { %v2628_v24 = vmul.f32 %v5622_v4, %v2455_v18  ;;  %v2457_v62 = vpop.f32.mrb[65].mxu0  ;;  %v2496_v40 = vpop.f32.mrb[64].mxu1 }
 0x218   : > { %v2629_v21 = vmul.f32 %v5625_v5, %v2457_v62  ;;  %v2630_v53 = vmul.f32 %v5628_v14, %v2496_v40  ;;  %v2459_v22 = vpop.f32.mrb[66].mxu0  ;;  %v2498_v20 = vpop.f32.mrb[65].mxu1 }
 0x219   : > { %v2636_v57 = vadd.f32 %v2628_v24, %v2373_v52  ;;  %v2631_v28 = vmul.f32 %v5631_v41, %v2498_v20  ;;  %v2460_v7 = vpop.f32.mrb[67].mxu0  ;;  %v2500_v13 = vpop.f32.mrb[66].mxu1  ;;  %v5647_v52 = vrot.slane %v4580_v2, %v5478_v54  ;;  %v5650_v24 = vrot.slane %v4580_v2, %v5474_v48 }
 0x21a   : > { %v2637_v16 = vadd.f32 %v2629_v21, %v2374_v6  ;;  %v2638_v3 = vadd.f32 %v2630_v53, %v2375_v1  ;;  %v2501_v25 = vpop.f32.mrb[67].mxu1  ;;  %v5643_v62 = vpop.permute.xlu1 %2661  ;;  %v2619_v1 = vrot.slane %v4580_v2, %v5481_v56  ;;  %v6800_v56 = vmov 0.0  }
 0x21b   : > { %v2651_v18 = vmul.f32 %v5637_v11, %v2636_v57  ;;  %v2639_v17 = vadd.f32 %v2631_v28, %v2376_v63  ;;  %6785 = vst [vmem:[#allocation27_spill] sm:$0xff] %v5647_v52  ;;  %6786 = vst [vmem:[#allocation28_spill] sm:$0xff] %v5650_v24 }
 0x21c   : > { %v2653_v40 = vmul.f32 %v5637_v11, %v2638_v3 }
 0x21d   : > { %v2664_v6 = vadd.f32 %v5643_v62, %v2651_v18 }
 0x21e   : > { %v2537_v21 = vpop.f32.mrb[68].mxu0  ;;  %v2666_v63 = vadd.f32 %v5643_v62, %v2653_v40 }
 0x21f   : > { %v5654_v53 = vmax.f32 %v2664_v6, 0.0  ;;  %v2632_v22 = vmul.f32 %v5641_v37, %v2537_v21  ;;  %v2539_v20 = vpop.f32.mrb[69].mxu0  ;;  %v2578_v57 = vpop.f32.mrb[68].mxu1 }
 0x220   : > { %v2633_v28 = vmul.f32 %v5647_v52, %v2539_v20  ;;  %v2634_v7 = vmul.f32 %v5650_v24, %v2578_v57  ;;  %v2580_v13 = vpop.f32.mrb[69].mxu1  ;;  %v2541_v3 = vpop.f32.mrb[70].mxu0  ;;  %v5664_v37 = vmax.f32 %v2666_v63, 0.0 }
 0x221   : > { %v2640_v25 = vadd.f32 %v2632_v22, %v2377_v23  ;;  %v2635_v55 = vmul.f32 %v2619_v1, %v2580_v13  ;;  %2849 = vrot.lane.b32.xlu0 %v5654_v53, %s4859_s12  ;;  %2750 = vrot.lane.b32.xlu1 %v5654_v53, %s4858_s20  ;;  %v2542_v2 = vpop.f32.mrb[71].mxu0  ;;  %v2582_v18 = vpop.f32.mrb[70].mxu1  ;;  %v2652_v23 = vmul.f32 %v5637_v11, %v2637_v16 }
 0x222   : > { %v2641_v40 = vadd.f32 %v2633_v28, %v2378_v39  ;;  %v2642_v6 = vadd.f32 %v2634_v7, %v2379_v0  ;;  %v2583_v21 = vpop.f32.mrb[71].mxu1  ;;  %v2654_v39 = vmul.f32 %v5637_v11, %v2639_v17  ;;  %v5736_v63 = vpop.permute.xlu1 %2794 }
 0x223   : > { %v2643_v20 = vadd.f32 %v2635_v55, %v2380_v9  ;;  %v2665_v0 = vadd.f32 %v5643_v62, %v2652_v23  ;;  %v2655_v17 = vmul.f32 %v5637_v11, %v2640_v25  ;;  %v5738_v22 = vpop.permute.xlu0 %2893 }
 0x224   : > { %v2667_v55 = vadd.f32 %v5643_v62, %v2654_v39  ;;  %v2657_v28 = vmul.f32 %v5637_v11, %v2642_v6  ;;  %v2656_v7 = vmul.f32 %v5637_v11, %v2641_v40 }
 0x225   : > { %2853 = vrot.lane.b32.xlu0 %v5664_v37, %s4859_s12  ;;  %2754 = vrot.lane.b32.xlu1 %v5664_v37, %s4858_s20  ;;  %v5681_v9 = vmax.f32 %v2665_v0, 0.0  ;;  %v2668_v1 = vadd.f32 %v5643_v62, %v2655_v17  ;;  %v2658_v6 = vmul.f32 %v5637_v11, %v2643_v20 }
 0x226   : > { %v5688_v16 = vmax.f32 %v2667_v55, 0.0  ;;  %v2670_v13 = vadd.f32 %v5643_v62, %v2657_v28  ;;  %v5749_v3 = vpop.permute.xlu1 %3001  ;;  %v2669_v2 = vadd.f32 %v5643_v62, %v2656_v7 }
 0x227   : > { %v5740_v57 = vmax.f32 %v2668_v1, 0.0  ;;  %v5751_v25 = vpop.permute.xlu0 %2748  ;;  %v2671_v0 = vadd.f32 %v5643_v62, %v2658_v6 }
 0x228   : > { %6787 = vst [vmem:[#allocation29_spill] sm:$0xff] %v5688_v16  ;;  %v5758_v18 = vmax.f32 %v2670_v13, 0.0  ;;  %v5769_v23 = vmax.f32 %v2669_v2, 0.0 }
 0x229   : > { %2956 = vrot.lane.b32.xlu0 %v5654_v53, %s4860_s22  ;;  %3535 = vrot.lane.b32.xlu1 %v5654_v53, %s4865_s16  ;;  %6789 = vst [vmem:[#allocation30_spill] sm:$0xff] %v5740_v57  ;;  %v5776_v11 = vmax.f32 %v2671_v0, 0.0 }
 0x22a   : > { %6790 = vst [vmem:[#allocation31_spill] sm:$0xff] %v5758_v18  ;;  %v5765_v40 = vpop.permute.xlu1 %2847  ;;  %6791 = vst [vmem:[#allocation32_spill] sm:$0xff] %v5769_v23 }
 0x22b   : > { %v5767_v21 = vpop.permute.xlu0 %3109  ;;  %6792 = vst [vmem:[#allocation33_spill] sm:$0xff] %v5776_v11 }
 0x22d   : > { %2960 = vrot.lane.b32.xlu0 %v5664_v37, %s4860_s22  ;;  %3539 = vrot.lane.b32.xlu1 %v5664_v37, %s4865_s16 }
 0x22e   : > { %v5778_v20 = vpop.permute.xlu1 %2954 }
 0x22f   : > { %v5780_v39 = vpop.permute.xlu0 %3132 }
 0x231   : > { %3064 = vrot.lane.b32.xlu0 %v5654_v53, %s4861_s23  ;;  %2851 = vrot.lane.b32.xlu1 %v5681_v9, %s4859_s12 }
 0x232   : > { %v5790_v62 = vpop.permute.xlu1 %3062 }
 0x233   : > { %v5792_v55 = vpop.permute.xlu0 %3258 }
 0x235   : > { %3068 = vrot.lane.b32.xlu0 %v5664_v37, %s4861_s23  ;;  %2855 = vrot.lane.b32.xlu1 %v5688_v16, %s4859_s12 }
 0x236   : > { %v5798_v17 = vpop.permute.xlu1 %3366 }
 0x237   : > { %v5800_v1 = vpop.permute.xlu0 %3612 }
 0x238   : > { %6793 = vst [vmem:[#allocation34_spill] sm:$0xff] %v5800_v1 }
 0x239   : > { %3211 = vrot.lane.b32.xlu0 %v5654_v53, %s4862_s29  ;;  %2958 = vrot.lane.b32.xlu1 %v5681_v9, %s4860_s22 }
 0x23a   : > { %v5810_v28 = vpop.permute.xlu1 %3474 }
 0x23b   : > { %6794 = vst [vmem:[#allocation35_spill] sm:$0xff] %v5810_v28  ;;  %v5812_v7 = vpop.permute.xlu0 %3645 }
 0x23c   : > { %6795 = vst [vmem:[#allocation36_spill] sm:$0xff] %v5812_v7 }
 0x23d   : > { %3215 = vrot.lane.b32.xlu0 %v5664_v37, %s4862_s29  ;;  %2962 = vrot.lane.b32.xlu1 %v5688_v16, %s4860_s22 }
 0x23e   : > { %v5820_v2 = vpop.permute.xlu1 %3582 }
 0x23f   : > { %v5818_v13 = vpop.permute.xlu0 %3227  ;;  %6797 = vst [vmem:[#allocation38_spill] sm:$0xff] %v5820_v2 }
 0x240   : > { %6796 = vst [vmem:[#allocation37_spill] sm:$0xff] %v5818_v13 }
 0x241   : > { %3319 = vrot.lane.b32.xlu0 %v5654_v53, %s4863_s21  ;;  %3066 = vrot.lane.b32.xlu1 %v5681_v9, %s4861_s23 }
 0x242   : > { %v5832_v0 = vpop.permute.xlu1 %3632 }
 0x243   : > { %v5830_v6 = vpop.permute.xlu0 %3335  ;;  %6799 = vst [vmem:[#allocation40_spill] sm:$0xff] %v5832_v0 }
 0x244   : > { %6798 = vst [vmem:[#allocation39_spill] sm:$0xff] %v5830_v6 }
 0x245   : > { %3323 = vrot.lane.b32.xlu0 %v5664_v37, %s4863_s21  ;;  %3070 = vrot.lane.b32.xlu1 %v5688_v16, %s4861_s23 }
 0x249   : > { %3427 = vrot.lane.b32.xlu0 %v5654_v53, %s6788_s18  ;;  %3213 = vrot.lane.b32.xlu1 %v5681_v9, %s4862_s29 }
 0x24d   : > { %3431 = vrot.lane.b32.xlu0 %v5664_v37, %s6788_s18  ;;  %3217 = vrot.lane.b32.xlu1 %v5688_v16, %s4862_s29 }
 0x251   : > { %2752 = vrot.lane.b32.xlu0 %v5681_v9, %s4858_s20  ;;  %3321 = vrot.lane.b32.xlu1 %v5681_v9, %s4863_s21 }
 0x255   : > { %2756 = vrot.lane.b32.xlu0 %v5688_v16, %s4858_s20  ;;  %3325 = vrot.lane.b32.xlu1 %v5688_v16, %s4863_s21 }
 0x259   : > { %3537 = vrot.lane.b32.xlu0 %v5681_v9, %s4865_s16  ;;  %3429 = vrot.lane.b32.xlu1 %v5681_v9, %s6788_s18 }
 0x25d   : > { %3541 = vrot.lane.b32.xlu0 %v5688_v16, %s4865_s16  ;;  %3433 = vrot.lane.b32.xlu1 %v5688_v16, %s6788_s18 }
 0x261   : > { %3219 = vrot.lane.b32.xlu0 %v5740_v57, %s4862_s29  ;;  %3543 = vrot.lane.b32.xlu1 %v5740_v57, %s4865_s16 }
 0x265   : > { %3327 = vrot.lane.b32.xlu0 %v5740_v57, %s4863_s21  ;;  %2964 = vrot.lane.b32.xlu1 %v5740_v57, %s4860_s22 }
 0x269   : > { %3435 = vrot.lane.b32.xlu0 %v5740_v57, %s6788_s18  ;;  %2968 = vrot.lane.b32.xlu1 %v5758_v18, %s4860_s22 }
 0x26d   : > { %2758 = vrot.lane.b32.xlu0 %v5740_v57, %s4858_s20  ;;  %2760 = vrot.lane.b32.xlu1 %v5769_v23, %s4858_s20 }
 0x271   : > { %2762 = vrot.lane.b32.xlu0 %v5758_v18, %s4858_s20  ;;  %2764 = vrot.lane.b32.xlu1 %v5776_v11, %s4858_s20 }
 0x275   : > { %2857 = vrot.lane.b32.xlu0 %v5740_v57, %s4859_s12  ;;  %2859 = vrot.lane.b32.xlu1 %v5769_v23, %s4859_s12 }
 0x279   : > { %2861 = vrot.lane.b32.xlu0 %v5758_v18, %s4859_s12  ;;  %2863 = vrot.lane.b32.xlu1 %v5776_v11, %s4859_s12 }
 0x27d   : > { %3072 = vrot.lane.b32.xlu0 %v5740_v57, %s4861_s23  ;;  %3074 = vrot.lane.b32.xlu1 %v5769_v23, %s4861_s23 }
 0x281   : > { %3076 = vrot.lane.b32.xlu0 %v5758_v18, %s4861_s23  ;;  %3078 = vrot.lane.b32.xlu1 %v5776_v11, %s4861_s23 }
 0x285   : > { %3223 = vrot.lane.b32.xlu0 %v5758_v18, %s4862_s29  ;;  %3221 = vrot.lane.b32.xlu1 %v5769_v23, %s4862_s29 }
 0x289   : > { %3331 = vrot.lane.b32.xlu0 %v5758_v18, %s4863_s21  ;;  %3225 = vrot.lane.b32.xlu1 %v5776_v11, %s4862_s29  ;;  %s4529_s29 = sshll.u32 %s5014_s17, 6 }
 0x28d   : > { %3439 = vrot.lane.b32.xlu0 %v5758_v18, %s6788_s18  ;;  %3329 = vrot.lane.b32.xlu1 %v5769_v23, %s4863_s21 }
 0x291   : > { %2966 = vrot.lane.b32.xlu0 %v5769_v23, %s4860_s22  ;;  %3333 = vrot.lane.b32.xlu1 %v5776_v11, %s4863_s21  ;;  %s6632_s21 = scalar_lea.vmem [#allocation7], %s4529_s29 }
 0x292   : > { %s4451_s9 = sshll.u32 %s6632_s21, 4  ;;  %s6653_s9 = int_to_ptr.vmem [resolvable:$true] %s4451_s9 }
 0x293   : > { %v5838_v24 = vpop.permute.xlu1 %2750  ;;  %v2850_v52 = vpop.permute.xlu0 %2849  ;;  %s4785_s11 = scalar_lea.vmem %s6653_s9, 1024 }
 0x294   : > { %v2767_v16 = vsel %vm373_vm0, %v5751_v25, %v5838_v24  ;;  %v2865_v1 = vsel %vm390_vm1, %v5765_v40, %v2850_v52  ;;  %p4786_p6 = scmp.ne.s32.totalorder %s6653_s9, %s4785_s11 }
 0x295   : > { %2970 = vrot.lane.b32.xlu0 %v5776_v11, %s4860_s22  ;;  %3437 = vrot.lane.b32.xlu1 %v5769_v23, %s6788_s18  ;;  %v2881_v59 = vmul.f32 %v2865_v1, %v5459_v35 }
 0x296   : > { %p4787_p12 = pnand %p4786_p6, %p6859_p11 }
 0x297   : > { %v5844_v13 = vpop.permute.xlu1 %2754  ;;  %v2854_v6 = vpop.permute.xlu0 %2853  ;;  %v2896_v40 = vmul.f32 %v5738_v22, %v2881_v59 }
 0x298   : > { %p4788_p13 = pneg %p4787_p12 }
 0x299   : > { %3443 = vrot.lane.b32.xlu0 %v6800_v56, %s6788_s18  ;;  %3441 = vrot.lane.b32.xlu1 %v5776_v11, %s6788_s18  ;;  %s4867_s18 = smov [#allocation7]  }
 0x29a   : > { %s4789_s20 = sshll.u32 %s4867_s18, 4  ;;  %s4790_s20 = int_to_ptr.vmem [resolvable:$false] %s4789_s20 }
 0x29b   : > { %v5850_v48 = vpop.permute.xlu1 %3535  ;;  %v2957_v54 = vpop.permute.xlu0 %2956  ;;  %s4791_s12 = scalar_lea.vmem %s4790_s20, 2048  ;;  %p4792_p4 = scmp.lt.s32.totalorder %s6653_s9, %s4790_s20 }
 0x29c   : > { %p4793_p10 = scmp.lt.s32.totalorder %s4791_s12, %s4785_s11 }
 0x29d   : > { %3547 = vrot.lane.b32.xlu0 %v5758_v18, %s4865_s16  ;;  %3545 = vrot.lane.b32.xlu1 %v5769_v23, %s4865_s16  ;;  %v3626_v18 = vld [vmem:[%s6701_s4 + $0x30] sm:$0xff]  ;;  %v3629_v23 = vld [vmem:[%s6701_s4 + $0x48] sm:$0xff] }
 0x29e   : > { %p4794_p1 = por %p4793_p10, %p4792_p4 }
 0x29f   : > { %v5856_v57 = vpop.permute.xlu1 %3539  ;;  %v2961_v43 = vpop.permute.xlu0 %2960 }
 0x2a0   : > { %6801 = vst [vmem:[#allocation41_spill] sm:$0xff] %v5856_v57  ;;  %p4795_p3 = pnand %p4794_p1, %p4788_p13 }
 0x2a1   : > { %3551 = vrot.lane.b32.xlu0 %v6800_v56, %s4865_s16  ;;  %3549 = vrot.lane.b32.xlu1 %v5776_v11, %s4865_s16  ;;  %v3628_v56 = vld [vmem:[%s6701_s4 + $0x40] sm:$0xff] }
 0x2a3   : > { %v2852_v41 = vpop.permute.xlu1 %2851  ;;  %v3065_v7 = vpop.permute.xlu0 %3064 }
 0x2a4   : > { %v2866_v35 = vsel %vm390_vm1, %v2850_v52, %v2852_v41  ;;  %v3135_v52 = vmul.f32 %v5780_v39, %v5654_v53 }
 0x2a5   : > { %3675 = vperm.xlu0 %4680, %v3627_v12   ;;  %3670 = vperm.xlu1 %4681, %v3626_v18  }
 0x2a7   : > { %v5874_v11 = vpop.permute.xlu1 %2855  ;;  %v5876_v0 = vpop.permute.xlu0 %3068 }
 0x2a8   : > { %6802 = vst [vmem:[#allocation42_spill] sm:$0xff] %v5874_v11 }
 0x2a9   : > { %3685 = vperm.xlu0 %4680, %v3629_v23   ;;  %3680 = vperm.xlu1 %4681, %v3628_v56   ;;  %v2973_v23 = vsel %vm891_vm2, %v5778_v20, %v2957_v54  ;;  %v2783_v56 = vmul.f32 %v2767_v16, %v5456_v34 }
 0x2aa   : > { %v2989_v25 = vmul.f32 %v2973_v23, %v5495_v10  ;;  %v2868_v10 = vsel %vm390_vm1, %v2854_v6, %v5874_v11 }
 0x2ab   : > { %v2959_v12 = vpop.permute.xlu1 %2958  ;;  %v3212_v18 = vpop.permute.xlu0 %3211  ;;  %v2797_v28 = vmul.f32 %v5736_v63, %v2783_v56 }
 0x2ac   : > { %v3004_v34 = vmul.f32 %v5749_v3, %v2989_v25  ;;  %v2974_v23 = vsel %vm891_vm2, %v2957_v54, %v2959_v12 }
 0x2ad   : > { %4249 = vperm.xlu1 %4681, %v3625_v29   ;;  %v3081_v29 = vsel %vm1154_vm3, %v5790_v62, %v3065_v7  ;;  %v2904_v16 = vadd.f32 %v2896_v40, %v2797_v28  ;;  %v2867_v62 = vsel %vm390_vm1, %v2852_v41, %v2854_v6  ;;  %v2884_v41 = vmul.f32 %v2868_v10, %v5453_v33 }
 0x2ae   : > { %v3097_v4 = vmul.f32 %v3081_v29, %v5524_v47  ;;  %v2882_v29 = vmul.f32 %v2866_v35, %v5465_v38  ;;  %v2883_v25 = vmul.f32 %v2867_v62, %v5447_v31  ;;  %v2990_v6 = vmul.f32 %v2974_v23, %v5501_v15 }
 0x2af   : > { %v5886_v26 = vpop.permute.xlu1 %2962  ;;  %v3216_v14 = vpop.permute.xlu0 %3215  ;;  %v3012_v47 = vadd.f32 %v3004_v34, %v2904_v16  ;;  %v5923_v38 = vmul.f32 %v5780_v39, %v5664_v37  ;;  %v5927_v31 = vmul.f32 %v5780_v39, %v5681_v9  ;;  %v2899_v35 = vmul.f32 %v5738_v22, %v2884_v41 }
 0x2b0   : > { %v3112_v1 = vmul.f32 %v5767_v21, %v3097_v4  ;;  %v2975_v4 = vsel %vm891_vm2, %v2959_v12, %v2961_v43  ;;  %v2976_v33 = vsel %vm891_vm2, %v2961_v43, %v5886_v26  ;;  %v2897_v15 = vmul.f32 %v5738_v22, %v2882_v29 }
 0x2b1   : > { %v2991_v34 = vmul.f32 %v2975_v4, %v5498_v19  ;;  %v3005_v62 = vmul.f32 %v5749_v3, %v2990_v6  ;;  %v2992_v43 = vmul.f32 %v2976_v33, %v5504_v45 }
 0x2b2   : > { %v3120_v28 = vadd.f32 %v3112_v1, %v3012_v47 }
 0x2b3   : > { %v3067_v2 = vpop.permute.xlu1 %3066  ;;  %v3320_v5 = vpop.permute.xlu0 %3319  ;;  %v3006_v45 = vmul.f32 %v5749_v3, %v2991_v34  ;;  %v3007_v41 = vmul.f32 %v5749_v3, %v2992_v43 }
 0x2b4   : > { %v3082_v12 = vsel %vm1154_vm3, %v3065_v7, %v3067_v2  ;;  %v3083_v16 = vsel %vm1154_vm3, %v3067_v2, %v5876_v0  ;;  %v3143_v1 = vadd.f32 %v3135_v52, %v3120_v28 }
 0x2b5   : > { %v3098_v7 = vmul.f32 %v3082_v12, %v5527_v50  ;;  %v3099_v2 = vmul.f32 %v3083_v16, %v5518_v42 }
 0x2b7   : > { %v5898_v57 = vpop.permute.xlu1 %3070  ;;  %v3324_v20 = vpop.permute.xlu0 %3323 }
 0x2b8   : > { %v3084_v50 = vsel %vm1154_vm3, %v5876_v0, %v5898_v57 }
 0x2bb   : > { %v3214_v59 = vpop.permute.xlu1 %3213  ;;  %v5907_v56 = vpop.permute.xlu0 %3427 }
 0x2bc   : > { %v3230_v54 = vsel %vm1612_vm4, %v3212_v18, %v3214_v59  ;;  %v2898_v18 = vmul.f32 %v5738_v22, %v2883_v25  ;;  %v3231_v23 = vsel %vm1612_vm4, %v3214_v59, %v3216_v14 }
 0x2bd   : > { %v3246_v10 = vmul.f32 %v3230_v54, %v5541_v60  ;;  %v3247_v42 = vmul.f32 %v3231_v23, %v5544_v58  ;;  %v3114_v58 = vmul.f32 %v5767_v21, %v3099_v2 }
 0x2bf   : > { %v5917_v40 = vpop.permute.xlu1 %3217  ;;  %v5919_v11 = vpop.permute.xlu0 %3431 }
 0x2c0   : > { %v3232_v47 = vsel %vm1612_vm4, %v3216_v14, %v5917_v40 }
 0x2c1   : > { %v3248_v28 = vmul.f32 %v3232_v47, %v5547_v49 }
 0x2c3   : > { %v3322_v19 = vpop.permute.xlu1 %3321  ;;  %v2753_v29 = vpop.permute.xlu0 %2752 }
 0x2c4   : > { %v3338_v25 = vsel %vm1875_vm5, %v3320_v5, %v3322_v19  ;;  %v2768_v52 = vsel %vm373_vm0, %v5838_v24, %v2753_v29  ;;  %v2769_v60 = vsel %vm373_vm0, %v2753_v29, %v5844_v13  ;;  %v3261_v5 = vmul.f32 %v5792_v55, %v3246_v10 }
 0x2c5   : > { %v2784_v14 = vmul.f32 %v2768_v52, %v5462_v36  ;;  %v2785_v59 = vmul.f32 %v2769_v60, %v5444_v30  ;;  %v3339_v24 = vsel %vm1875_vm5, %v3322_v19, %v3324_v20  ;;  %v3354_v4 = vmul.f32 %v3338_v25, %v5564_v51  ;;  %v6803_v60 = vld [vmem:[#allocation41_spill] sm:$0xff] }
 0x2c6   : > { %v3113_v30 = vmul.f32 %v5767_v21, %v3098_v7  ;;  %v3100_v51 = vmul.f32 %v3084_v50, %v5521_v46  ;;  %v3355_v12 = vmul.f32 %v3339_v24, %v5567_v27  ;;  %v3262_v10 = vmul.f32 %v5792_v55, %v3247_v42  ;;  %v6804_v50 = vld [vmem:[#allocation22_spill] sm:$0xff] }
 0x2c7   : > { %v2798_v6 = vmul.f32 %v5736_v63, %v2784_v14  ;;  %v2799_v0 = vmul.f32 %v5736_v63, %v2785_v59  ;;  %v5965_v54 = vpop.permute.xlu1 %3325  ;;  %v5967_v36 = vpop.permute.xlu0 %2756  ;;  %v3269_v43 = vadd.f32 %v3261_v5, %v3143_v1  ;;  %v3263_v7 = vmul.f32 %v5792_v55, %v3248_v28 }
 0x2c8   : > { %v3340_v49 = vsel %vm1875_vm5, %v3324_v20, %v5965_v54  ;;  %v2770_v33 = vsel %vm373_vm0, %v5844_v13, %v5967_v36  ;;  %v3369_v47 = vmul.f32 %v5798_v17, %v3354_v4 }
 0x2c9   : > { %v2905_v34 = vadd.f32 %v2897_v15, %v2798_v6  ;;  %v2906_v16 = vadd.f32 %v2898_v18, %v2799_v0  ;;  %v2786_v23 = vmul.f32 %v2770_v33, %v5450_v32  ;;  %v3356_v29 = vmul.f32 %v3340_v49, %v5570_v44  ;;  %v6807_v6 = vld [vmem:[#allocation38_spill] sm:$0xff]  ;;  %v6808_v33 = vld [vmem:[#allocation16_spill] sm:$0xff] }
 0x2ca   : > { %v3370_v32 = vmul.f32 %v5798_v17, %v3355_v12  ;;  %v3377_v14 = vadd.f32 %v3369_v47, %v3269_v43 }
 0x2cb   : > { %v3013_v20 = vadd.f32 %v3005_v62, %v2905_v34  ;;  %v3014_v19 = vadd.f32 %v3006_v45, %v2906_v16  ;;  %v3430_v13 = vpop.permute.xlu1 %3429  ;;  %v3538_v2 = vpop.permute.xlu0 %3537  ;;  %v2800_v46 = vmul.f32 %v5736_v63, %v2786_v23  ;;  %v3371_v4 = vmul.f32 %v5798_v17, %v3356_v29 }
 0x2cc   : > { %v3446_v27 = vsel %vm2138_vm6, %v5907_v56, %v3430_v13  ;;  %v3447_v15 = vsel %vm2138_vm6, %v3430_v13, %v5919_v11  ;;  %v3554_v18 = vsel %vm2401_vm7, %v5850_v48, %v3538_v2  ;;  %v3555_v45 = vsel %vm2401_vm7, %v3538_v2, %v6803_v60  ;;  %v6805_v48 = vld [vmem:[#allocation35_spill] sm:$0xff] }
 0x2cd   : > { %v3121_v1 = vadd.f32 %v3113_v30, %v3013_v20  ;;  %v3122_v62 = vadd.f32 %v3114_v58, %v3014_v19  ;;  %v3462_v25 = vmul.f32 %v3446_v27, %v5587_v8  ;;  %v2907_v44 = vadd.f32 %v2899_v35, %v2800_v46  ;;  %v6806_v8 = vld [vmem:[#allocation23_spill] sm:$0xff] }
 0x2ce   : > { %v3463_v52 = vmul.f32 %v3447_v15, %v5590_v61  ;;  %v3570_v56 = vmul.f32 %v3554_v18, %v6804_v50  ;;  %v3571_v35 = vmul.f32 %v3555_v45, %v6806_v8  ;;  %v6810_v15 = vld [vmem:[#allocation14_spill] sm:$0xff] }
 0x2cf   : > { %v3145_v59 = vadd.f32 %v5923_v38, %v3122_v62  ;;  %v3144_v42 = vadd.f32 %v5927_v31, %v3121_v1  ;;  %v3477_v5 = vmul.f32 %v6805_v48, %v3462_v25  ;;  %v3434_v28 = vpop.permute.xlu1 %3433  ;;  %v3542_v24 = vpop.permute.xlu0 %3541  ;;  %v3015_v12 = vadd.f32 %v3007_v41, %v2907_v44  ;;  %v6811_v25 = vld [vmem:[#allocation34_spill] sm:$0xff] }
 0x2d0   : > { %v3585_v61 = vmul.f32 %v6807_v6, %v3570_v56  ;;  %v3448_v0 = vsel %vm2138_vm6, %v5919_v11, %v3434_v28  ;;  %v3478_v31 = vmul.f32 %v6805_v48, %v3463_v52  ;;  %v3556_v34 = vsel %vm2401_vm7, %v6803_v60, %v3542_v24  ;;  %v6813_v52 = vld [vmem:[#allocation29_spill] sm:$0xff]  ;;  %v6814_v56 = vld [vmem:[#allocation15_spill] sm:$0xff] }
 0x2d1   : > { %v3271_v30 = vadd.f32 %v3263_v7, %v3145_v59  ;;  %v3270_v58 = vadd.f32 %v3262_v10, %v3144_v42  ;;  %v3485_v49 = vadd.f32 %v3477_v5, %v3377_v14  ;;  %v3464_v38 = vmul.f32 %v3448_v0, %v6808_v33  ;;  %v6809_v10 = vld [vmem:[#allocation24_spill] sm:$0xff] }
 0x2d2   : > { %v3115_v11 = vmul.f32 %v5767_v21, %v3100_v51  ;;  %v3572_v7 = vmul.f32 %v3556_v34, %v6809_v10  ;;  %v3586_v13 = vmul.f32 %v6807_v6, %v3571_v35  ;;  %v3138_v60 = vmul.f32 %v5780_v39, %v6813_v52  ;;  %v6815_v59 = vld [vmem:[#allocation40_spill] sm:$0xff] }
 0x2d3   : > { %v3379_v16 = vadd.f32 %v3371_v4, %v3271_v30  ;;  %v3378_v43 = vadd.f32 %v3370_v32, %v3270_v58  ;;  %v3593_v23 = vadd.f32 %v3585_v61, %v3485_v49  ;;  %v3479_v47 = vmul.f32 %v6805_v48, %v3464_v38  ;;  %v6009_v20 = vpop.permute.xlu1 %3543  ;;  %v6011_v19 = vpop.permute.xlu0 %3219  ;;  %v6818_v49 = vld [vmem:[#allocation25_spill] sm:$0xff] }
 0x2d4   : > { %v3233_v41 = vsel %vm1612_vm4, %v5917_v40, %v6011_v19  ;;  %v3587_v27 = vmul.f32 %v6807_v6, %v3572_v7  ;;  %v3123_v1 = vadd.f32 %v3115_v11, %v3015_v12  ;;  %v3557_v5 = vsel %vm2401_vm7, %v3542_v24, %v6009_v20  ;;  %v6819_v38 = vld [vmem:[#allocation17_spill] sm:$0xff] }
 0x2d5   : > { %v3486_v29 = vadd.f32 %v3478_v31, %v3378_v43  ;;  %v3602_v2 = vadd.f32 %v3593_v23, %v5654_v53  ;;  %v3487_v46 = vadd.f32 %v3479_v47, %v3379_v16  ;;  %v3249_v18 = vmul.f32 %v3233_v41, %v6810_v15 }
 0x2d6   : > { %v3146_v8 = vadd.f32 %v3138_v60, %v3123_v1  ;;  %v3573_v33 = vmul.f32 %v3557_v5, %v6818_v49  ;;  %v6824_v5 = vld [vmem:[#allocation42_spill] sm:$0xff] }
 0x2d7   : > { %v3594_v32 = vadd.f32 %v3586_v13, %v3486_v29  ;;  %v6022_v62 = vpop.permute.xlu1 %2964  ;;  %v6024_v51 = vpop.permute.xlu0 %3327  ;;  %v6027_v44 = vadd.f32 %v6811_v25, %v3602_v2  ;;  %v3595_v40 = vadd.f32 %v3587_v27, %v3487_v46  ;;  %v3264_v50 = vmul.f32 %v5792_v55, %v3249_v18  ;;  %v6070_v29 = vld [vmem:[%s6698_s1] sm:$0xff] }
 0x2d8   : > { %v3341_v53 = vsel %vm1875_vm5, %v5965_v54, %v6024_v51  ;;  %v3588_v11 = vmul.f32 %v6807_v6, %v3573_v33  ;;  %v6821_v13 = vld [vmem:[#allocation10_spill] sm:$0xff] }
 0x2d9   : > { %6812 = vst [vmem:[#allocation41_spill] sm:$0xff] %v6027_v44  ;;  %v3603_v45 = vadd.f32 %v3594_v32, %v5681_v9  ;;  %v3357_v14 = vmul.f32 %v3341_v53, %v6814_v56  ;;  %v3635_v42 = vmul.f32 %v6815_v59, %v6027_v44  ;;  %v6817_v9 = vld [vmem:[#allocation36_spill] sm:$0xff]  ;;  %v3604_v30 = vadd.f32 %v3595_v40, %v5664_v37  ;;  %v6083_v18 = vld [vmem:[%s6702_s5] sm:$0xff]  }
 0x2da   : > { %v3272_v24 = vadd.f32 %v3264_v50, %v3146_v8  ;;  %v2718_v2 = vrot.slane %v6070_v29, %v6821_v13  ;;  %6822 = vst [vmem:[#allocation23_spill] sm:$0xff] %v6083_v18  ;;  %v6093_v40 = vld [vmem:[%s6698_s1 + $0x10] sm:$0xff]  ;;  %v2977_v50 = vsel %vm891_vm2, %v5886_v26, %v6022_v62 }
 0x2db   : > { %v6042_v4 = vadd.f32 %v6811_v25, %v3603_v45  ;;  %v3372_v35 = vmul.f32 %v5798_v17, %v3357_v14  ;;  %v6045_v61 = vpop.permute.xlu1 %2968  ;;  %v6047_v54 = vpop.permute.xlu0 %3435  ;;  %v3648_v0 = vadd.f32 %v6817_v9, %v3635_v42  ;;  %v2933_v60 = vrot.slane %v6093_v40, %v6821_v13  ;;  %v6101_v45 = vld [vmem:[%s6698_s1 + $0x8] sm:$0xff] }
 0x2dc   : > { %v3449_v58 = vsel %vm2138_vm6, %v3434_v28, %v6047_v54  ;;  %v6064_v28 = vadd.f32 %v6811_v25, %v3604_v30 }
 0x2dd   : > { %6816 = vst [vmem:[#allocation22_spill] sm:$0xff] %v6042_v4  ;;  %v3465_v12 = vmul.f32 %v3449_v58, %v6819_v38  ;;  %v3636_v31 = vmul.f32 %v6815_v59, %v6042_v4  ;;  %v3380_v34 = vadd.f32 %v3372_v35, %v3272_v24  ;;  %v3656_v47 = vpack.c.bf16 %v3648_v0, %v3648_v0 }
 0x2de   : > { %6820 = vst [vmem:[#allocation35_spill] sm:$0xff] %v6064_v28  ;;  %v3637_v1 = vmul.f32 %v6815_v59, %v6064_v28  ;;  %v6825_v35 = vmov 0   ;;  %v2993_v30 = vmul.f32 %v2977_v50, %v2933_v60  ;;  %v6826_v50 = vld [vmem:[#allocation30_spill] sm:$0xff] }
 0x2df   : > { %v3480_v16 = vmul.f32 %v6805_v48, %v3465_v12  ;;  %v6058_v43 = vpop.permute.xlu1 %2760  ;;  %v6060_v23 = vpop.permute.xlu0 %2758  ;;  %v3649_v37 = vadd.f32 %v6817_v9, %v3636_v31  ;;  %v3707_v15 = vsel %vm3705_vm8, %v3656_v47, 0  ;;  %v6124_v12 = vld [vmem:[%s6702_s5 + $0x8] sm:$0xff]   ;;  %v6131_v47 = vld [vmem:[%s6698_s1 + $0x18] sm:$0xff] }
 0x2e0   : > { %v2771_v32 = vsel %vm373_vm0, %v5967_v36, %v6060_v23  ;;  %v2826_v36 = vrot.slane %v6101_v45, %v6821_v13  ;;  %v3650_v0 = vadd.f32 %v6817_v9, %v3637_v1 }
 0x2e1   : > { %v3488_v10 = vadd.f32 %v3480_v16, %v3380_v34  ;;  %v3657_v7 = vpack.c.bf16 %v3649_v37, %v3649_v37  ;;  %v2787_v56 = vmul.f32 %v2771_v32, %v2718_v2  ;;  %v3008_v16 = vmul.f32 %v5749_v3, %v2993_v30  ;;  %v6829_v30 = vld [vmem:[#allocation12_spill] sm:$0xff] }
 0x2e2   : > { %v3658_v34 = vpack.c.bf16 %v3650_v0, %v3650_v0  ;;  %v6828_v0 = vld [vmem:[#allocation31_spill] sm:$0xff] }
 0x2e3   : > { %v3596_v41 = vadd.f32 %v3588_v11, %v3488_v10  ;;  %v6074_v46 = vpop.permute.xlu1 %2764  ;;  %4598 = vmatprep.subr.msk.bf16.mxu0 %vm3705_vm8, %v3657_v7  ;;  %v6077_v27 = vpop.permute.xlu0 %2762  ;;  %v2801_v49 = vmul.f32 %v5736_v63, %v2787_v56  ;;  %v3041_v11 = vrot.slane %v6131_v47, %v6821_v13  ;;  %v6145_v56 = vmul.f32 %v5780_v39, %v6826_v50 }
 0x2e4   : > { %3731 = vmatpush1.bf16.msra.mxu0 %v3707_v15  ;;  %v3713_v32 = vsel %vm3705_vm8, %v3658_v34, 0  ;;  %v6832_v34 = vld [vmem:[#allocation33_spill] sm:$0xff] }
 0x2e5   : > { %v3605_v53 = vadd.f32 %v3596_v41, %v6813_v52 }
 0x2e7   : > { %v2860_v14 = vpop.permute.xlu1 %2859  ;;  %4599 = vmatmul.mubr.msk.bf16.vlgmr.msra.gmra.mrb[72].mxu0 %vm3698_vm9, %v6083_v18  ;;  %v2858_v42 = vpop.permute.xlu0 %2857  ;;  %v6111_v52 = vadd.f32 %v6811_v25, %v3605_v53  ;;  %v2937_v25 = vrot.slane %v6093_v40, %v6829_v30 }
 0x2e8   : > { %v2869_v8 = vsel %vm390_vm1, %v6824_v5, %v2858_v42  ;;  %3772 = vmatprep.mubr.bf16.mxu0 %v6825_v35  ;;  %v6827_v5 = vld [vmem:[#allocation32_spill] sm:$0xff] }
 0x2e9   : > { %6823 = vst [vmem:[#allocation16_spill] sm:$0xff] %v6111_v52  ;;  %v2885_v58 = vmul.f32 %v2869_v8, %v2826_v36  ;;  %v3638_v26 = vmul.f32 %v6815_v59, %v6111_v52  ;;  %v6149_v8 = vmul.f32 %v5780_v39, %v6827_v5 }
 0x2eb   : > { %v2900_v33 = vmul.f32 %v5738_v22, %v2885_v58  ;;  %v2864_v24 = vpop.permute.xlu1 %2863  ;;  %v2862_v38 = vpop.permute.xlu0 %2861  ;;  %v3651_v31 = vadd.f32 %v6817_v9, %v3638_v26  ;;  %v2722_v58 = vrot.slane %v6070_v29, %v6829_v30  ;;  %v6830_v26 = vld [vmem:[#allocation11_spill] sm:$0xff]  ;;  %v6201_v9 = vld [vmem:[%s6698_s1 + $0x30] sm:$0xff] }
 0x2ec   : > { %v2872_v44 = vsel %vm390_vm1, %v2862_v38, %v2864_v24  ;;  %v2773_v24 = vsel %vm373_vm0, %v6058_v43, %v6077_v27 }
 0x2ed   : > { %v2908_v37 = vadd.f32 %v2900_v33, %v2801_v49  ;;  %v3659_v10 = vpack.c.bf16 %v3651_v31, %v3651_v31  ;;  %v2726_v49 = vrot.slane %v6070_v29, %v6830_v26  ;;  %v6831_v33 = vld [vmem:[#allocation13_spill] sm:$0xff] }
 0x2ee   : > { %v2730_v31 = vrot.slane %v6070_v29, %v6831_v33  ;;  %v3045_v29 = vrot.slane %v6131_v47, %v6829_v30 }
 0x2ef   : > { %v3075_v7 = vpop.permute.xlu1 %3074  ;;  %4600 = vmatmul.mubr.msk.bf16.gmra.mrb[76].mxu0 %vm3698_vm9, %v6124_v12  ;;  %v3016_v41 = vadd.f32 %v3008_v16, %v2908_v37  ;;  %v3073_v2 = vpop.permute.xlu0 %3072  ;;  %4601 = vmatprep.subr.msk.bf16.mxu1 %vm3705_vm8, %v3659_v10  ;;  %v6165_v16 = vmul.f32 %v5780_v39, %v6832_v34  ;;  %v2830_v37 = vrot.slane %v6101_v45, %v6829_v30 }
 0x2f0   : > { %v3085_v15 = vsel %vm1154_vm3, %v5898_v57, %v3073_v2  ;;  %3868 = vmatprep.mubr.bf16.mxu0 %v6825_v35  ;;  %3784 = vmatpush1.bf16.msra.mxu1 %v3713_v32  ;;  %v6153_v57 = vmul.f32 %v5780_v39, %v6828_v0  ;;  %v2838_v10 = vrot.slane %v6101_v45, %v6831_v33 }
 0x2f1   : > { %v3101_v1 = vmul.f32 %v3085_v15, %v3041_v11  ;;  %6833 = vst [vmem:[#allocation24_spill] sm:$0xff] %v6165_v16  ;;  %v2834_v11 = vrot.slane %v6101_v45, %v6830_v26  ;;  %v3049_v39 = vrot.slane %v6131_v47, %v6830_v26  ;;  %v3053_v32 = vrot.slane %v6131_v47, %v6831_v33 }
 0x2f2   : > { %v2772_v34 = vsel %vm373_vm0, %v6060_v23, %v6058_v43  ;;  %v2888_v23 = vmul.f32 %v2872_v44, %v2838_v10  ;;  %v2941_v43 = vrot.slane %v6093_v40, %v6830_v26  ;;  %v3086_v16 = vsel %vm1154_vm3, %v3073_v2, %v3075_v7 }
 0x2f3   : > { %v3116_v60 = vmul.f32 %v5767_v21, %v3101_v1  ;;  %v3079_v53 = vpop.permute.xlu1 %3078  ;;  %v3077_v36 = vpop.permute.xlu0 %3076  ;;  %4602 = vmatmul.mubr.msk.bf16.vlgmr.msra.gmra.mrb[72].mxu1 %vm3698_vm9, %v6083_v18  ;;  %v6185_v1 = vld [vmem:[%s6698_s1 + $0x28] sm:$0xff]  ;;  %v2788_v6 = vmul.f32 %v2772_v34, %v2722_v58 }
 0x2f4   : > { %3825 = vmatprep.mubr.bf16.mxu1 %v6825_v35  ;;  %v3181_v45 = vrot.slane %v6185_v1, %v6821_v13  ;;  %v3185_v28 = vrot.slane %v6185_v1, %v6829_v30  ;;  %v3189_v47 = vrot.slane %v6185_v1, %v6830_v26  ;;  %v3193_v18 = vrot.slane %v6185_v1, %v6831_v33 }
 0x2f5   : > { %v6173_v15 = vadd.f32 %v3116_v60, %v3016_v41  ;;  %v2870_v41 = vsel %vm390_vm1, %v2858_v42, %v2860_v14  ;;  %v2871_v60 = vsel %vm390_vm1, %v2860_v14, %v2862_v38  ;;  %v3298_v14 = vrot.slane %v6201_v9, %v6821_v13 }
 0x2f6   : > { %v3302_v42 = vrot.slane %v6201_v9, %v6829_v30  ;;  %v2774_v13 = vsel %vm373_vm0, %v6077_v27, %v6074_v46  ;;  %v2886_v59 = vmul.f32 %v2870_v41, %v2830_v37  ;;  %v2887_v0 = vmul.f32 %v2871_v60, %v2834_v11 }
 0x2f7   : > { %v3222_v52 = vpop.permute.xlu1 %3221  ;;  %v3224_v4 = vpop.permute.xlu0 %3223  ;;  %v2789_v38 = vmul.f32 %v2773_v24, %v2726_v49  ;;  %v3087_v1 = vsel %vm1154_vm3, %v3075_v7, %v3077_v36  ;;  %v2790_v46 = vmul.f32 %v2774_v13, %v2730_v31  ;;  %v2945_v27 = vrot.slane %v6093_v40, %v6831_v33  ;;  %v6834_v24 = vld [vmem:[#allocation37_spill] sm:$0xff] }
 0x2f8   : > { %v2901_v44 = vmul.f32 %v5738_v22, %v2886_v59  ;;  %v2902_v30 = vmul.f32 %v5738_v22, %v2887_v0  ;;  %v3088_v58 = vsel %vm1154_vm3, %v3077_v36, %v3079_v53  ;;  %v3234_v2 = vsel %vm1612_vm4, %v6011_v19, %v3222_v52 }
 0x2f9   : > { %v2903_v7 = vmul.f32 %v5738_v22, %v2888_v23  ;;  %v3102_v49 = vmul.f32 %v3086_v16, %v3045_v29  ;;  %v3103_v34 = vmul.f32 %v3087_v1, %v3049_v39  ;;  %v3235_v31 = vsel %vm1612_vm4, %v3222_v52, %v3224_v4 }
 0x2fa   : > { %v2802_v40 = vmul.f32 %v5736_v63, %v2788_v6  ;;  %v2803_v10 = vmul.f32 %v5736_v63, %v2789_v38  ;;  %v2804_v59 = vmul.f32 %v5736_v63, %v2790_v46  ;;  %v3104_v0 = vmul.f32 %v3088_v58, %v3053_v32 }
 0x2fb   : > { %v3226_v5 = vpop.permute.xlu1 %3225  ;;  %v3332_v50 = vpop.permute.xlu0 %3331  ;;  %4603 = vmatmul.mubr.msk.bf16.gmra.mrb[76].mxu1 %vm3698_vm9, %v6124_v12  ;;  %v3250_v41 = vmul.f32 %v3234_v2, %v3181_v45  ;;  %v3251_v60 = vmul.f32 %v3235_v31, %v3185_v28  ;;  %v3117_v16 = vmul.f32 %v5767_v21, %v3102_v49  ;;  %v3118_v52 = vmul.f32 %v5767_v21, %v3103_v34  ;;  %v6836_v31 = vld [vmem:[#allocation18_spill] sm:$0xff] }
 0x2fc   : > { %3921 = vmatprep.mubr.bf16.mxu1 %v6825_v35  ;;  %v2909_v53 = vadd.f32 %v2901_v44, %v2802_v40  ;;  %v2910_v36 = vadd.f32 %v2902_v30, %v2803_v10  ;;  %v2911_v19 = vadd.f32 %v2903_v7, %v2804_v59  ;;  %v3236_v29 = vsel %vm1612_vm4, %v3224_v4, %v3226_v5  ;;  %v6838_v59 = vld [vmem:[#allocation19_spill] sm:$0xff] }
 0x2fd   : > { %v3237_v63 = vsel %vm1612_vm4, %v3226_v5, %v6834_v24  ;;  %v3119_v45 = vmul.f32 %v5767_v21, %v3104_v0  ;;  %v3265_v38 = vmul.f32 %v5792_v55, %v3250_v41  ;;  %v3147_v4 = vadd.f32 %v6145_v56, %v6173_v15 }
 0x2fe   : > { %v3266_v23 = vmul.f32 %v5792_v55, %v3251_v60  ;;  %v3252_v5 = vmul.f32 %v3236_v29, %v3189_v47  ;;  %v3253_v44 = vmul.f32 %v3237_v63, %v3193_v18 }
 0x2ff   : > { %v3330_v37 = vpop.permute.xlu1 %3329  ;;  %v3440_v11 = vpop.permute.xlu0 %3439  ;;  %v3273_v15 = vadd.f32 %v3265_v38, %v3147_v4 }
 0x300   : > { %v3342_v22 = vsel %vm1875_vm5, %v6024_v51, %v3330_v37  ;;  %v3343_v32 = vsel %vm1875_vm5, %v3330_v37, %v3332_v50 }
 0x301   : > { %v3358_v1 = vmul.f32 %v3342_v22, %v3298_v14  ;;  %v3359_v30 = vmul.f32 %v3343_v32, %v3302_v42 }
 0x303   : > { %v3334_v6 = vpop.permute.xlu1 %3333  ;;  %v2967_v39 = vpop.permute.xlu0 %2966  ;;  %v3373_v18 = vmul.f32 %v5798_v17, %v3358_v1  ;;  %v3374_v60 = vmul.f32 %v5798_v17, %v3359_v30  ;;  %v6841_v1 = vld [vmem:[#allocation21_spill] sm:$0xff]  ;;  %v6844_v30 = vld [vmem:[#allocation27_spill] sm:$0xff] }
 0x304   : > { %v2978_v28 = vsel %vm891_vm2, %v6022_v62, %v2967_v39  ;;  %v2979_v51 = vsel %vm891_vm2, %v2967_v39, %v6045_v61  ;;  %v3344_v62 = vsel %vm1875_vm5, %v3332_v50, %v3334_v6  ;;  %v3267_v50 = vmul.f32 %v5792_v55, %v3252_v5 }
 0x305   : > { %v2994_v13 = vmul.f32 %v2978_v28, %v2937_v25  ;;  %v2995_v46 = vmul.f32 %v2979_v51, %v2941_v43  ;;  %v6835_v43 = vrot.slane %v6201_v9, %v6830_v26  ;;  %v6840_v28 = vld [vmem:[#allocation20_spill] sm:$0xff] }
 0x307   : > { %v3009_v58 = vmul.f32 %v5749_v3, %v2994_v13  ;;  %v3438_v2 = vpop.permute.xlu1 %3437  ;;  %v2971_v7 = vpop.permute.xlu0 %2970  ;;  %v3010_v21 = vmul.f32 %v5749_v3, %v2995_v46  ;;  %v3360_v49 = vmul.f32 %v3344_v62, %v6835_v43 }
 0x308   : > { %v3450_v25 = vsel %vm2138_vm6, %v6047_v54, %v3438_v2  ;;  %v3451_v14 = vsel %vm2138_vm6, %v3438_v2, %v3440_v11  ;;  %v2980_v56 = vsel %vm891_vm2, %v6045_v61, %v2971_v7  ;;  %v6837_v54 = vld [vmem:[#allocation39_spill] sm:$0xff]  ;;  %v4754_v7 = vld [vmem:[%s6698_s1 + $0x40] sm:$0xff] }
 0x309   : > { %v3017_v47 = vadd.f32 %v3009_v58, %v2909_v53  ;;  %v2996_v42 = vmul.f32 %v2980_v56, %v2945_v27  ;;  %v3018_v34 = vadd.f32 %v3010_v21, %v2910_v36  ;;  %v3466_v37 = vmul.f32 %v3450_v25, %v6836_v31 }
 0x30a   : > { %v3345_v40 = vsel %vm1875_vm5, %v3334_v6, %v6837_v54  ;;  %v3467_v61 = vmul.f32 %v3451_v14, %v6838_v59  ;;  %v3268_v27 = vmul.f32 %v5792_v55, %v3253_v44  ;;  %v3381_v36 = vadd.f32 %v3373_v18, %v3273_v15  ;;  %v6843_v44 = vld [vmem:[#allocation26_spill] sm:$0xff] }
 0x30b   : > { %v3125_v10 = vadd.f32 %v3117_v16, %v3017_v47  ;;  %v3011_v0 = vmul.f32 %v5749_v3, %v2996_v42  ;;  %v3442_v41 = vpop.permute.xlu1 %3441  ;;  %v3444_v53 = vpop.permute.xlu0 %3443  ;;  %v3126_v22 = vadd.f32 %v3118_v52, %v3018_v34  ;;  %v6839_v16 = vrot.slane %v6201_v9, %v6831_v33  ;;  %v6845_v14 = vld [vmem:[#allocation38_spill] sm:$0xff] }
 0x30c   : > { %v3452_v26 = vsel %vm2138_vm6, %v3440_v11, %v3442_v41  ;;  %v3453_v6 = vsel %vm2138_vm6, %v3442_v41, %v3444_v53  ;;  %v3375_v3 = vmul.f32 %v5798_v17, %v3360_v49  ;;  %v3481_v55 = vmul.f32 %v6805_v48, %v3466_v37  ;;  %v6847_v59 = vld [vmem:[#allocation30_spill] sm:$0xff] }
 0x30d   : > { %v3148_v29 = vadd.f32 %v6149_v8, %v3125_v10  ;;  %v3019_v39 = vadd.f32 %v3011_v0, %v2911_v19  ;;  %v3361_v24 = vmul.f32 %v3345_v40, %v6839_v16  ;;  %v3149_v63 = vadd.f32 %v6153_v57, %v3126_v22  ;;  %v6842_v57 = vld [vmem:[#allocation24_spill] sm:$0xff] }
 0x30e   : > { %v3482_v52 = vmul.f32 %v6805_v48, %v3467_v61  ;;  %v3468_v51 = vmul.f32 %v3452_v26, %v6840_v28  ;;  %v3469_v13 = vmul.f32 %v3453_v6, %v6841_v1  ;;  %v3489_v58 = vadd.f32 %v3481_v55, %v3381_v36  ;;  %v6848_v0 = vld [vmem:[#allocation32_spill] sm:$0xff] }
 0x30f   : > { %v3274_v32 = vadd.f32 %v3266_v23, %v3148_v29  ;;  %v3127_v11 = vadd.f32 %v3119_v45, %v3019_v39  ;;  %v3546_v8 = vpop.permute.xlu1 %3545  ;;  %v3548_v19 = vpop.permute.xlu0 %3547  ;;  %v3275_v38 = vadd.f32 %v3267_v50, %v3149_v63  ;;  %v3376_v45 = vmul.f32 %v5798_v17, %v3361_v24  ;;  %v6850_v29 = vld [vmem:[#allocation31_spill] sm:$0xff]  ;;  %v6851_v6 = vld [vmem:[#allocation40_spill] sm:$0xff] }
 0x310   : > { %v3558_v9 = vsel %vm2401_vm7, %v6009_v20, %v3546_v8  ;;  %v3559_v4 = vsel %vm2401_vm7, %v3546_v8, %v3548_v19  ;;  %v3526_v21 = vrot.slane %v4754_v7, %v6831_v33  ;;  %v3483_v42 = vmul.f32 %v6805_v48, %v3468_v51  ;;  %v6846_v33 = vld [vmem:[#allocation28_spill] sm:$0xff] }
 0x311   : > { %v3382_v5 = vadd.f32 %v3374_v60, %v3274_v32  ;;  %v3150_v46 = vadd.f32 %v6842_v57, %v3127_v11  ;;  %v3574_v23 = vmul.f32 %v3558_v9, %v6843_v44  ;;  %v3575_v62 = vmul.f32 %v3559_v4, %v6844_v30  ;;  %v6853_v55 = vld [vmem:[#allocation36_spill] sm:$0xff]  ;;  %v6854_v57 = vld [vmem:[#allocation23_spill] sm:$0xff] }
 0x312   : > { %v3383_v2 = vadd.f32 %v3375_v3, %v3275_v38  ;;  %v3484_v17 = vmul.f32 %v6805_v48, %v3469_v13  ;;  %v6852_v3 = vld [vmem:[#allocation33_spill] sm:$0xff] }
 0x313   : > { %v3490_v20 = vadd.f32 %v3482_v52, %v3382_v5  ;;  %v3276_v25 = vadd.f32 %v3268_v27, %v3150_v46  ;;  %v3589_v56 = vmul.f32 %v6845_v14, %v3574_v23  ;;  %v3590_v15 = vmul.f32 %v6845_v14, %v3575_v62  ;;  %v3550_v18 = vpop.permute.xlu1 %3549  ;;  %v3552_v47 = vpop.permute.xlu0 %3551  ;;  %v6849_v27 = vld [vmem:[#allocation34_spill] sm:$0xff] }
 0x314   : > { %v3560_v50 = vsel %vm2401_vm7, %v3548_v19, %v3550_v18  ;;  %v3561_v43 = vsel %vm2401_vm7, %v3550_v18, %v3552_v47  ;;  %v3491_v54 = vadd.f32 %v3483_v42, %v3383_v2 }
 0x315   : > { %v3384_v49 = vadd.f32 %v3376_v45, %v3276_v25  ;;  %v3597_v34 = vadd.f32 %v3589_v56, %v3489_v58  ;;  %v3598_v31 = vadd.f32 %v3590_v15, %v3490_v20  ;;  %v3576_v37 = vmul.f32 %v3560_v50, %v6846_v33 }
 0x316   : > { %v3577_v40 = vmul.f32 %v3561_v43, %v3526_v21 }
 0x317   : > { %v3492_v10 = vadd.f32 %v3484_v17, %v3384_v49  ;;  %v3606_v61 = vadd.f32 %v3597_v34, %v6847_v59  ;;  %v3607_v41 = vadd.f32 %v3598_v31, %v6848_v0  ;;  %v3591_v53 = vmul.f32 %v6845_v14, %v3576_v37 }
 0x318   : > { %v3592_v48 = vmul.f32 %v6845_v14, %v3577_v40 }
 0x319   : > { %v6313_v60 = vadd.f32 %v6849_v27, %v3607_v41  ;;  %v3599_v22 = vadd.f32 %v3591_v53, %v3491_v54  ;;  %v6316_v26 = vadd.f32 %v6849_v27, %v3606_v61 }
 0x31a   : > { %v3600_v36 = vadd.f32 %v3592_v48, %v3492_v10 }
 0x31b   : > { %v3608_v39 = vadd.f32 %v3599_v22, %v6850_v29  ;;  %v3640_v16 = vmul.f32 %v6851_v6, %v6313_v60  ;;  %v3639_v24 = vmul.f32 %v6851_v6, %v6316_v26 }
 0x31c   : > { %v3609_v63 = vadd.f32 %v3600_v36, %v6852_v3 }
 0x31d   : > { %v3653_v32 = vadd.f32 %v6853_v55, %v3640_v16  ;;  %v3652_v52 = vadd.f32 %v6853_v55, %v3639_v24  ;;  %v6327_v11 = vadd.f32 %v6849_v27, %v3608_v39 }
 0x31e   : > { %v6330_v28 = vadd.f32 %v6849_v27, %v3609_v63 }
 0x31f   : > { %v3661_v51 = vpack.c.bf16 %v3653_v32, %v3653_v32  ;;  %v3660_v8 = vpack.c.bf16 %v3652_v52, %v3652_v52  ;;  %v3641_v19 = vmul.f32 %v6851_v6, %v6327_v11 }
 0x320   : > { %v3642_v38 = vmul.f32 %v6851_v6, %v6330_v28 }
 0x321   : > { %4604 = vmatprep.subr.msk.bf16.mxu0 %vm3705_vm8, %v3661_v51  ;;  %v3719_v1 = vsel %vm3705_vm8, %v3660_v8, 0  ;;  %v3654_v13 = vadd.f32 %v6853_v55, %v3641_v19 }
 0x322   : > { %3837 = vmatpush1.bf16.msra.mxu0 %v3719_v1  ;;  %v3655_v9 = vadd.f32 %v6853_v55, %v3642_v38 }
 0x323   : > { %v3662_v4 = vpack.c.bf16 %v3654_v13, %v3654_v13 }
 0x324   : > { %v3663_v5 = vpack.c.bf16 %v3655_v9, %v3655_v9  ;;  %v6354_v44 = vpop.permute.xlu1 %3670  ;;  %v6357_v45 = vpop.permute.xlu0 %3675 }
 0x325   : > { %4605 = vmatmul.mubr.msk.bf16.vlgmr.msra.gmra.mrb[80].mxu0 %vm3698_vm9, %v6854_v57  ;;  %v3725_v46 = vsel %vm3705_vm8, %v3662_v4, 0 }
 0x326   : > { %4607 = vmatprep.subr.msk.bf16.mxu1 %vm3705_vm8, %v3663_v5  ;;  %3878 = vmatprep.mubr.bf16.mxu0 %v6825_v35 }
 0x327   : > { %3890 = vmatpush1.bf16.msra.mxu1 %v3725_v46 }
 0x328   : > { %v6369_v17 = vpop.permute.xlu1 %3680  ;;  %v6376_v54 = vpop.permute.xlu0 %3685 }
 0x32a   : > { %4608 = vmatmul.mubr.msk.bf16.vlgmr.msra.gmra.mrb[80].mxu1 %vm3698_vm9, %v6854_v57 }
 0x32b   : > { %3931 = vmatprep.mubr.bf16.mxu1 %v6825_v35 }
 0x32d   : > { %4606 = vmatmul.mubr.msk.bf16.gmra.mrb[84].mxu0 %vm3698_vm9, %v6124_v12 }
 0x32e   : > { %4288 = vmatprep.mubr.bf16.mxu0 %v6825_v35 }
 0x332   : > { %4609 = vmatmul.mubr.msk.bf16.gmra.mrb[84].mxu1 %vm3698_vm9, %v6124_v12 }
 0x333   : > { %4329 = vmatprep.mubr.bf16.mxu1 %v6825_v35 }
 0x3ba   : > { %v3764_v23 = vpop.f32.mrb[72].mxu0 }
 0x3bb   : > { %v3765_v30 = vadd.f32 %v3764_v23, %v6354_v44  ;;  %v3766_v62 = vpop.f32.mrb[73].mxu0 }
 0x3bc   : > { %v3767_v58 = vadd.f32 %v3766_v62, %v6354_v44  ;;  %v3768_v2 = vpop.f32.mrb[74].mxu0 }
 0x3bd   : > { %v3974_v7 = vmul.f32 0.044715, %v3765_v30  ;;  %v6361_v21 = vadd.f32 %v3768_v2, %v6357_v45  ;;  %v3770_v20 = vpop.f32.mrb[75].mxu0  ;;  %v6392_v39 = vmul.f32 0.5, %v3765_v30 }
 0x3be   : > { %v3975_v25 = vmul.f32 0.044715, %v3767_v58  ;;  %v6364_v12 = vadd.f32 %v3770_v20, %v6357_v45  ;;  %v6410_v5 = vmul.f32 0.5, %v3767_v58 }
 0x3bf   : > { %v4006_v14 = vmul.f32 %v3974_v7, %v3765_v30  ;;  %v3982_v56 = vmul.f32 0.044715, %v6361_v21 }
 0x3c0   : > { %v4007_v15 = vmul.f32 %v3975_v25, %v3767_v58  ;;  %v3983_v18 = vmul.f32 0.044715, %v6364_v12 }
 0x3c1   : > { %v4038_v47 = vmul.f32 %v4006_v14, %v3765_v30  ;;  %v4014_v42 = vmul.f32 %v3982_v56, %v6361_v21 }
 0x3c2   : > { %v4039_v50 = vmul.f32 %v4007_v15, %v3767_v58  ;;  %v4015_v43 = vmul.f32 %v3983_v18, %v6364_v12  ;;  %v3774_v49 = vpop.f32.mrb[76].mxu0 }
 0x3c3   : > { %v4070_v34 = vadd.f32 %v4038_v47, %v3765_v30  ;;  %v4046_v31 = vmul.f32 %v4014_v42, %v6361_v21  ;;  %v6374_v33 = vadd.f32 %v3774_v49, %v6369_v17  ;;  %v3776_v37 = vpop.f32.mrb[77].mxu0  ;;  %v3950_v47 = vmul.f32 0.5, %v6361_v21 }
 0x3c4   : > { %v4047_v40 = vmul.f32 %v4015_v43, %v6364_v12  ;;  %v6380_v10 = vadd.f32 %v3776_v37, %v6369_v17  ;;  %v3778_v59 = vpop.f32.mrb[78].mxu0  ;;  %v4071_v61 = vadd.f32 %v4039_v50, %v3767_v58  ;;  %v3951_v49 = vmul.f32 0.5, %v6364_v12 }
 0x3c5   : > { %v4102_v0 = vmul.f32 0.7978846, %v4070_v34  ;;  %v4078_v41 = vadd.f32 %v4046_v31, %v6361_v21  ;;  %v3990_v53 = vmul.f32 0.044715, %v6374_v33  ;;  %v6385_v48 = vadd.f32 %v3778_v59, %v6376_v54  ;;  %v3780_v27 = vpop.f32.mrb[79].mxu0 }
 0x3c6   : > { %v3991_v22 = vmul.f32 0.044715, %v6380_v10  ;;  %v6389_v36 = vadd.f32 %v3780_v27, %v6376_v54  ;;  %v4079_v29 = vadd.f32 %v4047_v40, %v6364_v12  ;;  %v3817_v3 = vpop.f32.mrb[72].mxu1  ;;  %v4103_v51 = vmul.f32 0.7978846, %v4071_v61 }
 0x3c7   : > { %4684 = vtanh.f32 %v4102_v0  ;;  %v4110_v6 = vmul.f32 0.7978846, %v4078_v41  ;;  %v4022_v16 = vmul.f32 %v3990_v53, %v6374_v33  ;;  %v3998_v24 = vmul.f32 0.044715, %v6385_v48  ;;  %v3819_v52 = vpop.f32.mrb[73].mxu1 }
 0x3c8   : > { %v4023_v63 = vmul.f32 %v3991_v22, %v6380_v10  ;;  %v3999_v55 = vmul.f32 0.044715, %v6389_v36  ;;  %v6399_v32 = vadd.f32 %v3817_v3, %v6354_v44  ;;  %v6404_v38 = vadd.f32 %v3819_v52, %v6354_v44  ;;  %v3821_v1 = vpop.f32.mrb[74].mxu1 }
 0x3c9   : > { %4686 = vtanh.f32 %v4110_v6  ;;  %v4054_v8 = vmul.f32 %v4022_v16, %v6374_v33  ;;  %v4030_v19 = vmul.f32 %v3998_v24, %v6385_v48  ;;  %v6408_v9 = vadd.f32 %v3821_v1, %v6357_v45  ;;  %v3823_v4 = vpop.f32.mrb[75].mxu1 }
 0x3ca   : > { %v3976_v13 = vmul.f32 0.044715, %v6399_v32  ;;  %v4111_v57 = vmul.f32 0.7978846, %v4079_v29  ;;  %v4031_v30 = vmul.f32 %v3999_v55, %v6389_v36  ;;  %v3977_v62 = vmul.f32 0.044715, %v6404_v38 }
 0x3cb   : > { %v4086_v46 = vadd.f32 %v4054_v8, %v6374_v33  ;;  %v4062_v23 = vmul.f32 %v4030_v19, %v6385_v48  ;;  %v3984_v7 = vmul.f32 0.044715, %v6408_v9  ;;  %v6419_v20 = vadd.f32 %v3823_v4, %v6357_v45 }
 0x3cc   : > { %v4008_v2 = vmul.f32 %v3976_v13, %v6399_v32  ;;  %4688 = vtanh.f32 %v4103_v51  ;;  %v4055_v58 = vmul.f32 %v4023_v63, %v6380_v10  ;;  %v4009_v56 = vmul.f32 %v3977_v62, %v6404_v38 }
 0x3cd   : > { %v4118_v25 = vmul.f32 0.7978846, %v4086_v46  ;;  %v4094_v14 = vadd.f32 %v4062_v23, %v6385_v48  ;;  %v4016_v18 = vmul.f32 %v3984_v7, %v6408_v9  ;;  %4690 = vtanh.f32 %v4111_v57 }
 0x3ce   : > { %v4040_v15 = vmul.f32 %v4008_v2, %v6399_v32  ;;  %v4063_v50 = vmul.f32 %v4031_v30, %v6389_v36  ;;  %v3827_v43 = vpop.f32.mrb[76].mxu1  ;;  %v3985_v37 = vmul.f32 0.044715, %v6419_v20  ;;  %v4041_v21 = vmul.f32 %v4009_v56, %v6404_v38 }
 0x3cf   : > { %4692 = vtanh.f32 %v4118_v25  ;;  %v4126_v42 = vmul.f32 0.7978846, %v4094_v14  ;;  %v4048_v31 = vmul.f32 %v4016_v18, %v6408_v9  ;;  %v6433_v40 = vadd.f32 %v3827_v43, %v6369_v17  ;;  %v3829_v59 = vpop.f32.mrb[77].mxu1 }
 0x3d0   : > { %v4072_v34 = vadd.f32 %v4040_v15, %v6399_v32  ;;  %v6437_v0 = vadd.f32 %v3829_v59, %v6369_v17  ;;  %v3831_v41 = vpop.f32.mrb[78].mxu1  ;;  %v4087_v12 = vadd.f32 %v4055_v58, %v6380_v10  ;;  %v4095_v55 = vadd.f32 %v4063_v50, %v6389_v36 }
 0x3d1   : > { %v4685_v61 = vpop.eup %4684  ;;  %4694 = vtanh.f32 %v4126_v42  ;;  %v4080_v27 = vadd.f32 %v4048_v31, %v6408_v9  ;;  %v3992_v22 = vmul.f32 0.044715, %v6433_v40  ;;  %v6443_v29 = vadd.f32 %v3831_v41, %v6376_v54  ;;  %v3833_v6 = vpop.f32.mrb[79].mxu1 }
 0x3d2   : > { %v4104_v53 = vmul.f32 0.7978846, %v4072_v34  ;;  %v3993_v24 = vmul.f32 0.044715, %v6437_v0  ;;  %v6447_v3 = vadd.f32 %v3833_v6, %v6376_v54  ;;  %v4166_v63 = vadd.f32 1.0, %v4685_v61 }
 0x3d3   : > { %v4687_v16 = vpop.eup %4686  ;;  %v4112_v52 = vmul.f32 0.7978846, %v4080_v27  ;;  %v4024_v51 = vmul.f32 %v3992_v22, %v6433_v40  ;;  %v4000_v8 = vmul.f32 0.044715, %v6443_v29  ;;  %v4017_v19 = vmul.f32 %v3985_v37, %v6419_v20 }
 0x3d4   : > { %4696 = vtanh.f32 %v4104_v53  ;;  %v4025_v1 = vmul.f32 %v3993_v24, %v6437_v0  ;;  %v4001_v13 = vmul.f32 0.044715, %v6447_v3  ;;  %v4174_v4 = vadd.f32 1.0, %v4687_v16 }
 0x3d5   : > { %4698 = vtanh.f32 %v4112_v52  ;;  %v4056_v46 = vmul.f32 %v4024_v51, %v6433_v40  ;;  %v4032_v23 = vmul.f32 %v4000_v8, %v6443_v29  ;;  %v4119_v30 = vmul.f32 0.7978846, %v4087_v12 }
 0x3d6   : > { %v4689_v57 = vpop.eup %4688  ;;  %v4033_v62 = vmul.f32 %v4001_v13, %v6447_v3  ;;  %v4198_v7 = vmul.f32 %v4166_v63, %v6392_v39  ;;  %v4206_v25 = vmul.f32 %v4174_v4, %v3950_v47  ;;  %v4127_v15 = vmul.f32 0.7978846, %v4095_v55 }
 0x3d7   : > { %v4167_v2 = vadd.f32 1.0, %v4689_v57  ;;  %v4691_v58 = vpop.eup %4690  ;;  %v4088_v14 = vadd.f32 %v4056_v46, %v6433_v40  ;;  %v4064_v56 = vmul.f32 %v4032_v23, %v6443_v29  ;;  %4700 = vtanh.f32 %v4119_v30 }
 0x3d8   : > { %v4049_v42 = vmul.f32 %v4017_v19, %v6419_v20  ;;  %v4057_v50 = vmul.f32 %v4025_v1, %v6437_v0  ;;  %v4175_v43 = vadd.f32 1.0, %v4691_v58  ;;  %v4230_v34 = vpack.c.bf16 %v4206_v25, %v4198_v7 }
 0x3d9   : > { %v4693_v18 = vpop.eup %4692  ;;  %v4120_v31 = vmul.f32 0.7978846, %v4088_v14  ;;  %v4096_v37 = vadd.f32 %v4064_v56, %v6443_v29  ;;  %v4065_v39 = vmul.f32 %v4033_v62, %v6447_v3  ;;  %4702 = vtanh.f32 %v4127_v15 }
 0x3da   : > { %v4199_v59 = vmul.f32 %v4167_v2, %v6410_v5  ;;  %v4207_v61 = vmul.f32 %v4175_v43, %v3951_v49  ;;  %v3958_v41 = vmul.f32 0.5, %v6374_v33  ;;  %v4182_v12 = vadd.f32 1.0, %v4693_v18 }
 0x3db   : > { %v4695_v47 = vpop.eup %4694  ;;  %4704 = vtanh.f32 %v4120_v31  ;;  %v4128_v53 = vmul.f32 0.7978846, %v4096_v37  ;;  %v3966_v27 = vmul.f32 0.5, %v6385_v48  ;;  %v4073_v16 = vadd.f32 %v4041_v21, %v6404_v38 }
 0x3dc   : > { %v4190_v22 = vadd.f32 1.0, %v4695_v47  ;;  %v4231_v6 = vpack.c.bf16 %v4207_v61, %v4199_v59  ;;  %v4081_v24 = vadd.f32 %v4049_v42, %v6419_v20  ;;  %v4214_v55 = vmul.f32 %v4182_v12, %v3958_v41 }
 0x3dd   : > { %4706 = vtanh.f32 %v4128_v53  ;;  %v4105_v5 = vmul.f32 0.7978846, %v4073_v16  ;;  %v4089_v19 = vadd.f32 %v4057_v50, %v6437_v0  ;;  %v4097_v48 = vadd.f32 %v4065_v39, %v6447_v3 }
 0x3de   : > { %v4697_v63 = vpop.eup %4696  ;;  %v4222_v52 = vmul.f32 %v4190_v22, %v3966_v27  ;;  %4256 = vmatprep.subr.bf16.mxu0 %v4231_v6  ;;  %v4113_v49 = vmul.f32 0.7978846, %v4081_v24  ;;  %v3944_v21 = vmul.f32 0.5, %v6399_v32  ;;  %v3952_v1 = vmul.f32 0.5, %v6408_v9 }
 0x3df   : > { %v4168_v51 = vadd.f32 1.0, %v4697_v63  ;;  %v4699_v33 = vpop.eup %4698  ;;  %4257 = vmatpush1.bf16.msra.mxu0 %v4230_v34  ;;  %4708 = vtanh.f32 %v4105_v5  ;;  %v4121_v57 = vmul.f32 0.7978846, %v4089_v19  ;;  %v4129_v46 = vmul.f32 0.7978846, %v4097_v48 }
 0x3e0   : > { %v4238_v8 = vpack.c.bf16 %v4222_v52, %v4214_v55  ;;  %v4176_v13 = vadd.f32 1.0, %v4699_v33  ;;  %4710 = vtanh.f32 %v4113_v49  ;;  %v3959_v7 = vmul.f32 0.5, %v6380_v10 }
 0x3e1   : > { %v4701_v4 = vpop.eup %4700  ;;  %v4200_v30 = vmul.f32 %v4168_v51, %v3944_v21  ;;  %4712 = vtanh.f32 %v4121_v57  ;;  %v3967_v25 = vmul.f32 0.5, %v6389_v36  ;;  %v3960_v50 = vmul.f32 0.5, %v6433_v40  ;;  %v6481_v36 = vld [vmem:[%s6703_s6] sm:$0xf] }
 0x3e2   : > { %v4183_v23 = vadd.f32 1.0, %v4701_v4  ;;  %v4208_v62 = vmul.f32 %v4176_v13, %v3952_v1  ;;  %4714 = vtanh.f32 %v4129_v46  ;;  %v3968_v43 = vmul.f32 0.5, %v6443_v29 }
 0x3e3   : > { %v4703_v2 = vpop.eup %4702  ;;  %v3945_v59 = vmul.f32 0.5, %v6404_v38  ;;  %v3953_v40 = vmul.f32 0.5, %v6419_v20  ;;  %v3961_v6 = vmul.f32 0.5, %v6437_v0  ;;  %v3969_v16 = vmul.f32 0.5, %v6447_v3 }
 0x3e4   : > { %v4191_v58 = vadd.f32 1.0, %v4703_v2  ;;  %v4232_v14 = vpack.c.bf16 %v4208_v62, %v4200_v30  ;;  %v4215_v56 = vmul.f32 %v4183_v23, %v3959_v7 }
 0x3e5   : > { %v4705_v32 = vpop.eup %4704 }
 0x3e6   : > { %v4223_v9 = vmul.f32 %v4191_v58, %v3967_v25  ;;  %v4184_v15 = vadd.f32 1.0, %v4705_v32 }
 0x3e7   : > { %v4707_v18 = vpop.eup %4706 }
 0x3e8   : > { %v4239_v42 = vpack.c.bf16 %v4223_v9, %v4215_v56  ;;  %v4192_v34 = vadd.f32 1.0, %v4707_v18  ;;  %v4216_v10 = vmul.f32 %v4184_v15, %v3960_v50 }
 0x3e9   : > { %v4709_v31 = vpop.eup %4708 }
 0x3ea   : > { %4258 = vmatprep.subr.bf16.mxu0 %v4239_v42  ;;  %v4224_v37 = vmul.f32 %v4192_v34, %v3968_v43  ;;  %v4711_v39 = vpop.eup %4710  ;;  %v4169_v47 = vadd.f32 1.0, %v4709_v31 }
 0x3eb   : > { %4259 = vmatpush1.bf16.msra.mxu0 %v4238_v8  ;;  %v4177_v61 = vadd.f32 1.0, %v4711_v39  ;;  %v4713_v41 = vpop.eup %4712 }
 0x3ec   : > { %v4240_v29 = vpack.c.bf16 %v4224_v37, %v4216_v10  ;;  %v4715_v12 = vpop.eup %4714  ;;  %v4201_v53 = vmul.f32 %v4169_v47, %v3945_v59  ;;  %v4185_v22 = vadd.f32 1.0, %v4713_v41 }
 0x3ed   : > { %v4209_v27 = vmul.f32 %v4177_v61, %v3953_v40  ;;  %v4193_v24 = vadd.f32 1.0, %v4715_v12 }
 0x3ee   : > { %4610 = vmatmul.mubr.msk.bf16.vlgmr.msra.gmra.mrb[88].mxu0 %vm4252_vm10, %v6481_v36  ;;  %v4217_v63 = vmul.f32 %v4185_v22, %v3961_v6 }
 0x3ef   : > { %4370 = vmatprep.mubr.bf16.mxu0 %v6825_v35  ;;  %v4233_v38 = vpack.c.bf16 %v4209_v27, %v4201_v53  ;;  %v4225_v20 = vmul.f32 %v4193_v24, %v3969_v16 }
 0x3f1   : > { %4297 = vmatprep.subr.bf16.mxu1 %v4233_v38  ;;  %v4241_v55 = vpack.c.bf16 %v4225_v20, %v4217_v63 }
 0x3f2   : > { %4298 = vmatpush1.bf16.msra.mxu1 %v4232_v14 }
 0x3f3   : > { %4299 = vmatprep.subr.bf16.mxu1 %v4241_v55 }
 0x3f6   : > { %4300 = vmatpush1.bf16.msra.mxu1 %v4240_v29 }
 0x3f8   : > { %v3870_v52 = vpop.f32.mrb[80].mxu0 }
 0x3f9   : > { %v3871_v5 = vadd.f32 %v3870_v52, %v6354_v44  ;;  %v3872_v49 = vpop.f32.mrb[81].mxu0  ;;  %4611 = vmatmul.mubr.msk.bf16.vlgmr.msra.gmra.mrb[88].mxu1 %vm4252_vm10, %v6481_v36 }
 0x3fa   : > { %v6492_v51 = vadd.f32 %v3872_v49, %v6354_v44  ;;  %v3874_v0 = vpop.f32.mrb[82].mxu0  ;;  %4411 = vmatprep.mubr.bf16.mxu1 %v6825_v35 }
 0x3fb   : > { %v3978_v3 = vmul.f32 0.044715, %v3871_v5  ;;  %v3875_v33 = vadd.f32 %v3874_v0, %v6357_v45  ;;  %v3876_v8 = vpop.f32.mrb[83].mxu0  ;;  %v6513_v14 = vmul.f32 0.5, %v3871_v5 }
 0x3fc   : > { %v6498_v19 = vadd.f32 %v3876_v8, %v6357_v45  ;;  %v3979_v21 = vmul.f32 0.044715, %v6492_v51 }
 0x3fd   : > { %v4010_v48 = vmul.f32 %v3978_v3, %v3871_v5  ;;  %v3986_v1 = vmul.f32 0.044715, %v3875_v33  ;;  %v3923_v13 = vpop.f32.mrb[80].mxu1  ;;  %v6526_v47 = vmul.f32 0.5, %v3875_v33 }
 0x3fe   : > { %v6503_v4 = vadd.f32 %v3923_v13, %v6354_v44  ;;  %v3925_v57 = vpop.f32.mrb[81].mxu1  ;;  %v3987_v30 = vmul.f32 0.044715, %v6498_v19  ;;  %v4011_v56 = vmul.f32 %v3979_v21, %v6492_v51 }
 0x3ff   : > { %v4042_v46 = vmul.f32 %v4010_v48, %v3871_v5  ;;  %v4018_v23 = vmul.f32 %v3986_v1, %v3875_v33  ;;  %v6507_v62 = vadd.f32 %v3925_v57, %v6354_v44  ;;  %v3927_v2 = vpop.f32.mrb[82].mxu1 }
 0x400   : > { %v3980_v7 = vmul.f32 0.044715, %v6503_v4  ;;  %v6511_v35 = vadd.f32 %v3927_v2, %v6357_v45  ;;  %v3929_v25 = vpop.f32.mrb[83].mxu1  ;;  %v3880_v58 = vpop.f32.mrb[84].mxu0  ;;  %v4019_v37 = vmul.f32 %v3987_v30, %v6498_v19  ;;  %v4043_v29 = vmul.f32 %v4011_v56, %v6492_v51 }
 0x401   : > { %v4074_v32 = vadd.f32 %v4042_v46, %v3871_v5  ;;  %v4050_v9 = vmul.f32 %v4018_v23, %v3875_v33  ;;  %v6517_v15 = vadd.f32 %v3929_v25, %v6357_v45  ;;  %v3882_v18 = vpop.f32.mrb[85].mxu0  ;;  %v3981_v42 = vmul.f32 0.044715, %v6507_v62 }
 0x402   : > { %v4012_v44 = vmul.f32 %v3980_v7, %v6503_v4  ;;  %v3988_v50 = vmul.f32 0.044715, %v6511_v35  ;;  %v6523_v43 = vadd.f32 %v3880_v58, %v6369_v17  ;;  %v3884_v34 = vpop.f32.mrb[86].mxu0  ;;  %v6532_v61 = vadd.f32 %v3882_v18, %v6369_v17 }
 0x403   : > { %v4106_v31 = vmul.f32 0.7978846, %v4074_v32  ;;  %v4082_v10 = vadd.f32 %v4050_v9, %v3875_v33  ;;  %v3886_v39 = vpop.f32.mrb[87].mxu0  ;;  %v3989_v12 = vmul.f32 0.044715, %v6517_v15  ;;  %v4013_v22 = vmul.f32 %v3981_v42, %v6507_v62 }
 0x404   : > { %v4044_v45 = vmul.f32 %v4012_v44, %v6503_v4  ;;  %v4020_v59 = vmul.f32 %v3988_v50, %v6511_v35  ;;  %v3994_v40 = vmul.f32 0.044715, %v6523_v43  ;;  %v3995_v38 = vmul.f32 0.044715, %v6532_v61 }
 0x405   : > { %4716 = vtanh.f32 %v4106_v31  ;;  %v4114_v41 = vmul.f32 0.7978846, %v4082_v10  ;;  %v3933_v53 = vpop.f32.mrb[84].mxu1  ;;  %v6542_v63 = vadd.f32 %v3884_v34, %v6376_v54  ;;  %v6545_v20 = vadd.f32 %v3886_v39, %v6376_v54 }
 0x406   : > { %v4076_v27 = vadd.f32 %v4044_v45, %v6503_v4  ;;  %v4052_v6 = vmul.f32 %v4020_v59, %v6511_v35  ;;  %v4026_v16 = vmul.f32 %v3994_v40, %v6523_v43  ;;  %v3935_v24 = vpop.f32.mrb[85].mxu1  ;;  %v4051_v52 = vmul.f32 %v4019_v37, %v6498_v19 }
 0x407   : > { %4718 = vtanh.f32 %v4114_v41  ;;  %v3937_v55 = vpop.f32.mrb[86].mxu1  ;;  %v4021_v33 = vmul.f32 %v3989_v12, %v6517_v15  ;;  %v4002_v8 = vmul.f32 0.044715, %v6542_v63  ;;  %v6553_v48 = vadd.f32 %v3933_v53, %v6369_v17 }
 0x408   : > { %v4108_v5 = vmul.f32 0.7978846, %v4076_v27  ;;  %v4084_v49 = vadd.f32 %v4052_v6, %v6511_v35  ;;  %v4058_v0 = vmul.f32 %v4026_v16, %v6523_v43  ;;  %v3939_v3 = vpop.f32.mrb[87].mxu1  ;;  %v6556_v21 = vadd.f32 %v3935_v24, %v6369_v17 }
 0x409   : > { %v4003_v57 = vmul.f32 0.044715, %v6545_v20  ;;  %v4045_v46 = vmul.f32 %v4013_v22, %v6507_v62  ;;  %v4027_v23 = vmul.f32 %v3995_v38, %v6532_v61  ;;  %v4034_v30 = vmul.f32 %v4002_v8, %v6542_v63 }
 0x40a   : > { %4720 = vtanh.f32 %v4108_v5  ;;  %v4116_v1 = vmul.f32 0.7978846, %v4084_v49  ;;  %v4090_v13 = vadd.f32 %v4058_v0, %v6523_v43  ;;  %v3996_v2 = vmul.f32 0.044715, %v6553_v48 }
 0x40b   : > { %v6565_v25 = vadd.f32 %v3937_v55, %v6376_v54  ;;  %v6568_v17 = vadd.f32 %v3939_v3, %v6376_v54  ;;  %v4053_v58 = vmul.f32 %v4021_v33, %v6517_v15  ;;  %v4066_v32 = vmul.f32 %v4034_v30, %v6542_v63 }
 0x40c   : > { %4722 = vtanh.f32 %v4116_v1  ;;  %v4122_v7 = vmul.f32 0.7978846, %v4090_v13  ;;  %v4028_v56 = vmul.f32 %v3996_v2, %v6553_v48  ;;  %v3997_v9 = vmul.f32 0.044715, %v6556_v21 }
 0x40d   : > { %v4035_v18 = vmul.f32 %v4003_v57, %v6545_v20  ;;  %v4004_v44 = vmul.f32 0.044715, %v6565_v25  ;;  %v4075_v42 = vadd.f32 %v4043_v29, %v6492_v51  ;;  %v4098_v34 = vadd.f32 %v4066_v32, %v6542_v63 }
 0x40e   : > { %4724 = vtanh.f32 %v4122_v7  ;;  %v4060_v54 = vmul.f32 %v4028_v56, %v6553_v48  ;;  %v4005_v31 = vmul.f32 0.044715, %v6568_v17  ;;  %v4083_v10 = vadd.f32 %v4051_v52, %v6498_v19 }
 0x40f   : > { %v4717_v50 = vpop.eup %4716  ;;  %v4059_v37 = vmul.f32 %v4027_v23, %v6532_v61  ;;  %v4036_v39 = vmul.f32 %v4004_v44, %v6565_v25  ;;  %v4107_v45 = vmul.f32 0.7978846, %v4075_v42  ;;  %v4130_v41 = vmul.f32 0.7978846, %v4098_v34 }
 0x410   : > { %v4170_v59 = vadd.f32 1.0, %v4717_v50  ;;  %v4092_v12 = vadd.f32 %v4060_v54, %v6553_v48  ;;  %v4029_v29 = vmul.f32 %v3997_v9, %v6556_v21  ;;  %v4115_v53 = vmul.f32 0.7978846, %v4083_v10 }
 0x411   : > { %v4719_v40 = vpop.eup %4718  ;;  %v4067_v27 = vmul.f32 %v4035_v18, %v6545_v20  ;;  %v4068_v22 = vmul.f32 %v4036_v39, %v6565_v25  ;;  %4726 = vtanh.f32 %v4107_v45  ;;  %v4037_v24 = vmul.f32 %v4005_v31, %v6568_v17 }
 0x412   : > { %v4178_v6 = vadd.f32 1.0, %v4719_v40  ;;  %4728 = vtanh.f32 %v4130_v41  ;;  %v4124_v16 = vmul.f32 0.7978846, %v4092_v12  ;;  %v6589_v38 = vmul.f32 %v4170_v59, %v6513_v14 }
 0x413   : > { %v4100_v52 = vadd.f32 %v4068_v22, %v6565_v25  ;;  %4730 = vtanh.f32 %v4115_v53  ;;  %v4077_v49 = vadd.f32 %v4045_v46, %v6507_v62  ;;  %v4061_v0 = vmul.f32 %v4029_v29, %v6556_v21 }
 0x414   : > { %v4721_v55 = vpop.eup %4720  ;;  %v6593_v5 = vmul.f32 %v4178_v6, %v6526_v47  ;;  %4732 = vtanh.f32 %v4124_v16  ;;  %v4085_v3 = vadd.f32 %v4053_v58, %v6517_v15  ;;  %v3948_v23 = vmul.f32 0.5, %v6503_v4 }
 0x415   : > { %v4132_v8 = vmul.f32 0.7978846, %v4100_v52  ;;  %v4109_v1 = vmul.f32 0.7978846, %v4077_v49  ;;  %v4172_v13 = vadd.f32 1.0, %v4721_v55  ;;  %v3956_v47 = vmul.f32 0.5, %v6511_v35 }
 0x416   : > { %v4723_v33 = vpop.eup %4722  ;;  %v4234_v14 = vpack.c.bf16 %v6593_v5, %v6589_v38  ;;  %v4117_v57 = vmul.f32 0.7978846, %v4085_v3  ;;  %v4069_v46 = vmul.f32 %v4037_v24, %v6568_v17  ;;  %v4091_v7 = vadd.f32 %v4059_v37, %v6532_v61 }
 0x417   : > { %v4180_v30 = vadd.f32 1.0, %v4723_v33  ;;  %4734 = vtanh.f32 %v4132_v8  ;;  %v4099_v58 = vadd.f32 %v4067_v27, %v6545_v20  ;;  %v6605_v32 = vmul.f32 %v4172_v13, %v3948_v23 }
 0x418   : > { %v4725_v2 = vpop.eup %4724  ;;  %4736 = vtanh.f32 %v4109_v1  ;;  %v4123_v9 = vmul.f32 0.7978846, %v4091_v7  ;;  %v4093_v35 = vadd.f32 %v4061_v0, %v6556_v21  ;;  %v4101_v50 = vadd.f32 %v4069_v46, %v6568_v17 }
 0x419   : > { %v6607_v56 = vmul.f32 %v4180_v30, %v3956_v47  ;;  %4738 = vtanh.f32 %v4117_v57  ;;  %v4131_v18 = vmul.f32 0.7978846, %v4099_v58  ;;  %v4186_v42 = vadd.f32 1.0, %v4725_v2 }
 0x41a   : > { %4740 = vtanh.f32 %v4123_v9  ;;  %v4125_v31 = vmul.f32 0.7978846, %v4093_v35  ;;  %v3962_v37 = vmul.f32 0.5, %v6523_v43  ;;  %v3970_v39 = vmul.f32 0.5, %v6542_v63 }
 0x41b   : > { %v4236_v4 = vpack.c.bf16 %v6607_v56, %v6605_v32  ;;  %v4727_v44 = vpop.eup %4726  ;;  %4742 = vtanh.f32 %v4131_v18  ;;  %v4133_v59 = vmul.f32 0.7978846, %v4101_v50  ;;  %v3947_v41 = vmul.f32 0.5, %v6492_v51 }
 0x41c   : > { %v4729_v34 = vpop.eup %4728  ;;  %v4171_v54 = vadd.f32 1.0, %v4727_v44  ;;  %v3955_v12 = vmul.f32 0.5, %v6498_v19  ;;  %4744 = vtanh.f32 %v4125_v31  ;;  %v4218_v53 = vmul.f32 %v4186_v42, %v3962_v37 }
 0x41d   : > { %v4731_v10 = vpop.eup %4730  ;;  %v4194_v45 = vadd.f32 1.0, %v4729_v34  ;;  %4746 = vtanh.f32 %v4133_v59  ;;  %v3964_v63 = vmul.f32 0.5, %v6553_v48  ;;  %v3972_v52 = vmul.f32 0.5, %v6565_v25  ;;  %v6855_v34 = vld [vmem:[#allocation41_spill] sm:$0xff] }
 0x41e   : > { %v4733_v40 = vpop.eup %4732  ;;  %v4179_v29 = vadd.f32 1.0, %v4731_v10  ;;  %v4203_v22 = vmul.f32 %v4171_v54, %v3947_v41  ;;  %v3949_v19 = vmul.f32 0.5, %v6507_v62  ;;  %v3957_v0 = vmul.f32 0.5, %v6517_v15  ;;  %v6856_v10 = vld [vmem:[#allocation22_spill] sm:$0xff]  ;;  %v6857_v41 = vld [vmem:[#allocation35_spill] sm:$0xff] }
 0x41f   : > { %v4226_v27 = vmul.f32 %v4194_v45, %v3970_v39  ;;  %v4188_v16 = vadd.f32 1.0, %v4733_v40  ;;  %v3963_v25 = vmul.f32 0.5, %v6532_v61  ;;  %v3971_v30 = vmul.f32 0.5, %v6545_v20 }
 0x420   : > { %v4211_v6 = vmul.f32 %v4179_v29, %v3955_v12  ;;  %v3973_v56 = vmul.f32 0.5, %v6568_v17 }
 0x421   : > { %v4735_v24 = vpop.eup %4734  ;;  %v4242_v38 = vpack.c.bf16 %v4226_v27, %v4218_v53  ;;  %v4220_v33 = vmul.f32 %v4188_v16, %v3964_v63  ;;  %v6858_v53 = vld [vmem:[#allocation16_spill] sm:$0xff] }
 0x422   : > { %v4737_v43 = vpop.eup %4736  ;;  %v4235_v55 = vpack.c.bf16 %v4211_v6, %v4203_v22  ;;  %v4196_v5 = vadd.f32 1.0, %v4735_v24 }
 0x423   : > { %v4739_v51 = vpop.eup %4738  ;;  %v4173_v49 = vadd.f32 1.0, %v4737_v43 }
 0x424   : > { %4338 = vmatprep.subr.bf16.mxu0 %v4235_v55  ;;  %v4181_v3 = vadd.f32 1.0, %v4739_v51  ;;  %v4228_v8 = vmul.f32 %v4196_v5, %v3972_v52  ;;  %v4741_v1 = vpop.eup %4740 }
 0x425   : > { %4339 = vmatpush1.bf16.msra.mxu0 %v4234_v14  ;;  %v4743_v13 = vpop.eup %4742  ;;  %v4205_v57 = vmul.f32 %v4173_v49, %v3949_v19  ;;  %v4187_v47 = vadd.f32 1.0, %v4741_v1  ;;  %v3965_v14 = vmul.f32 0.5, %v6556_v21  ;;  %v4250_v21 = vpop.permute.xlu1 %4249 }
 0x426   : > { %v4213_v23 = vmul.f32 %v4181_v3, %v3957_v0  ;;  %v4244_v48 = vpack.c.bf16 %v4228_v8, %v4220_v33  ;;  %v4195_v2 = vadd.f32 1.0, %v4743_v13  ;;  %v4745_v62 = vpop.eup %4744 }
 0x427   : > { %v4747_v7 = vpop.eup %4746  ;;  %v4219_v58 = vmul.f32 %v4187_v47, %v3963_v25  ;;  %v4189_v32 = vadd.f32 1.0, %v4745_v62 }
 0x428   : > { %v4237_v46 = vpack.c.bf16 %v4213_v23, %v4205_v57  ;;  %v4227_v15 = vmul.f32 %v4195_v2, %v3971_v30  ;;  %v4197_v9 = vadd.f32 1.0, %v4747_v7 }
 0x429   : > { %v4221_v35 = vmul.f32 %v4189_v32, %v3965_v14 }
 0x42a   : > { %4379 = vmatprep.subr.bf16.mxu1 %v4237_v46  ;;  %v4243_v18 = vpack.c.bf16 %v4227_v15, %v4219_v58  ;;  %v4229_v61 = vmul.f32 %v4197_v9, %v3973_v56 }
 0x42b   : > { %4380 = vmatpush1.bf16.msra.mxu1 %v4236_v4 }
 0x42c   : > { %4340 = vmatprep.subr.bf16.mxu0 %v4243_v18  ;;  %v4245_v20 = vpack.c.bf16 %v4229_v61, %v4221_v35 }
 0x42d   : > { %4341 = vmatpush1.bf16.msra.mxu0 %v4242_v38 }
 0x42e   : > { %4381 = vmatprep.subr.bf16.mxu1 %v4245_v20 }
 0x42f   : > { %4382 = vmatpush1.bf16.msra.mxu1 %v4244_v48 }
 0x430   : > { %4612 = vmatmul.mubr.msk.bf16.vlgmr.msra.gmra.mrb[92].mxu0 %vm4252_vm10, %v6481_v36 }
 0x432   : > { %4613 = vmatmul.mubr.msk.bf16.vlgmr.msra.gmra.mrb[92].mxu1 %vm4252_vm10, %v6481_v36 }
 0x4c1   : > { %v4290_v44 = vpop.f32.mrb[88].mxu0 }
 0x4c2   : > { %v4291_v17 = vadd.f32 %v4290_v44, %v4250_v21  ;;  %v4292_v42 = vpop.f32.mrb[89].mxu0 }
 0x4c3   : > { %v4293_v4 = vadd.f32 %v4292_v42, %v4250_v21  ;;  %v4294_v50 = vpop.f32.mrb[90].mxu0 }
 0x4c4   : > { %v4420_v54 = vadd.f32 %v4291_v17, %v6855_v34  ;;  %v4295_v31 = vpop.f32.mrb[91].mxu0 }
 0x4c5   : > { %v4421_v37 = vadd.f32 %v4293_v4, %v6856_v10 }
 0x4c6   : > { %4428 = vst [vmem:[%s6632_s21] sm:$0xff] %v4420_v54 }
 0x4c7   : > { %4429 = vst [vmem:[%s6632_s21 + $0x8] sm:$0xff] %v4421_v37 }
 0x4cc   : > { %v4331_v36 = vpop.f32.mrb[88].mxu1 }
 0x4cd   : > { %v4332_v39 = vadd.f32 %v4331_v36, %v4250_v21  ;;  %v4333_v45 = vpop.f32.mrb[89].mxu1 }
 0x4ce   : > { %v4334_v59 = vadd.f32 %v4333_v45, %v4250_v21  ;;  %v4335_v40 = vpop.f32.mrb[90].mxu1 }
 0x4cf   : > { %v4422_v12 = vadd.f32 %v4332_v39, %v6857_v41  ;;  %v4336_v29 = vpop.f32.mrb[91].mxu1 }
 0x4d0   : > { %v4423_v27 = vadd.f32 %v4334_v59, %v6858_v53 }
 0x4d1   : > { %4430 = vst [vmem:[%s6632_s21 + $0x10] sm:$0xff] %v4422_v12 }
 0x4d2   : > { %4431 = vst [vmem:[%s6632_s21 + $0x18] sm:$0xff] %v4423_v27 }
 0x503   : > { %v4372_v22 = vpop.f32.mrb[92].mxu0 }
 0x504   : > { %v4373_v6 = vadd.f32 %v4372_v22, %v4250_v21  ;;  %v4374_v16 = vpop.f32.mrb[93].mxu0 }
 0x505   : > { %v4375_v24 = vadd.f32 %v4374_v16, %v4250_v21  ;;  %v4376_v38 = vpop.f32.mrb[94].mxu0  ;;  %v4413_v55 = vpop.f32.mrb[92].mxu1 }
 0x506   : > { %v4424_v43 = vadd.f32 %v4373_v6, %v6316_v26  ;;  %v4377_v63 = vpop.f32.mrb[95].mxu0  ;;  %v4414_v5 = vadd.f32 %v4413_v55, %v4250_v21  ;;  %v4415_v51 = vpop.f32.mrb[93].mxu1 }
 0x507   : > { %v4425_v52 = vadd.f32 %v4375_v24, %v6313_v60  ;;  %v4416_v19 = vadd.f32 %v4415_v51, %v4250_v21  ;;  %v4417_v49 = vpop.f32.mrb[94].mxu1 }
 0x508   : > { %4432 = vst [vmem:[%s6632_s21 + $0x20] sm:$0xff] %v4424_v43  ;;  %v4426_v0 = vadd.f32 %v4414_v5, %v6327_v11  ;;  %v4418_v3 = vpop.f32.mrb[95].mxu1 }
 0x509   : > { %4433 = vst [vmem:[%s6632_s21 + $0x28] sm:$0xff] %v4425_v52  ;;  %v4427_v26 = vadd.f32 %v4416_v19, %v6330_v28 }
 0x50a   : > { %4434 = vst [vmem:[%s6632_s21 + $0x30] sm:$0xff] %v4426_v0 }
 0x50b   : > { %4435 = vst [vmem:[%s6632_s21 + $0x38] sm:$0xff] %v4427_v26 }
 0x50c   : > { %4798 = shalt.err (!%p4795_p3)
}
 0x50d   : > { %s4799_s17 = scalar_lea.hbm %s6651_s8, 1024  ;;  %s4803_s29 = scalar_lea.hbm %s6704_s7, 2048 }
 0x50e   : > { %p4800_p5 = scmp.ne.s32.totalorder %s6651_s8, %s4799_s17  ;;  %p4804_p9 = scmp.lt.u32.totalorder %s6651_s8, %s6704_s7 }
 0x50f   : > { %p4805_p0 = scmp.lt.u32.totalorder %s4803_s29, %s4799_s17  ;;  %p4807_p6 = scmp.lt.u32.totalorder %s4799_s17, %s6651_s8 }
 0x510   : > { %p4801_p7 = pnand %p4800_p5, %p6859_p11 }
 0x511   : > { %p4806_p2 = por %p4805_p0, %p4804_p9 }
 0x512   : > { %p4802_p8 = pneg %p4801_p7 }
 0x513   : > { %p4808_p12 = por %p4807_p6, %p4806_p2 }
 0x515   : > { %p4809_p13 = pnand %p4808_p12, %p4802_p8 }
 0x517   : > { %4812 = shalt.err (!%p4809_p13)
}
 0x518   : > { %4623 = dma.vmem_to_hbm [thread:$0]  (%p6859_p11), %s6653_s9, 1024, %s6651_s8, %s4437_s28  }
 0x519 PF: > { %s4463_s16 = sand.u32 1, %s4839_s24   ;;  %p6860_p4 = scmp.ne.s32.totalorder %s6765_s14, 0 }
 0x51a   : > { %p6861_p10 = scmp.ge.s32.totalorder %s4851_s27, 2  ;;  %s4464_s19 = scalar_lea.sflag [#allocation6], %s4463_s16 }
 0x51c   : > { %p4630_p1 = pnand %p6861_p10, %p6860_p4 }
 0x51e   : > { %4834 = dma.done.wait (!%p4630_p1), %s4464_s19, 1024  }
 0x51f   : > { %4836 = vsyncadd (!%p4630_p1), %s4464_s19, 4294966272  ;;  %p20_p3 = scmp.ge.s32.totalorder %s4933_s30, 4   ;;  %s6862_s24 = smov %s4843_s25 }
 0x520   : > { %s6863_s25 = smov %s4847_s26  ;;  %s6864_s26 = smov %s4945_s10 }
 0x521   : > { %s6865_s27 = smov %s4933_s30  ;;  %22 = sbr.rel (!%p20_p3) target bundleno = 5 (0x5), region = 116 }
 0x528   :  { %4469 = vsyncpa [#allocation5], 1 }
 0x529   :  { %4471 = vsyncpa [#allocation5 + $0x1], 1 }
 0x52a   :  { %4472 = vsyncpa [#allocation6], 1 }
 0x52b   :  { %4474 = vsyncpa [#allocation6 + $0x1], 1 }

</bundles_post_ra>
